<compile_context>
chip_gen: v6e
topology: v6e:2x2x1
jax: 0.10.0
libtpu: 0.0.40
codegen_flags: <defaults>
</compile_context>

<pallas_src>
import functools

import jax
import jax.numpy as jnp
from jax import lax
from jax.experimental import pallas as pl
from jax.experimental.pallas import tpu as pltpu

EPS = 1e-5
LANES = 128
VMEM_LIMIT = 32 * 1024 * 1024  # explicit scoped-VMEM cap (safe on v5e/v6e/v7x)


def _round_up(n, m):
    return (n + m - 1) // m * m


def _pad_last(x, size):
    pad = size - x.shape[-1]
    if pad == 0:
        return x
    widths = [(0, 0)] * (x.ndim - 1) + [(0, pad)]
    return jnp.pad(x, widths)


# ---------------------------------------------------------------------------
# Kernel 1 / 3: pointwise (1x1) conv as a row-tiled matmul, optionally with the
# previous layer's BN+ReLU fused in front, plus per-tile BN partial statistics.
# Activations are stored bf16; stats are computed from the stored (rounded)
# values so the downstream BN is exactly consistent with the stored tensor.
# ---------------------------------------------------------------------------
def _pw_conv_stats_kernel(fuse_bn_relu, x_ref, scale_ref, shift_ref, w_ref,
                          out_ref, stats_ref):
    xf = x_ref[...].astype(jnp.float32)               # (TM, Cin_p) f32
    if fuse_bn_relu:                                   # BN + ReLU of previous layer
        xf = jnp.maximum(xf * scale_ref[...] + shift_ref[...], 0.0)
    # bf16 MXU inputs, f32 accumulation.
    h = jnp.dot(xf.astype(jnp.bfloat16), w_ref[...],
                preferred_element_type=jnp.float32)    # (TM, Cout_p) f32
    hq = h.astype(out_ref.dtype)                       # bf16 storage
    out_ref[...] = hq
    hf = hq.astype(jnp.float32)                        # stats from stored values
    s = jnp.sum(hf, axis=0, keepdims=True)
    q = jnp.sum(hf * hf, axis=0, keepdims=True)
    stats_ref[...] = jnp.concatenate([s, q], axis=0)[None]   # (1, 2, Cout_p)


def _pw_conv_stats(x2d, scale, shift, w, *, tm, fuse_bn_relu,
                   out_dtype=jnp.bfloat16):
    M, cin_p = x2d.shape
    cout_p = w.shape[1]
    n_tiles = M // tm
    cost = pl.CostEstimate(
        flops=2 * M * cin_p * cout_p,
        transcendentals=0,
        bytes_accessed=(x2d.dtype.itemsize * M * cin_p
                        + 2 * M * cout_p + 2 * cin_p * cout_p))
    kernel = functools.partial(_pw_conv_stats_kernel, fuse_bn_relu)
    return pl.pallas_call(
        kernel,
        out_shape=(jax.ShapeDtypeStruct((M, cout_p), out_dtype),
                   jax.ShapeDtypeStruct((n_tiles, 2, cout_p), jnp.float32)),
        grid=(n_tiles,),
        in_specs=[
            pl.BlockSpec((tm, cin_p), lambda i: (i, 0)),      # activations: row tile
            pl.BlockSpec((1, cin_p), lambda i: (0, 0)),       # BN scale (resident)
            pl.BlockSpec((1, cin_p), lambda i: (0, 0)),       # BN shift (resident)
            pl.BlockSpec((cin_p, cout_p), lambda i: (0, 0)),  # weights (resident)
        ],
        out_specs=(
            pl.BlockSpec((tm, cout_p), lambda i: (i, 0)),
            pl.BlockSpec((1, 2, cout_p), lambda i: (i, 0, 0)),
        ),
        compiler_params=pltpu.CompilerParams(
            dimension_semantics=("parallel",),
            vmem_limit_bytes=VMEM_LIMIT),
        cost_estimate=cost,
    )(x2d, scale, shift, w)


# ---------------------------------------------------------------------------
# Kernel 2: fused BN1+ReLU + 3x3 conv (stride 1, pad 1) per image, via im2col,
# plus per-image BN2 partial statistics.
# ---------------------------------------------------------------------------
def _conv3x3_kernel(H, W, x_ref, scale_ref, shift_ref, w_ref,
                    out_ref, stats_ref, pad_ref, col_ref):
    C = x_ref.shape[-1]
    # BN1 + ReLU of the raw conv1 output (f32 elementwise).
    h1 = jnp.maximum(x_ref[0].astype(jnp.float32) * scale_ref[...]
                     + shift_ref[...], 0.0)                           # (H, W, C)

    # Zero only the 1-element halo ring; the interior is written exactly once.
    pad_ref[0:1, :, :] = jnp.zeros((1, W + 2, C), jnp.float32)
    pad_ref[H + 1:H + 2, :, :] = jnp.zeros((1, W + 2, C), jnp.float32)
    pad_ref[:, 0:1, :] = jnp.zeros((H + 2, 1, C), jnp.float32)
    pad_ref[:, W + 1:W + 2, :] = jnp.zeros((H + 2, 1, C), jnp.float32)
    pad_ref[1:H + 1, 1:W + 1, :] = h1

    # im2col: gather the 9 taps into one bf16 (H*W, 9*C) operand so the MXU
    # runs a single full-depth contraction instead of 9 shallow matmuls.
    for kh in range(3):
        for kw in range(3):
            tap = kh * 3 + kw
            col_ref[:, :, tap * C:(tap + 1) * C] = (
                pad_ref[kh:kh + H, kw:kw + W, :].astype(jnp.bfloat16))

    col = col_ref[...].reshape(H * W, 9 * C)
    h2 = jnp.dot(col, w_ref[...], preferred_element_type=jnp.float32)  # (H*W, C)
    hq = h2.astype(out_ref.dtype)
    out_ref[...] = hq
    hf = hq.astype(jnp.float32)
    s = jnp.sum(hf, axis=0, keepdims=True)
    q = jnp.sum(hf * hf, axis=0, keepdims=True)
    stats_ref[...] = jnp.concatenate([s, q], axis=0)[None]


def _conv3x3_stats(h1_raw_nhwc, scale, shift, w2_mat):
    N, H, W, C = h1_raw_nhwc.shape
    HW = H * W
    M = N * HW
    cost = pl.CostEstimate(
        flops=2 * M * 9 * C * C,
        transcendentals=0,
        bytes_accessed=4 * M * C + 2 * 9 * C * C)
    kernel = functools.partial(_conv3x3_kernel, H, W)
    return pl.pallas_call(
        kernel,
        out_shape=(jax.ShapeDtypeStruct((M, C), jnp.bfloat16),
                   jax.ShapeDtypeStruct((N, 2, C), jnp.float32)),
        grid=(N,),
        in_specs=[
            pl.BlockSpec((1, H, W, C), lambda n: (n, 0, 0, 0)),
            pl.BlockSpec((1, C), lambda n: (0, 0)),
            pl.BlockSpec((1, C), lambda n: (0, 0)),
            pl.BlockSpec((9 * C, C), lambda n: (0, 0)),
        ],
        out_specs=(
            pl.BlockSpec((HW, C), lambda n: (n, 0)),
            pl.BlockSpec((1, 2, C), lambda n: (n, 0, 0)),
        ),
        scratch_shapes=[
            pltpu.VMEM((H + 2, W + 2, C), jnp.float32),    # halo-padded activations
            pltpu.VMEM((H, W, 9 * C), jnp.bfloat16),       # im2col operand
        ],
        compiler_params=pltpu.CompilerParams(
            dimension_semantics=("parallel",),
            vmem_limit_bytes=VMEM_LIMIT),
        cost_estimate=cost,
    )(h1_raw_nhwc, scale, shift, w2_mat)


# ---------------------------------------------------------------------------
# Kernel 4: BN3 + residual add + ReLU (row-tiled elementwise).
# ---------------------------------------------------------------------------
def _bn_residual_relu_kernel(h_ref, x_ref, scale_ref, shift_ref, out_ref):
    h = h_ref[...].astype(jnp.float32)
    out_ref[...] = jnp.maximum(
        h * scale_ref[...] + shift_ref[...] + x_ref[...], 0.0)


def _bn_residual_relu(h3_raw, x2d, scale, shift, *, tm):
    M, cout_p = h3_raw.shape
    n_tiles = M // tm
    cost = pl.CostEstimate(flops=4 * M * cout_p, transcendentals=0,
                           bytes_accessed=10 * M * cout_p)
    return pl.pallas_call(
        _bn_residual_relu_kernel,
        out_shape=jax.ShapeDtypeStruct((M, cout_p), jnp.float32),
        grid=(n_tiles,),
        in_specs=[
            pl.BlockSpec((tm, cout_p), lambda i: (i, 0)),
            pl.BlockSpec((tm, cout_p), lambda i: (i, 0)),
            pl.BlockSpec((1, cout_p), lambda i: (0, 0)),
            pl.BlockSpec((1, cout_p), lambda i: (0, 0)),
        ],
        out_specs=pl.BlockSpec((tm, cout_p), lambda i: (i, 0)),
        compiler_params=pltpu.CompilerParams(
            dimension_semantics=("parallel",),
            vmem_limit_bytes=VMEM_LIMIT),
        cost_estimate=cost,
    )(h3_raw, x2d, scale, shift)


# ---------------------------------------------------------------------------
# Tiny XLA glue: finalize per-tile (sum, sumsq) partials into BN scale/shift.
# (For very large N*H*W use Welford / per-tile mean subtraction for precision.)
# ---------------------------------------------------------------------------
def _finalize_stats(partials, gamma, beta, m):
    tot = jnp.sum(partials, axis=0)                    # (2, C)
    mean = tot[0:1] / m
    var = jnp.maximum(tot[1:2] / m - mean * mean, 0.0)  # biased var (training BN)
    scale = gamma * lax.rsqrt(var + EPS)
    shift = beta - mean * scale
    return scale, shift


# ---------------------------------------------------------------------------
# Public forward pass.
# ---------------------------------------------------------------------------
def bottleneck_forward(x_nchw, kp, *, tm=512):
    """x_nchw: (N, Cin, H, W) f32 with Cin == 4*out_channel. Returns NCHW f32."""
    N, Cin, H, W = x_nchw.shape
    cin_r, cmid_r, cout_r = kp["dims"]
    assert Cin == cin_r and cout_r == Cin, "residual requires Cin == 4*out_channel"
    cin_p, cmid_p = kp["w1"].shape
    cout_p = kp["w3"].shape[1]
    assert cin_p == cout_p

    M = N * H * W
    assert M % tm == 0, "row tile must divide N*H*W"

    x_nhwc = jnp.transpose(x_nchw, (0, 2, 3, 1)).astype(jnp.float32)
    x2d = _pad_last(x_nhwc.reshape(M, Cin), cin_p)      # (M, Cin_p) f32 (residual)

    ones = jnp.ones((1, cin_p), jnp.float32)             # dummy (no BN before conv1)
    zeros = jnp.zeros((1, cin_p), jnp.float32)

    # stage 1: conv1 (1x1) + BN1 partial stats (bf16 intermediate)
    h1_raw, st1 = _pw_conv_stats(x2d, ones, zeros, kp["w1"],
                                 tm=tm, fuse_bn_relu=False)
    scale1, shift1 = _finalize_stats(st1, kp["g1"], kp["be1"], M)

    # stage 2: BN1+ReLU fused into 3x3 conv (im2col) + BN2 partial stats
    h2_raw, st2 = _conv3x3_stats(h1_raw.reshape(N, H, W, cmid_p),
                                 scale1, shift1, kp["w2"])
    scale2, shift2 = _finalize_stats(st2, kp["g2"], kp["be2"], M)

    # stage 3: BN2+ReLU fused into conv3 (1x1) + BN3 partial stats
    h3_raw, st3 = _pw_conv_stats(h2_raw, scale2, shift2, kp["w3"],
                                 tm=tm, fuse_bn_relu=True)
    scale3, shift3 = _finalize_stats(st3, kp["g3"], kp["be3"], M)

    # stage 4: BN3 + residual + ReLU (residual stays f32)
    out2d = _bn_residual_relu(h3_raw, x2d, scale3, shift3, tm=tm)

    out = out2d.reshape(N, H, W, cout_p)[..., :cout_r]
    return jnp.transpose(out, (0, 3, 1, 2))


# ---------------------------------------------------------------------------
# Parameters (PyTorch-style provenance) + packing into kernel layouts.
# ---------------------------------------------------------------------------
def init_params(key, in_channel, out_channel):
    expansion = 4
    Cin, Cmid, Cout = in_channel, out_channel, out_channel * expansion
    ks = jax.random.split(key, 6)

    def snap(w):  # snap weights to bf16-representable values (kernel stores bf16)
        return w.astype(jnp.bfloat16).astype(jnp.float32)

    w1_oihw = snap(jax.random.normal(ks[0], (Cmid, Cin, 1, 1), jnp.float32) * 0.2)
    w2_oihw = snap(jax.random.normal(ks[1], (Cmid, Cmid, 3, 3), jnp.float32) * 0.2)
    w3_oihw = snap(jax.random.normal(ks[2], (Cout, Cmid, 1, 1), jnp.float32) * 0.2)
    # Conv biases exist in the PyTorch module but cancel exactly under
    # training-mode BatchNorm; the reference keeps them, the kernels skip them.
    b1 = jax.random.normal(ks[3], (Cmid,), jnp.float32) * 0.1
    b2 = jax.random.normal(ks[4], (Cmid,), jnp.float32) * 0.1
    b3 = jax.random.normal(ks[5], (Cout,), jnp.float32) * 0.1

    return dict(
        w1=jnp.transpose(w1_oihw[:, :, 0, 0]),          # (Cin, Cmid)
        w2=jnp.transpose(w2_oihw, (2, 3, 1, 0)),        # HWIO (3,3,Cmid,Cmid)
        w3=jnp.transpose(w3_oihw[:, :, 0, 0]),          # (Cmid, Cout)
        b1=b1, b2=b2, b3=b3,
        g1=jnp.ones((Cmid,), jnp.float32), be1=jnp.zeros((Cmid,), jnp.float32),
        g2=jnp.ones((Cmid,), jnp.float32), be2=jnp.zeros((Cmid,), jnp.float32),
        g3=jnp.ones((Cout,), jnp.float32), be3=jnp.zeros((Cout,), jnp.float32),
    )


def pack_params(raw):
    w1, w2, w3 = raw["w1"], raw["w2"], raw["w3"]
    Cin, Cmid = w1.shape
    Cout = w3.shape[1]
    cin_p, cmid_p, cout_p = (_round_up(c, LANES) for c in (Cin, Cmid, Cout))

    w1p = jnp.zeros((cin_p, cmid_p), jnp.float32).at[:Cin, :Cmid].set(w1)
    w2p = jnp.zeros((3, 3, cmid_p, cmid_p), jnp.float32).at[:, :, :Cmid, :Cmid].set(w2)
    w3p = jnp.zeros((cmid_p, cout_p), jnp.float32).at[:Cmid, :Cout].set(w3)

    def bn_pad(g, b, cp):
        gp = jnp.ones((1, cp), jnp.float32).at[0, :g.shape[0]].set(g)
        bp = jnp.zeros((1, cp), jnp.float32).at[0, :b.shape[0]].set(b)
        return gp, bp

    g1, be1 = bn_pad(raw["g1"], raw["be1"], cmid_p)
    g2, be2 = bn_pad(raw["g2"], raw["be2"], cmid_p)
    g3, be3 = bn_pad(raw["g3"], raw["be3"], cout_p)

    return dict(
        w1=w1p.astype(jnp.bfloat16),
        w2=w2p.reshape(9 * cmid_p, cmid_p).astype(jnp.bfloat16),  # im2col weight
        w3=w3p.astype(jnp.bfloat16),
        g1=g1, be1=be1, g2=g2, be2=be2, g3=g3, be3=be3,
        dims=(Cin, Cmid, Cout))


# ---------------------------------------------------------------------------
# Pure-JAX (XLA, f32, with biases) reference matching the PyTorch module in
# training-mode BatchNorm semantics.
# ---------------------------------------------------------------------------
def reference_forward(x_nchw, raw):
    x = jnp.transpose(x_nchw, (0, 2, 3, 1))

    def bn(h, g, b):
        m = jnp.mean(h, axis=(0, 1, 2), keepdims=True)
        v = jnp.mean((h - m) ** 2, axis=(0, 1, 2), keepdims=True)
        return (h - m) * lax.rsqrt(v + EPS) * g + b

    dn = ("NHWC", "HWIO", "NHWC")
    h = lax.conv_general_dilated(x, raw["w1"][None, None], (1, 1), "VALID",
                                 dimension_numbers=dn) + raw["b1"]
    h = jax.nn.relu(bn(h, raw["g1"], raw["be1"]))
    h = lax.conv_general_dilated(h, raw["w2"], (1, 1), ((1, 1), (1, 1)),
                                 dimension_numbers=dn) + raw["b2"]
    h = jax.nn.relu(bn(h, raw["g2"], raw["be2"]))
    h = lax.conv_general_dilated(h, raw["w3"][None, None], (1, 1), "VALID",
                                 dimension_numbers=dn) + raw["b3"]
    h = bn(h, raw["g3"], raw["be3"])
    return jnp.transpose(jax.nn.relu(h + x), (0, 3, 1, 2))


# TODO(synk): BatchNorm running-stats buffer updates (momentum side effect) are
# not emitted; they do not affect the training-mode forward output.

if __name__ == "__main__":
    key = jax.random.PRNGKey(0)
    k_x, k_p = jax.random.split(key)

    # Residual add requires in_channel == out_channel * expansion.
    N, Cin, H, W = 2, 16, 16, 16
    out_channel = 4                       # -> Cout = 16 == Cin

    x = jax.random.normal(k_x, (N, Cin, H, W), jnp.float32)
    raw = init_params(k_p, Cin, out_channel)
    kp = pack_params(raw)

    # tm=128 so the toy problem still exercises a 4-step pipelined grid;
    # at production ResNet sizes use 512-1024 rows per tile.
    fwd = jax.jit(lambda xx: bottleneck_forward(xx, kp, tm=128))
    y = jax.block_until_ready(fwd(x))
    y_ref = jax.block_until_ready(reference_forward(x, raw))

    assert y.shape == (N, out_channel * 4, H, W)
    max_err = float(jnp.max(jnp.abs(y - y_ref)))
    # bf16 MXU inputs + bf16 inter-stage activation storage vs an f32 reference
    # through three batch-stat BN layers -> ~1e-2 absolute is expected.
    assert jnp.allclose(y, y_ref, atol=4e-2, rtol=4e-2), f"mismatch: {max_err}"

    print("KERNEL_OK")
</pallas_src>

<mosaic_0001>
module attributes {stable_mosaic.version = 11 : i64} {
  func.func @_pw_conv_stats_kernel(%arg0: i32, %arg1: memref<128x128xf32, #tpu.memory_space<vmem>>, %arg2: memref<1x128xf32, #tpu.memory_space<vmem>>, %arg3: memref<1x128xf32, #tpu.memory_space<vmem>>, %arg4: memref<128x128xbf16, #tpu.memory_space<vmem>>, %arg5: memref<128x128xbf16, #tpu.memory_space<vmem>>, %arg6: memref<1x2x128xf32, #tpu.memory_space<vmem>>) attributes {dimension_semantics = [#tpu.dimension_semantics<parallel>], iteration_bounds = array<i64: 4>, scalar_prefetch = 0 : i64, scratch_operands = 0 : i64, tpu.core_type = #tpu.core_type<tc>, window_params = [{transform_indices = @transform_0, window_bounds = array<i64: 128, 128>}, {pipeline_mode = #tpu.pipeline_mode<synchronous>, transform_indices = @transform_1, window_bounds = array<i64: 1, 128>}, {pipeline_mode = #tpu.pipeline_mode<synchronous>, transform_indices = @transform_2, window_bounds = array<i64: 1, 128>}, {pipeline_mode = #tpu.pipeline_mode<synchronous>, transform_indices = @transform_3, window_bounds = array<i64: 128, 128>}, {transform_indices = @transform_4, window_bounds = array<i64: 128, 128>}, {transform_indices = @transform_5, window_bounds = array<i64: 1, 2, 128>}]} {
    %c0 = arith.constant 0 : index
    %c0_0 = arith.constant 0 : index
    %0 = vector.load %arg1[%c0, %c0_0] : memref<128x128xf32, #tpu.memory_space<vmem>>, vector<128x128xf32>
    %1 = arith.truncf %0 : vector<128x128xf32> to vector<128x128xbf16>
    %c0_1 = arith.constant 0 : index
    %c0_2 = arith.constant 0 : index
    %2 = vector.load %arg4[%c0_1, %c0_2] : memref<128x128xbf16, #tpu.memory_space<vmem>>, vector<128x128xbf16>
    %cst = arith.constant dense<0.000000e+00> : vector<128x128xf32>
    %3 = tpu.matmul %1, %2, %cst {dimension_numbers = #tpu.dot_dimension_numbers<[1], [0], [0], [1], [0, 0, 1, 1], [], []>} : vector<128x128xbf16>, vector<128x128xbf16>, vector<128x128xf32> -> vector<128x128xf32>
    %4 = arith.truncf %3 : vector<128x128xf32> to vector<128x128xbf16>
    %c0_3 = arith.constant 0 : index
    %c0_4 = arith.constant 0 : index
    %5 = vector.load %arg5[%c0_3, %c0_4] : memref<128x128xbf16, #tpu.memory_space<vmem>>, vector<128x128xbf16>
    tpu.vector_store %arg5[%c0_3, %c0_4], %4 {strides = array<i32>} : memref<128x128xbf16, #tpu.memory_space<vmem>>, vector<128x128xbf16>,
    %6 = arith.extf %4 : vector<128x128xbf16> to vector<128x128xf32>
    %cst_5 = arith.constant dense<0.000000e+00> : vector<128xf32>
    %7 = vector.multi_reduction <add>, %6, %cst_5 [0] : vector<128x128xf32> to vector<128xf32>
    %8 = vector.shape_cast %7 : vector<128xf32> to vector<1x128xf32>
    %9 = arith.mulf %6, %6 : vector<128x128xf32>
    %cst_6 = arith.constant dense<0.000000e+00> : vector<128xf32>
    %10 = vector.multi_reduction <add>, %9, %cst_6 [0] : vector<128x128xf32> to vector<128xf32>
    %11 = vector.shape_cast %10 : vector<128xf32> to vector<1x128xf32>
    %12 = tpu.concatenate %8, %11 in 0 : vector<1x128xf32>, vector<1x128xf32> -> vector<2x128xf32>
    %13 = vector.shape_cast %12 : vector<2x128xf32> to vector<1x2x128xf32>
    %c0_7 = arith.constant 0 : index
    %c0_8 = arith.constant 0 : index
    %c0_9 = arith.constant 0 : index
    %14 = vector.load %arg6[%c0_7, %c0_8, %c0_9] : memref<1x2x128xf32, #tpu.memory_space<vmem>>, vector<1x2x128xf32>
    tpu.vector_store %arg6[%c0_7, %c0_8, %c0_9], %13 {strides = array<i32>} : memref<1x2x128xf32, #tpu.memory_space<vmem>>, vector<1x2x128xf32>,
    return
  }
  func.func @transform_0(%arg0: i32) -> (i32, i32) {
    %c0_i32 = arith.constant 0 : i32
    %c0_i32_0 = arith.constant 0 : i32
    return %arg0, %c0_i32 : i32, i32
  }
  func.func @transform_1(%arg0: i32) -> (i32, i32) {
    %c0_i32 = arith.constant 0 : i32
    %c0_i32_0 = arith.constant 0 : i32
    %c0_i32_1 = arith.constant 0 : i32
    return %c0_i32, %c0_i32_0 : i32, i32
  }
  func.func @transform_2(%arg0: i32) -> (i32, i32) {
    %c0_i32 = arith.constant 0 : i32
    %c0_i32_0 = arith.constant 0 : i32
    %c0_i32_1 = arith.constant 0 : i32
    return %c0_i32, %c0_i32_0 : i32, i32
  }
  func.func @transform_3(%arg0: i32) -> (i32, i32) {
    %c0_i32 = arith.constant 0 : i32
    %c0_i32_0 = arith.constant 0 : i32
    %c0_i32_1 = arith.constant 0 : i32
    return %c0_i32, %c0_i32_0 : i32, i32
  }
  func.func @transform_4(%arg0: i32) -> (i32, i32) {
    %c0_i32 = arith.constant 0 : i32
    %c0_i32_0 = arith.constant 0 : i32
    return %arg0, %c0_i32 : i32, i32
  }
  func.func @transform_5(%arg0: i32) -> (i32, i32, i32) {
    %c0_i32 = arith.constant 0 : i32
    %c0_i32_0 = arith.constant 0 : i32
    %c0_i32_1 = arith.constant 0 : i32
    return %arg0, %c0_i32, %c0_i32_0 : i32, i32, i32
  }
}

module attributes {stable_mosaic.version = 11 : i64} {
  func.func @_conv3x3_kernel(%arg0: i32, %arg1: memref<1x16x16x128xbf16, #tpu.memory_space<vmem>>, %arg2: memref<1x128xf32, #tpu.memory_space<vmem>>, %arg3: memref<1x128xf32, #tpu.memory_space<vmem>>, %arg4: memref<1152x128xbf16, #tpu.memory_space<vmem>>, %arg5: memref<256x128xbf16, #tpu.memory_space<vmem>>, %arg6: memref<1x2x128xf32, #tpu.memory_space<vmem>>, %arg7: memref<18x18x128xf32, #tpu.memory_space<vmem>>, %arg8: memref<16x16x1152xbf16, #tpu.memory_space<vmem>>) attributes {dimension_semantics = [#tpu.dimension_semantics<parallel>], iteration_bounds = array<i64: 2>, scalar_prefetch = 0 : i64, scratch_operands = 2 : i64, tpu.core_type = #tpu.core_type<tc>, window_params = [{transform_indices = @transform_0, window_bounds = array<i64: 1, 16, 16, 128>}, {pipeline_mode = #tpu.pipeline_mode<synchronous>, transform_indices = @transform_1, window_bounds = array<i64: 1, 128>}, {pipeline_mode = #tpu.pipeline_mode<synchronous>, transform_indices = @transform_2, window_bounds = array<i64: 1, 128>}, {pipeline_mode = #tpu.pipeline_mode<synchronous>, transform_indices = @transform_3, window_bounds = array<i64: 1152, 128>}, {transform_indices = @transform_4, window_bounds = array<i64: 256, 128>}, {transform_indices = @transform_5, window_bounds = array<i64: 1, 2, 128>}]} {
    %c0 = arith.constant 0 : index
    %c0_0 = arith.constant 0 : index
    %c0_1 = arith.constant 0 : index
    %c0_2 = arith.constant 0 : index
    %0 = vector.load %arg1[%c0, %c0_0, %c0_1, %c0_2] : memref<1x16x16x128xbf16, #tpu.memory_space<vmem>>, vector<1x16x16x128xbf16>
    %1 = vector.shape_cast %0 : vector<1x16x16x128xbf16> to vector<16x16x128xbf16>
    %2 = arith.extf %1 : vector<16x16x128xbf16> to vector<16x16x128xf32>
    %c0_3 = arith.constant 0 : index
    %c0_4 = arith.constant 0 : index
    %3 = vector.load %arg2[%c0_3, %c0_4] : memref<1x128xf32, #tpu.memory_space<vmem>>, vector<1x128xf32>
    %4 = vector.shape_cast %3 : vector<1x128xf32> to vector<1x1x128xf32>
    %5 = vector.broadcast %4 : vector<1x1x128xf32> to vector<16x16x128xf32>
    %6 = arith.mulf %2, %5 : vector<16x16x128xf32>
    %c0_5 = arith.constant 0 : index
    %c0_6 = arith.constant 0 : index
    %7 = vector.load %arg3[%c0_5, %c0_6] : memref<1x128xf32, #tpu.memory_space<vmem>>, vector<1x128xf32>
    %8 = vector.shape_cast %7 : vector<1x128xf32> to vector<1x1x128xf32>
    %9 = vector.broadcast %8 : vector<1x1x128xf32> to vector<16x16x128xf32>
    %10 = arith.addf %6, %9 : vector<16x16x128xf32>
    %cst = arith.constant 0.000000e+00 : f32
    %11 = vector.broadcast %cst : f32 to vector<16x16x128xf32>
    %12 = arith.maximumf %10, %11 : vector<16x16x128xf32>
    %cst_7 = arith.constant 0.000000e+00 : f32
    %13 = vector.broadcast %cst_7 : f32 to vector<1x18x128xf32>
    %c0_8 = arith.constant 0 : index
    %c0_9 = arith.constant 0 : index
    %c0_10 = arith.constant 0 : index
    %14 = vector.load %arg7[%c0_8, %c0_9, %c0_10] : memref<18x18x128xf32, #tpu.memory_space<vmem>>, vector<1x18x128xf32>
    tpu.vector_store %arg7[%c0_8, %c0_9, %c0_10], %13 {strides = array<i32>} : memref<18x18x128xf32, #tpu.memory_space<vmem>>, vector<1x18x128xf32>,
    %cst_11 = arith.constant 0.000000e+00 : f32
    %15 = vector.broadcast %cst_11 : f32 to vector<1x18x128xf32>
    %c17 = arith.constant 17 : index
    %c0_12 = arith.constant 0 : index
    %c0_13 = arith.constant 0 : index
    %16 = vector.load %arg7[%c17, %c0_12, %c0_13] : memref<18x18x128xf32, #tpu.memory_space<vmem>>, vector<1x18x128xf32>
    tpu.vector_store %arg7[%c17, %c0_12, %c0_13], %15 {strides = array<i32>} : memref<18x18x128xf32, #tpu.memory_space<vmem>>, vector<1x18x128xf32>,
    %cst_14 = arith.constant 0.000000e+00 : f32
    %17 = vector.broadcast %cst_14 : f32 to vector<18x1x128xf32>
    %c0_15 = arith.constant 0 : index
    %c0_16 = arith.constant 0 : index
    %c0_17 = arith.constant 0 : index
    %18 = vector.load %arg7[%c0_15, %c0_16, %c0_17] : memref<18x18x128xf32, #tpu.memory_space<vmem>>, vector<18x1x128xf32>
    tpu.vector_store %arg7[%c0_15, %c0_16, %c0_17], %17 {strides = array<i32>} : memref<18x18x128xf32, #tpu.memory_space<vmem>>, vector<18x1x128xf32>,
    %cst_18 = arith.constant 0.000000e+00 : f32
    %19 = vector.broadcast %cst_18 : f32 to vector<18x1x128xf32>
    %c0_19 = arith.constant 0 : index
    %c17_20 = arith.constant 17 : index
    %c0_21 = arith.constant 0 : index
    %20 = vector.load %arg7[%c0_19, %c17_20, %c0_21] : memref<18x18x128xf32, #tpu.memory_space<vmem>>, vector<18x1x128xf32>
    tpu.vector_store %arg7[%c0_19, %c17_20, %c0_21], %19 {strides = array<i32>} : memref<18x18x128xf32, #tpu.memory_space<vmem>>, vector<18x1x128xf32>,
    %c1 = arith.constant 1 : index
    %c1_22 = arith.constant 1 : index
    %c0_23 = arith.constant 0 : index
    %21 = vector.load %arg7[%c1, %c1_22, %c0_23] : memref<18x18x128xf32, #tpu.memory_space<vmem>>, vector<16x16x128xf32>
    tpu.vector_store %arg7[%c1, %c1_22, %c0_23], %12 {strides = array<i32>} : memref<18x18x128xf32, #tpu.memory_space<vmem>>, vector<16x16x128xf32>,
    %c0_24 = arith.constant 0 : index
    %c0_25 = arith.constant 0 : index
    %c0_26 = arith.constant 0 : index
    %22 = vector.load %arg7[%c0_24, %c0_25, %c0_26] : memref<18x18x128xf32, #tpu.memory_space<vmem>>, vector<16x16x128xf32>
    %23 = arith.truncf %22 : vector<16x16x128xf32> to vector<16x16x128xbf16>
    %c0_27 = arith.constant 0 : index
    %c0_28 = arith.constant 0 : index
    %c0_29 = arith.constant 0 : index
    %24 = vector.load %arg8[%c0_27, %c0_28, %c0_29] : memref<16x16x1152xbf16, #tpu.memory_space<vmem>>, vector<16x16x128xbf16>
    tpu.vector_store %arg8[%c0_27, %c0_28, %c0_29], %23 {strides = array<i32>} : memref<16x16x1152xbf16, #tpu.memory_space<vmem>>, vector<16x16x128xbf16>,
    %c0_30 = arith.constant 0 : index
    %c1_31 = arith.constant 1 : index
    %c0_32 = arith.constant 0 : index
    %25 = vector.load %arg7[%c0_30, %c1_31, %c0_32] : memref<18x18x128xf32, #tpu.memory_space<vmem>>, vector<16x16x128xf32>
    %26 = arith.truncf %25 : vector<16x16x128xf32> to vector<16x16x128xbf16>
    %c0_33 = arith.constant 0 : index
    %c0_34 = arith.constant 0 : index
    %c128 = arith.constant 128 : index
    %27 = vector.load %arg8[%c0_33, %c0_34, %c128] : memref<16x16x1152xbf16, #tpu.memory_space<vmem>>, vector<16x16x128xbf16>
    tpu.vector_store %arg8[%c0_33, %c0_34, %c128], %26 {strides = array<i32>} : memref<16x16x1152xbf16, #tpu.memory_space<vmem>>, vector<16x16x128xbf16>,
    %c0_35 = arith.constant 0 : index
    %c2 = arith.constant 2 : index
    %c0_36 = arith.constant 0 : index
    %28 = vector.load %arg7[%c0_35, %c2, %c0_36] : memref<18x18x128xf32, #tpu.memory_space<vmem>>, vector<16x16x128xf32>
    %29 = arith.truncf %28 : vector<16x16x128xf32> to vector<16x16x128xbf16>
    %c0_37 = arith.constant 0 : index
    %c0_38 = arith.constant 0 : index
    %c256 = arith.constant 256 : index
    %30 = vector.load %arg8[%c0_37, %c0_38, %c256] : memref<16x16x1152xbf16, #tpu.memory_space<vmem>>, vector<16x16x128xbf16>
    tpu.vector_store %arg8[%c0_37, %c0_38, %c256], %29 {strides = array<i32>} : memref<16x16x1152xbf16, #tpu.memory_space<vmem>>, vector<16x16x128xbf16>,
    %c1_39 = arith.constant 1 : index
    %c0_40 = arith.constant 0 : index
    %c0_41 = arith.constant 0 : index
    %31 = vector.load %arg7[%c1_39, %c0_40, %c0_41] : memref<18x18x128xf32, #tpu.memory_space<vmem>>, vector<16x16x128xf32>
    %32 = arith.truncf %31 : vector<16x16x128xf32> to vector<16x16x128xbf16>
    %c0_42 = arith.constant 0 : index
    %c0_43 = arith.constant 0 : index
    %c384 = arith.constant 384 : index
    %33 = vector.load %arg8[%c0_42, %c0_43, %c384] : memref<16x16x1152xbf16, #tpu.memory_space<vmem>>, vector<16x16x128xbf16>
    tpu.vector_store %arg8[%c0_42, %c0_43, %c384], %32 {strides = array<i32>} : memref<16x16x1152xbf16, #tpu.memory_space<vmem>>, vector<16x16x128xbf16>,
    %c1_44 = arith.constant 1 : index
    %c1_45 = arith.constant 1 : index
    %c0_46 = arith.constant 0 : index
    %34 = vector.load %arg7[%c1_44, %c1_45, %c0_46] : memref<18x18x128xf32, #tpu.memory_space<vmem>>, vector<16x16x128xf32>
    %35 = arith.truncf %34 : vector<16x16x128xf32> to vector<16x16x128xbf16>
    %c0_47 = arith.constant 0 : index
    %c0_48 = arith.constant 0 : index
    %c512 = arith.constant 512 : index
    %36 = vector.load %arg8[%c0_47, %c0_48, %c512] : memref<16x16x1152xbf16, #tpu.memory_space<vmem>>, vector<16x16x128xbf16>
    tpu.vector_store %arg8[%c0_47, %c0_48, %c512], %35 {strides = array<i32>} : memref<16x16x1152xbf16, #tpu.memory_space<vmem>>, vector<16x16x128xbf16>,
    %c1_49 = arith.constant 1 : index
    %c2_50 = arith.constant 2 : index
    %c0_51 = arith.constant 0 : index
    %37 = vector.load %arg7[%c1_49, %c2_50, %c0_51] : memref<18x18x128xf32, #tpu.memory_space<vmem>>, vector<16x16x128xf32>
    %38 = arith.truncf %37 : vector<16x16x128xf32> to vector<16x16x128xbf16>
    %c0_52 = arith.constant 0 : index
    %c0_53 = arith.constant 0 : index
    %c640 = arith.constant 640 : index
    %39 = vector.load %arg8[%c0_52, %c0_53, %c640] : memref<16x16x1152xbf16, #tpu.memory_space<vmem>>, vector<16x16x128xbf16>
    tpu.vector_store %arg8[%c0_52, %c0_53, %c640], %38 {strides = array<i32>} : memref<16x16x1152xbf16, #tpu.memory_space<vmem>>, vector<16x16x128xbf16>,
    %c2_54 = arith.constant 2 : index
    %c0_55 = arith.constant 0 : index
    %c0_56 = arith.constant 0 : index
    %40 = vector.load %arg7[%c2_54, %c0_55, %c0_56] : memref<18x18x128xf32, #tpu.memory_space<vmem>>, vector<16x16x128xf32>
    %41 = arith.truncf %40 : vector<16x16x128xf32> to vector<16x16x128xbf16>
    %c0_57 = arith.constant 0 : index
    %c0_58 = arith.constant 0 : index
    %c768 = arith.constant 768 : index
    %42 = vector.load %arg8[%c0_57, %c0_58, %c768] : memref<16x16x1152xbf16, #tpu.memory_space<vmem>>, vector<16x16x128xbf16>
    tpu.vector_store %arg8[%c0_57, %c0_58, %c768], %41 {strides = array<i32>} : memref<16x16x1152xbf16, #tpu.memory_space<vmem>>, vector<16x16x128xbf16>,
    %c2_59 = arith.constant 2 : index
    %c1_60 = arith.constant 1 : index
    %c0_61 = arith.constant 0 : index
    %43 = vector.load %arg7[%c2_59, %c1_60, %c0_61] : memref<18x18x128xf32, #tpu.memory_space<vmem>>, vector<16x16x128xf32>
    %44 = arith.truncf %43 : vector<16x16x128xf32> to vector<16x16x128xbf16>
    %c0_62 = arith.constant 0 : index
    %c0_63 = arith.constant 0 : index
    %c896 = arith.constant 896 : index
    %45 = vector.load %arg8[%c0_62, %c0_63, %c896] : memref<16x16x1152xbf16, #tpu.memory_space<vmem>>, vector<16x16x128xbf16>
    tpu.vector_store %arg8[%c0_62, %c0_63, %c896], %44 {strides = array<i32>} : memref<16x16x1152xbf16, #tpu.memory_space<vmem>>, vector<16x16x128xbf16>,
    %c2_64 = arith.constant 2 : index
    %c2_65 = arith.constant 2 : index
    %c0_66 = arith.constant 0 : index
    %46 = vector.load %arg7[%c2_64, %c2_65, %c0_66] : memref<18x18x128xf32, #tpu.memory_space<vmem>>, vector<16x16x128xf32>
    %47 = arith.truncf %46 : vector<16x16x128xf32> to vector<16x16x128xbf16>
    %c0_67 = arith.constant 0 : index
    %c0_68 = arith.constant 0 : index
    %c1024 = arith.constant 1024 : index
    %48 = vector.load %arg8[%c0_67, %c0_68, %c1024] : memref<16x16x1152xbf16, #tpu.memory_space<vmem>>, vector<16x16x128xbf16>
    tpu.vector_store %arg8[%c0_67, %c0_68, %c1024], %47 {strides = array<i32>} : memref<16x16x1152xbf16, #tpu.memory_space<vmem>>, vector<16x16x128xbf16>,
    %c0_69 = arith.constant 0 : index
    %c0_70 = arith.constant 0 : index
    %c0_71 = arith.constant 0 : index
    %49 = vector.load %arg8[%c0_69, %c0_70, %c0_71] : memref<16x16x1152xbf16, #tpu.memory_space<vmem>>, vector<16x16x1152xbf16>
    %50 = vector.shape_cast %49 : vector<16x16x1152xbf16> to vector<256x1152xbf16>
    %c0_72 = arith.constant 0 : index
    %c0_73 = arith.constant 0 : index
    %51 = vector.load %arg4[%c0_72, %c0_73] : memref<1152x128xbf16, #tpu.memory_space<vmem>>, vector<1152x128xbf16>
    %cst_74 = arith.constant dense<0.000000e+00> : vector<256x128xf32>
    %52 = tpu.matmul %50, %51, %cst_74 {dimension_numbers = #tpu.dot_dimension_numbers<[1], [0], [0], [1], [0, 0, 1, 1], [], []>} : vector<256x1152xbf16>, vector<1152x128xbf16>, vector<256x128xf32> -> vector<256x128xf32>
    %53 = arith.truncf %52 : vector<256x128xf32> to vector<256x128xbf16>
    %c0_75 = arith.constant 0 : index
    %c0_76 = arith.constant 0 : index
    %54 = vector.load %arg5[%c0_75, %c0_76] : memref<256x128xbf16, #tpu.memory_space<vmem>>, vector<256x128xbf16>
    tpu.vector_store %arg5[%c0_75, %c0_76], %53 {strides = array<i32>} : memref<256x128xbf16, #tpu.memory_space<vmem>>, vector<256x128xbf16>,
    %55 = arith.extf %53 : vector<256x128xbf16> to vector<256x128xf32>
    %cst_77 = arith.constant dense<0.000000e+00> : vector<128xf32>
    %56 = vector.multi_reduction <add>, %55, %cst_77 [0] : vector<256x128xf32> to vector<128xf32>
    %57 = vector.shape_cast %56 : vector<128xf32> to vector<1x128xf32>
    %58 = arith.mulf %55, %55 : vector<256x128xf32>
    %cst_78 = arith.constant dense<0.000000e+00> : vector<128xf32>
    %59 = vector.multi_reduction <add>, %58, %cst_78 [0] : vector<256x128xf32> to vector<128xf32>
    %60 = vector.shape_cast %59 : vector<128xf32> to vector<1x128xf32>
    %61 = tpu.concatenate %57, %60 in 0 : vector<1x128xf32>, vector<1x128xf32> -> vector<2x128xf32>
    %62 = vector.shape_cast %61 : vector<2x128xf32> to vector<1x2x128xf32>
    %c0_79 = arith.constant 0 : index
    %c0_80 = arith.constant 0 : index
    %c0_81 = arith.constant 0 : index
    %63 = vector.load %arg6[%c0_79, %c0_80, %c0_81] : memref<1x2x128xf32, #tpu.memory_space<vmem>>, vector<1x2x128xf32>
    tpu.vector_store %arg6[%c0_79, %c0_80, %c0_81], %62 {strides = array<i32>} : memref<1x2x128xf32, #tpu.memory_space<vmem>>, vector<1x2x128xf32>,
    return
  }
  func.func @transform_0(%arg0: i32) -> (i32, i32, i32, i32) {
    %c0_i32 = arith.constant 0 : i32
    %c0_i32_0 = arith.constant 0 : i32
    %c0_i32_1 = arith.constant 0 : i32
    %c0_i32_2 = arith.constant 0 : i32
    return %arg0, %c0_i32, %c0_i32_0, %c0_i32_1 : i32, i32, i32, i32
  }
  func.func @transform_1(%arg0: i32) -> (i32, i32) {
    %c0_i32 = arith.constant 0 : i32
    %c0_i32_0 = arith.constant 0 : i32
    %c0_i32_1 = arith.constant 0 : i32
    return %c0_i32, %c0_i32_0 : i32, i32
  }
  func.func @transform_2(%arg0: i32) -> (i32, i32) {
    %c0_i32 = arith.constant 0 : i32
    %c0_i32_0 = arith.constant 0 : i32
    %c0_i32_1 = arith.constant 0 : i32
    return %c0_i32, %c0_i32_0 : i32, i32
  }
  func.func @transform_3(%arg0: i32) -> (i32, i32) {
    %c0_i32 = arith.constant 0 : i32
    %c0_i32_0 = arith.constant 0 : i32
    %c0_i32_1 = arith.constant 0 : i32
    return %c0_i32, %c0_i32_0 : i32, i32
  }
  func.func @transform_4(%arg0: i32) -> (i32, i32) {
    %c0_i32 = arith.constant 0 : i32
    %c0_i32_0 = arith.constant 0 : i32
    return %arg0, %c0_i32 : i32, i32
  }
  func.func @transform_5(%arg0: i32) -> (i32, i32, i32) {
    %c0_i32 = arith.constant 0 : i32
    %c0_i32_0 = arith.constant 0 : i32
    %c0_i32_1 = arith.constant 0 : i32
    return %arg0, %c0_i32, %c0_i32_0 : i32, i32, i32
  }
}

module attributes {stable_mosaic.version = 11 : i64} {
  func.func @_pw_conv_stats_kernel(%arg0: i32, %arg1: memref<128x128xbf16, #tpu.memory_space<vmem>>, %arg2: memref<1x128xf32, #tpu.memory_space<vmem>>, %arg3: memref<1x128xf32, #tpu.memory_space<vmem>>, %arg4: memref<128x128xbf16, #tpu.memory_space<vmem>>, %arg5: memref<128x128xbf16, #tpu.memory_space<vmem>>, %arg6: memref<1x2x128xf32, #tpu.memory_space<vmem>>) attributes {dimension_semantics = [#tpu.dimension_semantics<parallel>], iteration_bounds = array<i64: 4>, scalar_prefetch = 0 : i64, scratch_operands = 0 : i64, tpu.core_type = #tpu.core_type<tc>, window_params = [{transform_indices = @transform_0, window_bounds = array<i64: 128, 128>}, {pipeline_mode = #tpu.pipeline_mode<synchronous>, transform_indices = @transform_1, window_bounds = array<i64: 1, 128>}, {pipeline_mode = #tpu.pipeline_mode<synchronous>, transform_indices = @transform_2, window_bounds = array<i64: 1, 128>}, {pipeline_mode = #tpu.pipeline_mode<synchronous>, transform_indices = @transform_3, window_bounds = array<i64: 128, 128>}, {transform_indices = @transform_4, window_bounds = array<i64: 128, 128>}, {transform_indices = @transform_5, window_bounds = array<i64: 1, 2, 128>}]} {
    %c0 = arith.constant 0 : index
    %c0_0 = arith.constant 0 : index
    %0 = vector.load %arg1[%c0, %c0_0] : memref<128x128xbf16, #tpu.memory_space<vmem>>, vector<128x128xbf16>
    %1 = arith.extf %0 : vector<128x128xbf16> to vector<128x128xf32>
    %c0_1 = arith.constant 0 : index
    %c0_2 = arith.constant 0 : index
    %2 = vector.load %arg2[%c0_1, %c0_2] : memref<1x128xf32, #tpu.memory_space<vmem>>, vector<1x128xf32>
    %3 = vector.broadcast %2 : vector<1x128xf32> to vector<128x128xf32>
    %4 = arith.mulf %1, %3 : vector<128x128xf32>
    %c0_3 = arith.constant 0 : index
    %c0_4 = arith.constant 0 : index
    %5 = vector.load %arg3[%c0_3, %c0_4] : memref<1x128xf32, #tpu.memory_space<vmem>>, vector<1x128xf32>
    %6 = vector.broadcast %5 : vector<1x128xf32> to vector<128x128xf32>
    %7 = arith.addf %4, %6 : vector<128x128xf32>
    %cst = arith.constant 0.000000e+00 : f32
    %8 = vector.broadcast %cst : f32 to vector<128x128xf32>
    %9 = arith.maximumf %7, %8 : vector<128x128xf32>
    %10 = arith.truncf %9 : vector<128x128xf32> to vector<128x128xbf16>
    %c0_5 = arith.constant 0 : index
    %c0_6 = arith.constant 0 : index
    %11 = vector.load %arg4[%c0_5, %c0_6] : memref<128x128xbf16, #tpu.memory_space<vmem>>, vector<128x128xbf16>
    %cst_7 = arith.constant dense<0.000000e+00> : vector<128x128xf32>
    %12 = tpu.matmul %10, %11, %cst_7 {dimension_numbers = #tpu.dot_dimension_numbers<[1], [0], [0], [1], [0, 0, 1, 1], [], []>} : vector<128x128xbf16>, vector<128x128xbf16>, vector<128x128xf32> -> vector<128x128xf32>
    %13 = arith.truncf %12 : vector<128x128xf32> to vector<128x128xbf16>
    %c0_8 = arith.constant 0 : index
    %c0_9 = arith.constant 0 : index
    %14 = vector.load %arg5[%c0_8, %c0_9] : memref<128x128xbf16, #tpu.memory_space<vmem>>, vector<128x128xbf16>
    tpu.vector_store %arg5[%c0_8, %c0_9], %13 {strides = array<i32>} : memref<128x128xbf16, #tpu.memory_space<vmem>>, vector<128x128xbf16>,
    %15 = arith.extf %13 : vector<128x128xbf16> to vector<128x128xf32>
    %cst_10 = arith.constant dense<0.000000e+00> : vector<128xf32>
    %16 = vector.multi_reduction <add>, %15, %cst_10 [0] : vector<128x128xf32> to vector<128xf32>
    %17 = vector.shape_cast %16 : vector<128xf32> to vector<1x128xf32>
    %18 = arith.mulf %15, %15 : vector<128x128xf32>
    %cst_11 = arith.constant dense<0.000000e+00> : vector<128xf32>
    %19 = vector.multi_reduction <add>, %18, %cst_11 [0] : vector<128x128xf32> to vector<128xf32>
    %20 = vector.shape_cast %19 : vector<128xf32> to vector<1x128xf32>
    %21 = tpu.concatenate %17, %20 in 0 : vector<1x128xf32>, vector<1x128xf32> -> vector<2x128xf32>
    %22 = vector.shape_cast %21 : vector<2x128xf32> to vector<1x2x128xf32>
    %c0_12 = arith.constant 0 : index
    %c0_13 = arith.constant 0 : index
    %c0_14 = arith.constant 0 : index
    %23 = vector.load %arg6[%c0_12, %c0_13, %c0_14] : memref<1x2x128xf32, #tpu.memory_space<vmem>>, vector<1x2x128xf32>
    tpu.vector_store %arg6[%c0_12, %c0_13, %c0_14], %22 {strides = array<i32>} : memref<1x2x128xf32, #tpu.memory_space<vmem>>, vector<1x2x128xf32>,
    return
  }
  func.func @transform_0(%arg0: i32) -> (i32, i32) {
    %c0_i32 = arith.constant 0 : i32
    %c0_i32_0 = arith.constant 0 : i32
    return %arg0, %c0_i32 : i32, i32
  }
  func.func @transform_1(%arg0: i32) -> (i32, i32) {
    %c0_i32 = arith.constant 0 : i32
    %c0_i32_0 = arith.constant 0 : i32
    %c0_i32_1 = arith.constant 0 : i32
    return %c0_i32, %c0_i32_0 : i32, i32
  }
  func.func @transform_2(%arg0: i32) -> (i32, i32) {
    %c0_i32 = arith.constant 0 : i32
    %c0_i32_0 = arith.constant 0 : i32
    %c0_i32_1 = arith.constant 0 : i32
    return %c0_i32, %c0_i32_0 : i32, i32
  }
  func.func @transform_3(%arg0: i32) -> (i32, i32) {
    %c0_i32 = arith.constant 0 : i32
    %c0_i32_0 = arith.constant 0 : i32
    %c0_i32_1 = arith.constant 0 : i32
    return %c0_i32, %c0_i32_0 : i32, i32
  }
  func.func @transform_4(%arg0: i32) -> (i32, i32) {
    %c0_i32 = arith.constant 0 : i32
    %c0_i32_0 = arith.constant 0 : i32
    return %arg0, %c0_i32 : i32, i32
  }
  func.func @transform_5(%arg0: i32) -> (i32, i32, i32) {
    %c0_i32 = arith.constant 0 : i32
    %c0_i32_0 = arith.constant 0 : i32
    %c0_i32_1 = arith.constant 0 : i32
    return %arg0, %c0_i32, %c0_i32_0 : i32, i32, i32
  }
}

module attributes {stable_mosaic.version = 11 : i64} {
  func.func @_bn_residual_relu_kernel(%arg0: i32, %arg1: memref<128x128xbf16, #tpu.memory_space<vmem>>, %arg2: memref<128x128xf32, #tpu.memory_space<vmem>>, %arg3: memref<1x128xf32, #tpu.memory_space<vmem>>, %arg4: memref<1x128xf32, #tpu.memory_space<vmem>>, %arg5: memref<128x128xf32, #tpu.memory_space<vmem>>) attributes {dimension_semantics = [#tpu.dimension_semantics<parallel>], iteration_bounds = array<i64: 4>, scalar_prefetch = 0 : i64, scratch_operands = 0 : i64, tpu.core_type = #tpu.core_type<tc>, window_params = [{transform_indices = @transform_0, window_bounds = array<i64: 128, 128>}, {transform_indices = @transform_1, window_bounds = array<i64: 128, 128>}, {pipeline_mode = #tpu.pipeline_mode<synchronous>, transform_indices = @transform_2, window_bounds = array<i64: 1, 128>}, {pipeline_mode = #tpu.pipeline_mode<synchronous>, transform_indices = @transform_3, window_bounds = array<i64: 1, 128>}, {transform_indices = @transform_4, window_bounds = array<i64: 128, 128>}]} {
    %c0 = arith.constant 0 : index
    %c0_0 = arith.constant 0 : index
    %0 = vector.load %arg1[%c0, %c0_0] : memref<128x128xbf16, #tpu.memory_space<vmem>>, vector<128x128xbf16>
    %1 = arith.extf %0 : vector<128x128xbf16> to vector<128x128xf32>
    %c0_1 = arith.constant 0 : index
    %c0_2 = arith.constant 0 : index
    %2 = vector.load %arg3[%c0_1, %c0_2] : memref<1x128xf32, #tpu.memory_space<vmem>>, vector<1x128xf32>
    %3 = vector.broadcast %2 : vector<1x128xf32> to vector<128x128xf32>
    %4 = arith.mulf %1, %3 : vector<128x128xf32>
    %c0_3 = arith.constant 0 : index
    %c0_4 = arith.constant 0 : index
    %5 = vector.load %arg4[%c0_3, %c0_4] : memref<1x128xf32, #tpu.memory_space<vmem>>, vector<1x128xf32>
    %6 = vector.broadcast %5 : vector<1x128xf32> to vector<128x128xf32>
    %7 = arith.addf %4, %6 : vector<128x128xf32>
    %c0_5 = arith.constant 0 : index
    %c0_6 = arith.constant 0 : index
    %8 = vector.load %arg2[%c0_5, %c0_6] : memref<128x128xf32, #tpu.memory_space<vmem>>, vector<128x128xf32>
    %9 = arith.addf %7, %8 : vector<128x128xf32>
    %cst = arith.constant 0.000000e+00 : f32
    %10 = vector.broadcast %cst : f32 to vector<128x128xf32>
    %11 = arith.maximumf %9, %10 : vector<128x128xf32>
    %c0_7 = arith.constant 0 : index
    %c0_8 = arith.constant 0 : index
    %12 = vector.load %arg5[%c0_7, %c0_8] : memref<128x128xf32, #tpu.memory_space<vmem>>, vector<128x128xf32>
    tpu.vector_store %arg5[%c0_7, %c0_8], %11 {strides = array<i32>} : memref<128x128xf32, #tpu.memory_space<vmem>>, vector<128x128xf32>,
    return
  }
  func.func @transform_0(%arg0: i32) -> (i32, i32) {
    %c0_i32 = arith.constant 0 : i32
    %c0_i32_0 = arith.constant 0 : i32
    return %arg0, %c0_i32 : i32, i32
  }
  func.func @transform_1(%arg0: i32) -> (i32, i32) {
    %c0_i32 = arith.constant 0 : i32
    %c0_i32_0 = arith.constant 0 : i32
    return %arg0, %c0_i32 : i32, i32
  }
  func.func @transform_2(%arg0: i32) -> (i32, i32) {
    %c0_i32 = arith.constant 0 : i32
    %c0_i32_0 = arith.constant 0 : i32
    %c0_i32_1 = arith.constant 0 : i32
    return %c0_i32, %c0_i32_0 : i32, i32
  }
  func.func @transform_3(%arg0: i32) -> (i32, i32) {
    %c0_i32 = arith.constant 0 : i32
    %c0_i32_0 = arith.constant 0 : i32
    %c0_i32_1 = arith.constant 0 : i32
    return %c0_i32, %c0_i32_0 : i32, i32
  }
  func.func @transform_4(%arg0: i32) -> (i32, i32) {
    %c0_i32 = arith.constant 0 : i32
    %c0_i32_0 = arith.constant 0 : i32
    return %arg0, %c0_i32 : i32, i32
  }
}

</mosaic_0001>

<bundles_post_ra>
// kernel: _lambda_.4
= control target key start
LH: loop header
LB: loop body
LE: loop exit
PB: predicated region body
PF: predicated region fallthrough
CT: control target
= control target key end

     0   :  { %s886_s18 = smov 0   ;;  %s967_s0 = inlined_call_operand.vmem [shape: f32[512,128], index: 0, kind: input, shape index: {}]   ;;  %s968_s1 = inlined_call_operand.vmem [shape: f32[1,128], index: 1, kind: input, shape index: {}]   ;;  %s969_s2 = inlined_call_operand.vmem [shape: f32[1,128], index: 2, kind: input, shape index: {}]   ;;  %s970_s3 = inlined_call_operand.vmem [shape: bf16[128,128], index: 3, kind: input, shape index: {}]   ;;  %s971_s4 = inlined_call_operand.vmem [shape: bf16[512,128], index: 4, kind: output, shape index: {0}]   ;;  %s972_s5 = inlined_call_operand.vmem [shape: f32[4,2,128], index: 5, kind: output, shape index: {1}]  }
   0x1 LB: > { %s892_s1 = sadd.s32 4294967295, %s854_s18   ;;  %p673_p0 = scmp.ge.s32.totalorder %s854_s18, 1  ;;  %s854_s18 = sphi %s886_s18, %s16_s18  }
   0x2   : > { %p191_p1 = scmp.lt.s32.totalorder %s854_s18, 5 }
   0x4   : > { %p192_p2 = pnand %p673_p0, %p191_p1 }
   0x5   : > { %s674_s20 = sshll.u32 (!%p192_p2), %s892_s1, 4  ;;  %p235_p4 = scmp.lt.s32.totalorder (!%p192_p2), %s892_s1, 3 }
   0x6   : > { %195 = sbr.rel (%p192_p2) target bundleno = 295 (0x127), region = 36  ;;  %p224_p3 = scmp.lt.s32.totalorder (!%p192_p2), %s674_s20, 63 }
   0xb   : > { %v840_v0 = vld [vmem:[%s970_s3 + $0x38] sm:$0xff]   ;;  %v841_v1 = vld [vmem:[%s970_s3 + $0x30] sm:$0xff]   ;;  %s974_s20 = smov (!%p224_p3, %s674_s20), 63  ;;  %v842_v2 = vld [vmem:[%s970_s3 + $0x28] sm:$0xff]   ;;  %s976_s1 = smov (!%p235_p4, %s892_s1), 3  ;;  %vm579_vm0 = vcmask 1040384  }
   0xc   : > { %784 = vmatprep.subr.bf16.mxu0 %v840_v0  ;;  %816 = vmatprep.subr.bf16.mxu1 %v840_v0  ;;  %s675_s25 = sshll.u32 %s974_s20, 3  ;;  %v843_v3 = vld [vmem:[%s970_s3 + $0x20] sm:$0xff]   ;;  %v844_v9 = vld [vmem:[%s970_s3 + $0x18] sm:$0xff]   ;;  %v845_v11 = vld [vmem:[%s970_s3 + $0x10] sm:$0xff]   ;;  %s677_s14 = sshll.u32 %s974_s20, 2 }
   0xd   : > { %785 = vmatpush3.bf16.msra.mxu0 %v840_v0  ;;  %824 = vmatpush3.bf16.msra.mxu1 %v840_v0  ;;  %s912_s28 = scalar_lea.vmem %s967_s0, %s675_s25  ;;  %v846_v12 = vld [vmem:[%s970_s3 + $0x8] sm:$0xff]   ;;  %v847_v13 = vld [vmem:[%s970_s3] sm:$0xff]   ;;  %s949_s17 = scalar_lea.vmem %s971_s4, %s677_s14 }
   0xe   : > { %786 = vmatprep.subr.bf16.mxu0 %v841_v1  ;;  %817 = vmatprep.subr.bf16.mxu1 %v841_v1  ;;  %v240_v4 = vld [vmem:[%s912_s28] sm:$0xff]  ;;  %v241_v5 = vld [vmem:[%s912_s28 + $0x8] sm:$0xff]  ;;  %v242_v14 = vld [vmem:[%s912_s28 + $0x10] sm:$0xff]  ;;  %s678_s2 = sshll.u32 %s976_s1, 1 }
   0xf   : > { %v256_v6 = vpack.c.bf16 %v241_v5, %v240_v4  ;;  %v248_v7 = vld [vmem:[%s912_s28 + $0x40] sm:$0xff]  ;;  %v249_v8 = vld [vmem:[%s912_s28 + $0x48] sm:$0xff]  ;;  %v243_v15 = vld [vmem:[%s912_s28 + $0x18] sm:$0xff]  ;;  %s238_s21 = scalar_lea.vmem %s972_s5, %s678_s2 }
  0x10   : > { %v260_v10 = vpack.c.bf16 %v249_v8, %v248_v7  ;;  %v244_v16 = vld [vmem:[%s912_s28 + $0x20] sm:$0xff]  ;;  %v250_v17 = vld [vmem:[%s912_s28 + $0x50] sm:$0xff]  ;;  %v251_v18 = vld [vmem:[%s912_s28 + $0x58] sm:$0xff]  ;;  %v257_v22 = vpack.c.bf16 %v243_v15, %v242_v14 }
  0x11   : > { %787 = vmatpush3.bf16.msra.mxu0 %v841_v1  ;;  %825 = vmatpush3.bf16.msra.mxu1 %v841_v1  ;;  %v245_v19 = vld [vmem:[%s912_s28 + $0x28] sm:$0xff]  ;;  %v252_v20 = vld [vmem:[%s912_s28 + $0x60] sm:$0xff]  ;;  %v261_v23 = vpack.c.bf16 %v251_v18, %v250_v17  ;;  %v246_v26 = vld [vmem:[%s912_s28 + $0x30] sm:$0xff] }
  0x12   : > { %788 = vmatprep.subr.bf16.mxu0 %v842_v2  ;;  %818 = vmatprep.subr.bf16.mxu1 %v842_v2  ;;  %v253_v21 = vld [vmem:[%s912_s28 + $0x68] sm:$0xff]  ;;  %v258_v24 = vpack.c.bf16 %v245_v19, %v244_v16  ;;  %v247_v27 = vld [vmem:[%s912_s28 + $0x38] sm:$0xff]  ;;  %v254_v28 = vld [vmem:[%s912_s28 + $0x70] sm:$0xff] }
  0x13   : > { %800 = vmatprep.mubr.bf16.mxu0 %v256_v6  ;;  %808 = vmatprep.mubr.bf16.mxu1 %v260_v10  ;;  %v262_v25 = vpack.c.bf16 %v253_v21, %v252_v20  ;;  %v255_v29 = vld [vmem:[%s912_s28 + $0x78] sm:$0xff]  ;;  %v259_v30 = vpack.c.bf16 %v247_v27, %v246_v26 }
  0x14   : > { %v263_v31 = vpack.c.bf16 %v255_v29, %v254_v28 }
  0x15   : > { %789 = vmatpush3.bf16.msra.mxu0 %v842_v2  ;;  %826 = vmatpush3.bf16.msra.mxu1 %v842_v2 }
  0x16   : > { %790 = vmatprep.subr.bf16.mxu0 %v843_v3  ;;  %819 = vmatprep.subr.bf16.mxu1 %v843_v3 }
  0x19   : > { %791 = vmatpush3.bf16.msra.mxu0 %v843_v3  ;;  %827 = vmatpush3.bf16.msra.mxu1 %v843_v3 }
  0x1a   : > { %792 = vmatprep.subr.bf16.mxu0 %v844_v9  ;;  %820 = vmatprep.subr.bf16.mxu1 %v844_v9 }
  0x1d   : > { %793 = vmatpush3.bf16.msra.mxu0 %v844_v9  ;;  %828 = vmatpush3.bf16.msra.mxu1 %v844_v9 }
  0x1e   : > { %794 = vmatprep.subr.bf16.mxu0 %v845_v11  ;;  %821 = vmatprep.subr.bf16.mxu1 %v845_v11 }
  0x21   : > { %795 = vmatpush3.bf16.msra.mxu0 %v845_v11  ;;  %829 = vmatpush3.bf16.msra.mxu1 %v845_v11 }
  0x22   : > { %796 = vmatprep.subr.bf16.mxu0 %v846_v12  ;;  %822 = vmatprep.subr.bf16.mxu1 %v846_v12 }
  0x25   : > { %797 = vmatpush3.bf16.msra.mxu0 %v846_v12  ;;  %830 = vmatpush3.bf16.msra.mxu1 %v846_v12 }
  0x26   : > { %798 = vmatprep.subr.bf16.mxu0 %v847_v13  ;;  %823 = vmatprep.subr.bf16.mxu1 %v847_v13 }
  0x29   : > { %799 = vmatpush3.bf16.msra.mxu0 %v847_v13  ;;  %831 = vmatpush3.bf16.msra.mxu1 %v847_v13 }
  0x2c   : > { %801 = vmatmul.mubr.bf16.vlgmr.msra.gmra.mxu0 %v257_v22  ;;  %809 = vmatmul.mubr.bf16.vlgmr.msra.gmra.mxu1 %v261_v23 }
  0x2d   : > { %804 = vmatprep.mubr.bf16.mxu0 %v258_v24  ;;  %812 = vmatprep.mubr.bf16.mxu1 %v262_v25 }
  0x34   : > { %805 = vmatmul.mubr.bf16.gmra.mxu0 %v259_v30  ;;  %813 = vmatmul.mubr.bf16.gmra.mxu1 %v263_v31 }
  0xec   : > { %v802_v32 = vpop.f32.mrf.mxu0  ;;  %v810_v33 = vpop.f32.mrf.mxu1 }
  0xee   : > { %v362_v34 = vpop.f32.mrf.mxu0  ;;  %v394_v35 = vpop.f32.mrf.mxu1 }
  0xf0   : > { %v803_v36 = vpop.f32.mrf.mxu0  ;;  %v811_v37 = vpop.f32.mrf.mxu1 }
  0xf1   : > { %v426_v38 = vpack.c.bf16 %v803_v36, %v802_v32  ;;  %v430_v39 = vpack.c.bf16 %v811_v37, %v810_v33 }
  0xf2   : > { %v365_v40 = vpop.f32.mrf.mxu0  ;;  %v397_v41 = vpop.f32.mrf.mxu1 }
  0xf3   : > { %761 = vst [vmem:[%s949_s17 + $0x8] sm:$0xff] %v426_v38   ;;  %v425_v42 = vpack.c.bf16 %v365_v40, %v362_v34  ;;  %765 = vst [vmem:[%s949_s17 + $0x28] sm:$0xff] %v430_v39   ;;  %v507_v43 = vunpack.c.l.bf16 %v426_v38  ;;  %v429_v45 = vpack.c.bf16 %v397_v41, %v394_v35  ;;  %v508_v54 = vunpack.c.h.bf16 %v426_v38 }
  0xf4   : > { %v806_v44 = vpop.f32.mrf.mxu0  ;;  %v814_v46 = vpop.f32.mrf.mxu1  ;;  %v515_v23 = vunpack.c.l.bf16 %v430_v39  ;;  %v516_v27 = vunpack.c.h.bf16 %v430_v39 }
  0xf5   : > { %725 = vst [vmem:[%s949_s17] sm:$0xff] %v425_v42   ;;  %v505_v47 = vunpack.c.l.bf16 %v425_v42  ;;  %v506_v48 = vunpack.c.h.bf16 %v425_v42  ;;  %764 = vst [vmem:[%s949_s17 + $0x20] sm:$0xff] %v429_v45   ;;  %v544_v55 = vmul.f32 %v507_v43, %v507_v43  ;;  %v545_v3 = vmul.f32 %v508_v54, %v508_v54 }
  0xf6   : > { %v378_v49 = vpop.f32.mrf.mxu0  ;;  %v410_v50 = vpop.f32.mrf.mxu1  ;;  %v513_v18 = vunpack.c.l.bf16 %v429_v45  ;;  %v514_v21 = vunpack.c.h.bf16 %v429_v45  ;;  %v552_v31 = vmul.f32 %v515_v23, %v515_v23  ;;  %v553_v35 = vmul.f32 %v516_v27, %v516_v27 }
  0xf7   : > { %v521_v51 = vadd.f32 %v506_v48, %v505_v47  ;;  %v542_v52 = vmul.f32 %v505_v47, %v505_v47  ;;  %v543_v53 = vmul.f32 %v506_v48, %v506_v48 }
  0xf8   : > { %v807_v56 = vpop.f32.mrf.mxu0  ;;  %v815_v57 = vpop.f32.mrf.mxu1  ;;  %v550_v25 = vmul.f32 %v513_v18, %v513_v18  ;;  %v551_v29 = vmul.f32 %v514_v21, %v514_v21 }
  0xf9   : > { %v522_v58 = vadd.f32 %v521_v51, %v507_v43  ;;  %v558_v59 = vadd.f32 %v543_v53, %v542_v52  ;;  %v428_v60 = vpack.c.bf16 %v807_v56, %v806_v44  ;;  %v432_v61 = vpack.c.bf16 %v815_v57, %v814_v46 }
  0xfa   : > { %v381_v62 = vpop.f32.mrf.mxu0  ;;  %v413_v63 = vpop.f32.mrf.mxu1 }
  0xfb   : > { %v559_v0 = vadd.f32 %v558_v59, %v544_v55  ;;  %763 = vst [vmem:[%s949_s17 + $0x18] sm:$0xff] %v428_v60   ;;  %v427_v1 = vpack.c.bf16 %v381_v62, %v378_v49  ;;  %767 = vst [vmem:[%s949_s17 + $0x38] sm:$0xff] %v432_v61   ;;  %v431_v2 = vpack.c.bf16 %v413_v63, %v410_v50  ;;  %v511_v7 = vunpack.c.l.bf16 %v428_v60 }
  0xfc   : > { %v523_v6 = vadd.f32 %v522_v58, %v508_v54  ;;  %v512_v11 = vunpack.c.h.bf16 %v428_v60  ;;  %v519_v40 = vunpack.c.l.bf16 %v432_v61  ;;  %v520_v44 = vunpack.c.h.bf16 %v432_v61 }
  0xfd   : > { %762 = vst [vmem:[%s949_s17 + $0x10] sm:$0xff] %v427_v1   ;;  %v509_v4 = vunpack.c.l.bf16 %v427_v1  ;;  %v510_v5 = vunpack.c.h.bf16 %v427_v1  ;;  %766 = vst [vmem:[%s949_s17 + $0x30] sm:$0xff] %v431_v2   ;;  %v560_v10 = vadd.f32 %v559_v0, %v545_v3  ;;  %v548_v15 = vmul.f32 %v511_v7, %v511_v7 }
  0xfe   : > { %v549_v19 = vmul.f32 %v512_v11, %v512_v11  ;;  %v517_v34 = vunpack.c.l.bf16 %v431_v2  ;;  %v518_v37 = vunpack.c.h.bf16 %v431_v2  ;;  %v556_v47 = vmul.f32 %v519_v40, %v519_v40 }
  0xff   : > { %v524_v8 = vadd.f32 %v523_v6, %v509_v4  ;;  %v546_v9 = vmul.f32 %v509_v4, %v509_v4  ;;  %v547_v13 = vmul.f32 %v510_v5, %v510_v5  ;;  %v557_v50 = vmul.f32 %v520_v44, %v520_v44 }
 0x100   : > { %v554_v42 = vmul.f32 %v517_v34, %v517_v34  ;;  %v555_v39 = vmul.f32 %v518_v37, %v518_v37 }
 0x101   : > { %v525_v12 = vadd.f32 %v524_v8, %v510_v5  ;;  %v561_v14 = vadd.f32 %v560_v10, %v546_v9 }
 0x103   : > { %v526_v16 = vadd.f32 %v525_v12, %v511_v7  ;;  %v562_v17 = vadd.f32 %v561_v14, %v547_v13 }
 0x105   : > { %v563_v20 = vadd.f32 %v562_v17, %v548_v15  ;;  %v527_v22 = vadd.f32 %v526_v16, %v512_v11 }
 0x107   : > { %v528_v24 = vadd.f32 %v527_v22, %v513_v18  ;;  %v564_v26 = vadd.f32 %v563_v20, %v549_v19 }
 0x109   : > { %v529_v28 = vadd.f32 %v528_v24, %v514_v21  ;;  %v565_v30 = vadd.f32 %v564_v26, %v550_v25 }
 0x10b   : > { %v530_v32 = vadd.f32 %v529_v28, %v515_v23  ;;  %v566_v33 = vadd.f32 %v565_v30, %v551_v29 }
 0x10d   : > { %v567_v36 = vadd.f32 %v566_v33, %v552_v31  ;;  %v531_v38 = vadd.f32 %v530_v32, %v516_v27 }
 0x10f   : > { %v532_v41 = vadd.f32 %v531_v38, %v517_v34  ;;  %v568_v43 = vadd.f32 %v567_v36, %v553_v35 }
 0x111   : > { %v533_v45 = vadd.f32 %v532_v41, %v518_v37  ;;  %v569_v46 = vadd.f32 %v568_v43, %v554_v42 }
 0x113   : > { %v534_v48 = vadd.f32 %v533_v45, %v519_v40  ;;  %v570_v49 = vadd.f32 %v569_v46, %v555_v39 }
 0x115   : > { %v535_v51 = vadd.f32 %v534_v48, %v520_v44  ;;  %v571_v52 = vadd.f32 %v570_v49, %v556_v47 }
 0x117   : > { %v536_v53 = vrot.slane %v535_v51, 4  ;;  %v572_v54 = vadd.f32 %v571_v52, %v557_v50 }
 0x119   : > { %v537_v55 = vadd.f32 %v536_v53, %v535_v51  ;;  %v573_v56 = vrot.slane %v572_v54, 4 }
 0x11b   : > { %v538_v57 = vrot.slane %v537_v55, 2  ;;  %v574_v58 = vadd.f32 %v573_v56, %v572_v54 }
 0x11d   : > { %v539_v59 = vadd.f32 %v538_v57, %v537_v55  ;;  %v575_v60 = vrot.slane %v574_v58, 2 }
 0x11f   : > { %v540_v61 = vrot.slane %v539_v59, 1  ;;  %v576_v62 = vadd.f32 %v575_v60, %v574_v58 }
 0x121   : > { %v577_v63 = vrot.slane %v576_v62, 1  ;;  %v541_v0 = vadd.f32 %v540_v61, %v539_v59 }
 0x123   : > { %v578_v1 = vadd.f32 %v577_v63, %v576_v62 }
 0x125   : > { %v580_v2 = vsel %vm579_vm0, %v541_v0, %v578_v1 }
 0x126   : > { %581 = vst [vmem:[%s238_s21] sm:$0x3] %v580_v2 }
 0x127 PF: > { %s16_s18 = sadd.s32 1, %s854_s18  }
 0x128   : > { %p13_p5 = scmp.ge.s32.totalorder %s16_s18, 6  }
 0x12a   :  { %15 = sbr.rel (!%p13_p5) target bundleno = 1 (0x1), region = 78 }

// kernel: _lambda_.6
= control target key start
LH: loop header
LB: loop body
LE: loop exit
PB: predicated region body
PF: predicated region fallthrough
CT: control target
= control target key end

     0   :  { %s1005_s18 = smov 0   ;;  %s1123_s0 = inlined_call_operand.vmem [shape: bf16[512,128], index: 0, kind: input, shape index: {}]   ;;  %s1124_s1 = inlined_call_operand.vmem [shape: f32[1,128], index: 1, kind: input, shape index: {}]   ;;  %s1125_s2 = inlined_call_operand.vmem [shape: f32[1,128], index: 2, kind: input, shape index: {}]   ;;  %s1126_s3 = inlined_call_operand.vmem [shape: bf16[128,128], index: 3, kind: input, shape index: {}]   ;;  %s1127_s4 = inlined_call_operand.vmem [shape: bf16[512,128], index: 4, kind: output, shape index: {0}]   ;;  %s1128_s5 = inlined_call_operand.vmem [shape: f32[4,2,128], index: 5, kind: output, shape index: {1}]  }
   0x1 LB: > { %s1011_s19 = sadd.s32 4294967295, %s973_s18   ;;  %p751_p0 = scmp.ge.s32.totalorder %s973_s18, 1  ;;  %s973_s18 = sphi %s1005_s18, %s16_s18  }
   0x2   : > { %p191_p1 = scmp.lt.s32.totalorder %s973_s18, 5 }
   0x4   : > { %p192_p2 = pnand %p751_p0, %p191_p1 }
   0x5   : > { %s752_s22 = sshll.u32 (!%p192_p2), %s1011_s19, 4  ;;  %p235_p4 = scmp.lt.s32.totalorder (!%p192_p2), %s1011_s19, 3 }
   0x6   : > { %195 = sbr.rel (%p192_p2) target bundleno = 295 (0x127), region = 36  ;;  %p224_p3 = scmp.lt.s32.totalorder (!%p192_p2), %s752_s22, 63 }
   0xb   : > { %v959_v0 = vld [vmem:[%s1126_s3 + $0x38] sm:$0xff]   ;;  %v960_v1 = vld [vmem:[%s1126_s3 + $0x30] sm:$0xff]   ;;  %s1130_s22 = smov (!%p224_p3, %s752_s22), 63  ;;  %v961_v2 = vld [vmem:[%s1126_s3 + $0x28] sm:$0xff]   ;;  %s1132_s19 = smov (!%p235_p4, %s1011_s19), 3  ;;  %vm657_vm0 = vcmask 1040384  }
   0xc   : > { %903 = vmatprep.subr.bf16.mxu0 %v959_v0  ;;  %935 = vmatprep.subr.bf16.mxu1 %v959_v0  ;;  %s753_s27 = sshll.u32 %s1130_s22, 2  ;;  %v962_v3 = vld [vmem:[%s1126_s3 + $0x20] sm:$0xff]   ;;  %v963_v16 = vld [vmem:[%s1126_s3 + $0x18] sm:$0xff]   ;;  %v964_v28 = vld [vmem:[%s1126_s3 + $0x10] sm:$0xff]   ;;  %s756_s22 = sshll.u32 %s1132_s19, 1 }
   0xd   : > { %904 = vmatpush3.bf16.msra.mxu0 %v959_v0  ;;  %943 = vmatpush3.bf16.msra.mxu1 %v959_v0  ;;  %s1033_s30 = scalar_lea.vmem %s1123_s0, %s753_s27  ;;  %v1042_v5 = vld [vmem:[%s1124_s1] ss:$0 sm:$0xff]  ;;  %v965_v44 = vld [vmem:[%s1126_s3 + $0x8] sm:$0xff]   ;;  %s1105_s25 = scalar_lea.vmem %s1127_s4, %s753_s27 }
   0xe   : > { %905 = vmatprep.subr.bf16.mxu0 %v960_v1  ;;  %936 = vmatprep.subr.bf16.mxu1 %v960_v1  ;;  %v802_v4 = vld [vmem:[%s1033_s30] sm:$0xff]   ;;  %v873_v8 = vld [vmem:[%s1033_s30 + $0x8] sm:$0xff]   ;;  %v874_v9 = vld [vmem:[%s1033_s30 + $0x10] sm:$0xff]   ;;  %s238_s28 = scalar_lea.vmem %s1128_s5, %s756_s22 }
   0xf   : > { %v803_v6 = vunpack.c.l.bf16 %v802_v4  ;;  %v804_v7 = vunpack.c.h.bf16 %v802_v4  ;;  %v1049_v10 = vld [vmem:[%s1125_s2] ss:$0 sm:$0xff]  ;;  %v807_v11 = vunpack.c.l.bf16 %v873_v8  ;;  %v808_v14 = vunpack.c.h.bf16 %v873_v8  ;;  %v875_v22 = vld [vmem:[%s1033_s30 + $0x18] sm:$0xff]   ;;  %v877_v27 = vld [vmem:[%s1033_s30 + $0x28] sm:$0xff]  }
  0x10   : > { %v876_v15 = vld [vmem:[%s1033_s30 + $0x20] sm:$0xff]   ;;  %v811_v17 = vunpack.c.l.bf16 %v874_v9  ;;  %v812_v21 = vunpack.c.h.bf16 %v874_v9  ;;  %v878_v30 = vld [vmem:[%s1033_s30 + $0x30] sm:$0xff]   ;;  %v815_v32 = vunpack.c.l.bf16 %v875_v22  ;;  %v816_v33 = vunpack.c.h.bf16 %v875_v22  ;;  %v879_v39 = vld [vmem:[%s1033_s30 + $0x38] sm:$0xff]  }
  0x11   : > { %906 = vmatpush3.bf16.msra.mxu0 %v960_v1  ;;  %944 = vmatpush3.bf16.msra.mxu1 %v960_v1  ;;  %v279_v12 = vmul.f32 %v803_v6, %v1042_v5  ;;  %v280_v13 = vmul.f32 %v804_v7, %v1042_v5  ;;  %v281_v20 = vmul.f32 %v807_v11, %v1042_v5  ;;  %v819_v23 = vunpack.c.l.bf16 %v876_v15  ;;  %v966_v61 = vld [vmem:[%s1126_s3] sm:$0xff]  }
  0x12   : > { %907 = vmatprep.subr.bf16.mxu0 %v961_v2  ;;  %937 = vmatprep.subr.bf16.mxu1 %v961_v2  ;;  %v282_v26 = vmul.f32 %v808_v14, %v1042_v5  ;;  %v283_v29 = vmul.f32 %v811_v17, %v1042_v5  ;;  %v820_v34 = vunpack.c.h.bf16 %v876_v15  ;;  %v284_v36 = vmul.f32 %v812_v21, %v1042_v5 }
  0x13   : > { %v302_v18 = vadd.f32 %v1049_v10, %v279_v12  ;;  %v303_v19 = vadd.f32 %v1049_v10, %v280_v13  ;;  %v304_v35 = vadd.f32 %v1049_v10, %v281_v20  ;;  %v287_v37 = vmul.f32 %v819_v23, %v1042_v5 }
  0x14   : > { %v823_v38 = vunpack.c.l.bf16 %v877_v27  ;;  %v305_v40 = vadd.f32 %v1049_v10, %v282_v26  ;;  %v288_v41 = vmul.f32 %v820_v34, %v1042_v5  ;;  %v824_v42 = vunpack.c.h.bf16 %v877_v27 }
  0x15   : > { %908 = vmatpush3.bf16.msra.mxu0 %v961_v2  ;;  %945 = vmatpush3.bf16.msra.mxu1 %v961_v2  ;;  %v318_v24 = vmax.f32 %v302_v18, 0.0  ;;  %v319_v25 = vmax.f32 %v303_v19, 0.0  ;;  %v827_v43 = vunpack.c.l.bf16 %v878_v30  ;;  %v306_v45 = vadd.f32 %v1049_v10, %v283_v29 }
  0x16   : > { %909 = vmatprep.subr.bf16.mxu0 %v962_v3  ;;  %938 = vmatprep.subr.bf16.mxu1 %v962_v3  ;;  %v310_v46 = vadd.f32 %v1049_v10, %v287_v37  ;;  %v289_v47 = vmul.f32 %v823_v38, %v1042_v5  ;;  %v828_v48 = vunpack.c.h.bf16 %v878_v30  ;;  %v311_v49 = vadd.f32 %v1049_v10, %v288_v41 }
  0x17   : > { %v334_v31 = vpack.c.bf16 %v319_v25, %v318_v24  ;;  %v290_v50 = vmul.f32 %v824_v42, %v1042_v5  ;;  %v291_v51 = vmul.f32 %v827_v43, %v1042_v5  ;;  %v831_v52 = vunpack.c.l.bf16 %v879_v39 }
  0x18   : > { %v326_v53 = vmax.f32 %v310_v46, 0.0  ;;  %v312_v54 = vadd.f32 %v1049_v10, %v289_v47  ;;  %v292_v55 = vmul.f32 %v828_v48, %v1042_v5  ;;  %v832_v56 = vunpack.c.h.bf16 %v879_v39 }
  0x19   : > { %910 = vmatpush3.bf16.msra.mxu0 %v962_v3  ;;  %946 = vmatpush3.bf16.msra.mxu1 %v962_v3  ;;  %v307_v57 = vadd.f32 %v1049_v10, %v284_v36  ;;  %v327_v58 = vmax.f32 %v311_v49, 0.0  ;;  %v313_v59 = vadd.f32 %v1049_v10, %v290_v50  ;;  %v314_v60 = vadd.f32 %v1049_v10, %v291_v51 }
  0x1a   : > { %911 = vmatprep.subr.bf16.mxu0 %v963_v16  ;;  %939 = vmatprep.subr.bf16.mxu1 %v963_v16  ;;  %v285_v62 = vmul.f32 %v815_v32, %v1042_v5  ;;  %v315_v63 = vadd.f32 %v1049_v10, %v292_v55  ;;  %v320_v0 = vmax.f32 %v304_v35, 0.0  ;;  %v321_v1 = vmax.f32 %v305_v40, 0.0 }
  0x1b   : > { %919 = vmatprep.mubr.bf16.mxu0 %v334_v31  ;;  %v286_v2 = vmul.f32 %v816_v33, %v1042_v5  ;;  %v338_v3 = vpack.c.bf16 %v327_v58, %v326_v53  ;;  %v328_v4 = vmax.f32 %v312_v54, 0.0  ;;  %v329_v6 = vmax.f32 %v313_v59, 0.0 }
  0x1c   : > { %v293_v7 = vmul.f32 %v831_v52, %v1042_v5  ;;  %v294_v8 = vmul.f32 %v832_v56, %v1042_v5  ;;  %v322_v9 = vmax.f32 %v306_v45, 0.0  ;;  %v323_v11 = vmax.f32 %v307_v57, 0.0 }
  0x1d   : > { %912 = vmatpush3.bf16.msra.mxu0 %v963_v16  ;;  %947 = vmatpush3.bf16.msra.mxu1 %v963_v16  ;;  %v330_v12 = vmax.f32 %v314_v60, 0.0  ;;  %v331_v13 = vmax.f32 %v315_v63, 0.0  ;;  %v308_v14 = vadd.f32 %v1049_v10, %v285_v62  ;;  %v309_v15 = vadd.f32 %v1049_v10, %v286_v2 }
  0x1e   : > { %913 = vmatprep.subr.bf16.mxu0 %v964_v28  ;;  %940 = vmatprep.subr.bf16.mxu1 %v964_v28  ;;  %v335_v16 = vpack.c.bf16 %v321_v1, %v320_v0  ;;  %v339_v17 = vpack.c.bf16 %v329_v6, %v328_v4  ;;  %v316_v18 = vadd.f32 %v1049_v10, %v293_v7 }
  0x1f   : > { %927 = vmatprep.mubr.bf16.mxu1 %v338_v3  ;;  %v317_v19 = vadd.f32 %v1049_v10, %v294_v8  ;;  %v336_v5 = vpack.c.bf16 %v323_v11, %v322_v9  ;;  %v340_v20 = vpack.c.bf16 %v331_v13, %v330_v12  ;;  %v324_v21 = vmax.f32 %v308_v14, 0.0 }
  0x20   : > { %v325_v22 = vmax.f32 %v309_v15, 0.0  ;;  %v332_v23 = vmax.f32 %v316_v18, 0.0 }
  0x21   : > { %914 = vmatpush3.bf16.msra.mxu0 %v964_v28  ;;  %948 = vmatpush3.bf16.msra.mxu1 %v964_v28  ;;  %v333_v24 = vmax.f32 %v317_v19, 0.0 }
  0x22   : > { %915 = vmatprep.subr.bf16.mxu0 %v965_v44  ;;  %941 = vmatprep.subr.bf16.mxu1 %v965_v44  ;;  %v337_v25 = vpack.c.bf16 %v325_v22, %v324_v21 }
  0x23   : > { %v341_v26 = vpack.c.bf16 %v333_v24, %v332_v23 }
  0x25   : > { %916 = vmatpush3.bf16.msra.mxu0 %v965_v44  ;;  %949 = vmatpush3.bf16.msra.mxu1 %v965_v44 }
  0x26   : > { %917 = vmatprep.subr.bf16.mxu0 %v966_v61  ;;  %942 = vmatprep.subr.bf16.mxu1 %v966_v61 }
  0x29   : > { %918 = vmatpush3.bf16.msra.mxu0 %v966_v61  ;;  %950 = vmatpush3.bf16.msra.mxu1 %v966_v61 }
  0x2c   : > { %920 = vmatmul.mubr.bf16.vlgmr.msra.gmra.mxu0 %v335_v16  ;;  %928 = vmatmul.mubr.bf16.vlgmr.msra.gmra.mxu1 %v339_v17 }
  0x2d   : > { %923 = vmatprep.mubr.bf16.mxu0 %v336_v5  ;;  %931 = vmatprep.mubr.bf16.mxu1 %v340_v20 }
  0x34   : > { %924 = vmatmul.mubr.bf16.gmra.mxu0 %v337_v25  ;;  %932 = vmatmul.mubr.bf16.gmra.mxu1 %v341_v26 }
  0xec   : > { %v921_v27 = vpop.f32.mrf.mxu0  ;;  %v929_v28 = vpop.f32.mrf.mxu1 }
  0xee   : > { %v440_v10 = vpop.f32.mrf.mxu0  ;;  %v472_v29 = vpop.f32.mrf.mxu1 }
  0xf0   : > { %v922_v30 = vpop.f32.mrf.mxu0  ;;  %v930_v31 = vpop.f32.mrf.mxu1 }
  0xf1   : > { %v504_v32 = vpack.c.bf16 %v922_v30, %v921_v27  ;;  %v508_v33 = vpack.c.bf16 %v930_v31, %v929_v28 }
  0xf2   : > { %v443_v34 = vpop.f32.mrf.mxu0  ;;  %v475_v35 = vpop.f32.mrf.mxu1 }
  0xf3   : > { %880 = vst [vmem:[%s1105_s25 + $0x8] sm:$0xff] %v504_v32   ;;  %v503_v36 = vpack.c.bf16 %v443_v34, %v440_v10  ;;  %884 = vst [vmem:[%s1105_s25 + $0x28] sm:$0xff] %v508_v33   ;;  %v585_v37 = vunpack.c.l.bf16 %v504_v32  ;;  %v507_v39 = vpack.c.bf16 %v475_v35, %v472_v29  ;;  %v586_v48 = vunpack.c.h.bf16 %v504_v32 }
  0xf4   : > { %v925_v38 = vpop.f32.mrf.mxu0  ;;  %v933_v40 = vpop.f32.mrf.mxu1  ;;  %v593_v19 = vunpack.c.l.bf16 %v508_v33  ;;  %v594_v22 = vunpack.c.h.bf16 %v508_v33 }
  0xf5   : > { %837 = vst [vmem:[%s1105_s25] sm:$0xff] %v503_v36   ;;  %v583_v41 = vunpack.c.l.bf16 %v503_v36  ;;  %v584_v42 = vunpack.c.h.bf16 %v503_v36  ;;  %883 = vst [vmem:[%s1105_s25 + $0x20] sm:$0xff] %v507_v39   ;;  %v622_v49 = vmul.f32 %v585_v37, %v585_v37  ;;  %v623_v61 = vmul.f32 %v586_v48, %v586_v48 }
  0xf6   : > { %v456_v43 = vpop.f32.mrf.mxu0  ;;  %v488_v44 = vpop.f32.mrf.mxu1  ;;  %v591_v14 = vunpack.c.l.bf16 %v507_v39  ;;  %v592_v17 = vunpack.c.h.bf16 %v507_v39  ;;  %v630_v26 = vmul.f32 %v593_v19, %v593_v19  ;;  %v631_v29 = vmul.f32 %v594_v22, %v594_v22 }
  0xf7   : > { %v599_v45 = vadd.f32 %v584_v42, %v583_v41  ;;  %v620_v46 = vmul.f32 %v583_v41, %v583_v41  ;;  %v621_v47 = vmul.f32 %v584_v42, %v584_v42 }
  0xf8   : > { %v926_v50 = vpop.f32.mrf.mxu0  ;;  %v934_v51 = vpop.f32.mrf.mxu1  ;;  %v628_v20 = vmul.f32 %v591_v14, %v591_v14  ;;  %v629_v24 = vmul.f32 %v592_v17, %v592_v17 }
  0xf9   : > { %v600_v52 = vadd.f32 %v599_v45, %v585_v37  ;;  %v636_v53 = vadd.f32 %v621_v47, %v620_v46  ;;  %v506_v54 = vpack.c.bf16 %v926_v50, %v925_v38  ;;  %v510_v55 = vpack.c.bf16 %v934_v51, %v933_v40 }
  0xfa   : > { %v459_v56 = vpop.f32.mrf.mxu0  ;;  %v491_v57 = vpop.f32.mrf.mxu1 }
  0xfb   : > { %v637_v58 = vadd.f32 %v636_v53, %v622_v49  ;;  %882 = vst [vmem:[%s1105_s25 + $0x18] sm:$0xff] %v506_v54   ;;  %v505_v59 = vpack.c.bf16 %v459_v56, %v456_v43  ;;  %886 = vst [vmem:[%s1105_s25 + $0x38] sm:$0xff] %v510_v55   ;;  %v509_v60 = vpack.c.bf16 %v491_v57, %v488_v44  ;;  %v589_v1 = vunpack.c.l.bf16 %v506_v54 }
  0xfc   : > { %v601_v0 = vadd.f32 %v600_v52, %v586_v48  ;;  %v590_v6 = vunpack.c.h.bf16 %v506_v54  ;;  %v597_v34 = vunpack.c.l.bf16 %v510_v55  ;;  %v598_v38 = vunpack.c.h.bf16 %v510_v55 }
  0xfd   : > { %881 = vst [vmem:[%s1105_s25 + $0x10] sm:$0xff] %v505_v59   ;;  %v587_v62 = vunpack.c.l.bf16 %v505_v59  ;;  %v588_v63 = vunpack.c.h.bf16 %v505_v59  ;;  %885 = vst [vmem:[%s1105_s25 + $0x30] sm:$0xff] %v509_v60   ;;  %v638_v4 = vadd.f32 %v637_v58, %v623_v61  ;;  %v626_v11 = vmul.f32 %v589_v1, %v589_v1 }
  0xfe   : > { %v627_v15 = vmul.f32 %v590_v6, %v590_v6  ;;  %v595_v10 = vunpack.c.l.bf16 %v509_v60  ;;  %v596_v31 = vunpack.c.h.bf16 %v509_v60  ;;  %v634_v41 = vmul.f32 %v597_v34, %v597_v34 }
  0xff   : > { %v602_v2 = vadd.f32 %v601_v0, %v587_v62  ;;  %v624_v3 = vmul.f32 %v587_v62, %v587_v62  ;;  %v625_v8 = vmul.f32 %v588_v63, %v588_v63  ;;  %v635_v44 = vmul.f32 %v598_v38, %v598_v38 }
 0x100   : > { %v632_v36 = vmul.f32 %v595_v10, %v595_v10  ;;  %v633_v33 = vmul.f32 %v596_v31, %v596_v31 }
 0x101   : > { %v603_v7 = vadd.f32 %v602_v2, %v588_v63  ;;  %v639_v9 = vadd.f32 %v638_v4, %v624_v3 }
 0x103   : > { %v604_v12 = vadd.f32 %v603_v7, %v589_v1  ;;  %v640_v13 = vadd.f32 %v639_v9, %v625_v8 }
 0x105   : > { %v641_v16 = vadd.f32 %v640_v13, %v626_v11  ;;  %v605_v18 = vadd.f32 %v604_v12, %v590_v6 }
 0x107   : > { %v606_v5 = vadd.f32 %v605_v18, %v591_v14  ;;  %v642_v21 = vadd.f32 %v641_v16, %v627_v15 }
 0x109   : > { %v607_v23 = vadd.f32 %v606_v5, %v592_v17  ;;  %v643_v25 = vadd.f32 %v642_v21, %v628_v20 }
 0x10b   : > { %v608_v27 = vadd.f32 %v607_v23, %v593_v19  ;;  %v644_v28 = vadd.f32 %v643_v25, %v629_v24 }
 0x10d   : > { %v645_v30 = vadd.f32 %v644_v28, %v630_v26  ;;  %v609_v32 = vadd.f32 %v608_v27, %v594_v22 }
 0x10f   : > { %v610_v35 = vadd.f32 %v609_v32, %v595_v10  ;;  %v646_v37 = vadd.f32 %v645_v30, %v631_v29 }
 0x111   : > { %v611_v39 = vadd.f32 %v610_v35, %v596_v31  ;;  %v647_v40 = vadd.f32 %v646_v37, %v632_v36 }
 0x113   : > { %v612_v42 = vadd.f32 %v611_v39, %v597_v34  ;;  %v648_v43 = vadd.f32 %v647_v40, %v633_v33 }
 0x115   : > { %v613_v45 = vadd.f32 %v612_v42, %v598_v38  ;;  %v649_v46 = vadd.f32 %v648_v43, %v634_v41 }
 0x117   : > { %v614_v47 = vrot.slane %v613_v45, 4  ;;  %v650_v48 = vadd.f32 %v649_v46, %v635_v44 }
 0x119   : > { %v615_v49 = vadd.f32 %v614_v47, %v613_v45  ;;  %v651_v50 = vrot.slane %v650_v48, 4 }
 0x11b   : > { %v616_v51 = vrot.slane %v615_v49, 2  ;;  %v652_v52 = vadd.f32 %v651_v50, %v650_v48 }
 0x11d   : > { %v617_v53 = vadd.f32 %v616_v51, %v615_v49  ;;  %v653_v54 = vrot.slane %v652_v52, 2 }
 0x11f   : > { %v618_v55 = vrot.slane %v617_v53, 1  ;;  %v654_v56 = vadd.f32 %v653_v54, %v652_v52 }
 0x121   : > { %v655_v57 = vrot.slane %v654_v56, 1  ;;  %v619_v58 = vadd.f32 %v618_v55, %v617_v53 }
 0x123   : > { %v656_v59 = vadd.f32 %v655_v57, %v654_v56 }
 0x125   : > { %v658_v60 = vsel %vm657_vm0, %v619_v58, %v656_v59 }
 0x126   : > { %659 = vst [vmem:[%s238_s28] sm:$0x3] %v658_v60 }
 0x127 PF: > { %s16_s18 = sadd.s32 1, %s973_s18  }
 0x128   : > { %p13_p5 = scmp.ge.s32.totalorder %s16_s18, 6  }
 0x12a   :  { %15 = sbr.rel (!%p13_p5) target bundleno = 1 (0x1), region = 78 }

// kernel: _lambda_.7
= control target key start
LH: loop header
LB: loop body
LE: loop exit
PB: predicated region body
PF: predicated region fallthrough
CT: control target
= control target key end

     0   :  { %s528_s15 = smov 0   ;;  %s644_s0 = inlined_call_operand.vmem [shape: bf16[512,128], index: 0, kind: input, shape index: {}]   ;;  %s645_s1 = inlined_call_operand.vmem [shape: f32[512,128], index: 1, kind: input, shape index: {}]   ;;  %s646_s2 = inlined_call_operand.vmem [shape: f32[1,128], index: 2, kind: input, shape index: {}]   ;;  %s647_s3 = inlined_call_operand.vmem [shape: f32[1,128], index: 3, kind: input, shape index: {}]   ;;  %s648_s4 = inlined_call_operand.vmem [shape: f32[512,128], index: 4, kind: output, shape index: {}]  }
   0x1 LB: > { %s433_s16 = sadd.s32 4294967295, %s501_s15   ;;  %p437_p0 = scmp.ge.s32.totalorder %s501_s15, 1  ;;  %s501_s15 = sphi %s528_s15, %s14_s15  }
   0x2   : > { %p174_p1 = scmp.lt.s32.totalorder %s501_s15, 5 }
   0x4   : > { %p175_p2 = pnand %p437_p0, %p174_p1 }
   0x5   : > { %s438_s17 = sshll.u32 (!%p175_p2), %s433_s16, 4 }
   0x6   : > { %178 = sbr.rel (%p175_p2) target bundleno = 39 (0x27), region = 36  ;;  %p206_p3 = scmp.lt.s32.totalorder (!%p175_p2), %s438_s17, 63 }
   0xb   : > { %s650_s17 = smov (!%p206_p3, %s438_s17), 63  ;;  %v549_v1 = vld [vmem:[%s646_s2] ss:$0 sm:$0xff] }
   0xc   : > { %s439_s18 = sshll.u32 %s650_s17, 2  ;;  %s441_s19 = sshll.u32 %s650_s17, 3  ;;  %v562_v5 = vld [vmem:[%s647_s3] ss:$0 sm:$0xff] }
   0xd   : > { %s543_s22 = scalar_lea.vmem %s644_s0, %s439_s18  ;;  %s556_s27 = scalar_lea.vmem %s645_s1, %s441_s19 }
   0xe   : > { %v449_v0 = vld [vmem:[%s543_s22] sm:$0xff]   ;;  %v480_v4 = vld [vmem:[%s543_s22 + $0x8] sm:$0xff]   ;;  %v481_v8 = vld [vmem:[%s543_s22 + $0x10] sm:$0xff]   ;;  %s593_s6 = scalar_lea.vmem %s648_s4, %s441_s19 }
   0xf   : > { %v450_v2 = vunpack.c.l.bf16 %v449_v0  ;;  %v451_v3 = vunpack.c.h.bf16 %v449_v0  ;;  %v454_v6 = vunpack.c.l.bf16 %v480_v4  ;;  %v455_v7 = vunpack.c.h.bf16 %v480_v4  ;;  %v482_v13 = vld [vmem:[%s543_s22 + $0x18] sm:$0xff]   ;;  %v301_v14 = vld [vmem:[%s556_s27] sm:$0xff]  ;;  %v302_v15 = vld [vmem:[%s556_s27 + $0x8] sm:$0xff] }
  0x10   : > { %v458_v11 = vunpack.c.l.bf16 %v481_v8  ;;  %v459_v12 = vunpack.c.h.bf16 %v481_v8  ;;  %v462_v18 = vunpack.c.l.bf16 %v482_v13  ;;  %v463_v19 = vunpack.c.h.bf16 %v482_v13  ;;  %v303_v22 = vld [vmem:[%s556_s27 + $0x10] sm:$0xff]  ;;  %v304_v23 = vld [vmem:[%s556_s27 + $0x18] sm:$0xff]  ;;  %v305_v28 = vld [vmem:[%s556_s27 + $0x20] sm:$0xff] }
  0x11   : > { %v262_v9 = vmul.f32 %v450_v2, %v549_v1  ;;  %v263_v10 = vmul.f32 %v451_v3, %v549_v1  ;;  %v264_v16 = vmul.f32 %v454_v6, %v549_v1  ;;  %v265_v17 = vmul.f32 %v455_v7, %v549_v1  ;;  %v306_v29 = vld [vmem:[%s556_s27 + $0x28] sm:$0xff]  ;;  %v307_v36 = vld [vmem:[%s556_s27 + $0x30] sm:$0xff]  ;;  %v308_v37 = vld [vmem:[%s556_s27 + $0x38] sm:$0xff] }
  0x12   : > { %v266_v24 = vmul.f32 %v458_v11, %v549_v1  ;;  %v267_v25 = vmul.f32 %v459_v12, %v549_v1  ;;  %v268_v30 = vmul.f32 %v462_v18, %v549_v1  ;;  %v269_v31 = vmul.f32 %v463_v19, %v549_v1  ;;  %v483_v42 = vld [vmem:[%s543_s22 + $0x20] sm:$0xff]   ;;  %v484_v47 = vld [vmem:[%s543_s22 + $0x28] sm:$0xff]   ;;  %v485_v52 = vld [vmem:[%s543_s22 + $0x30] sm:$0xff]  }
  0x13   : > { %v285_v20 = vadd.f32 %v562_v5, %v262_v9  ;;  %v286_v21 = vadd.f32 %v562_v5, %v263_v10  ;;  %v287_v26 = vadd.f32 %v562_v5, %v264_v16  ;;  %v288_v27 = vadd.f32 %v562_v5, %v265_v17  ;;  %v486_v57 = vld [vmem:[%s543_s22 + $0x38] sm:$0xff]   ;;  %v309_v3 = vld [vmem:[%s556_s27 + $0x40] sm:$0xff]  ;;  %v310_v4 = vld [vmem:[%s556_s27 + $0x48] sm:$0xff] }
  0x14   : > { %v289_v34 = vadd.f32 %v562_v5, %v266_v24  ;;  %v290_v35 = vadd.f32 %v562_v5, %v267_v25  ;;  %v291_v40 = vadd.f32 %v562_v5, %v268_v30  ;;  %v292_v41 = vadd.f32 %v562_v5, %v269_v31  ;;  %v311_v12 = vld [vmem:[%s556_s27 + $0x50] sm:$0xff]  ;;  %v312_v13 = vld [vmem:[%s556_s27 + $0x58] sm:$0xff]  ;;  %v313_v18 = vld [vmem:[%s556_s27 + $0x60] sm:$0xff] }
  0x15   : > { %v317_v32 = vadd.f32 %v301_v14, %v285_v20  ;;  %v318_v33 = vadd.f32 %v302_v15, %v286_v21  ;;  %v319_v38 = vadd.f32 %v303_v22, %v287_v26  ;;  %v320_v39 = vadd.f32 %v304_v23, %v288_v27  ;;  %v314_v19 = vld [vmem:[%s556_s27 + $0x68] sm:$0xff]  ;;  %v315_v26 = vld [vmem:[%s556_s27 + $0x70] sm:$0xff]  ;;  %v316_v27 = vld [vmem:[%s556_s27 + $0x78] sm:$0xff] }
  0x16   : > { %v321_v45 = vadd.f32 %v305_v28, %v289_v34  ;;  %v322_v46 = vadd.f32 %v306_v29, %v290_v35  ;;  %v323_v50 = vadd.f32 %v307_v36, %v291_v40  ;;  %v324_v51 = vadd.f32 %v308_v37, %v292_v41 }
  0x17   : > { %v333_v43 = vmax.f32 %v317_v32, 0.0  ;;  %v334_v44 = vmax.f32 %v318_v33, 0.0  ;;  %v335_v48 = vmax.f32 %v319_v38, 0.0  ;;  %v336_v49 = vmax.f32 %v320_v39, 0.0 }
  0x18   : > { %v337_v53 = vmax.f32 %v321_v45, 0.0  ;;  %v338_v54 = vmax.f32 %v322_v46, 0.0  ;;  %v466_v55 = vunpack.c.l.bf16 %v483_v42  ;;  %v467_v56 = vunpack.c.h.bf16 %v483_v42 }
  0x19   : > { %349 = vst [vmem:[%s593_s6] sm:$0xff] %v333_v43  ;;  %350 = vst [vmem:[%s593_s6 + $0x8] sm:$0xff] %v334_v44  ;;  %v339_v58 = vmax.f32 %v323_v50, 0.0  ;;  %v340_v59 = vmax.f32 %v324_v51, 0.0  ;;  %v470_v60 = vunpack.c.l.bf16 %v484_v47  ;;  %v471_v61 = vunpack.c.h.bf16 %v484_v47 }
  0x1a   : > { %351 = vst [vmem:[%s593_s6 + $0x10] sm:$0xff] %v335_v48  ;;  %352 = vst [vmem:[%s593_s6 + $0x18] sm:$0xff] %v336_v49  ;;  %v270_v62 = vmul.f32 %v466_v55, %v549_v1  ;;  %v271_v63 = vmul.f32 %v467_v56, %v549_v1  ;;  %v474_v0 = vunpack.c.l.bf16 %v485_v52  ;;  %v475_v2 = vunpack.c.h.bf16 %v485_v52 }
  0x1b   : > { %353 = vst [vmem:[%s593_s6 + $0x20] sm:$0xff] %v337_v53  ;;  %354 = vst [vmem:[%s593_s6 + $0x28] sm:$0xff] %v338_v54  ;;  %v272_v6 = vmul.f32 %v470_v60, %v549_v1  ;;  %v273_v7 = vmul.f32 %v471_v61, %v549_v1  ;;  %v478_v8 = vunpack.c.l.bf16 %v486_v57  ;;  %v479_v9 = vunpack.c.h.bf16 %v486_v57 }
  0x1c   : > { %355 = vst [vmem:[%s593_s6 + $0x30] sm:$0xff] %v339_v58  ;;  %356 = vst [vmem:[%s593_s6 + $0x38] sm:$0xff] %v340_v59  ;;  %v293_v10 = vadd.f32 %v562_v5, %v270_v62  ;;  %v294_v11 = vadd.f32 %v562_v5, %v271_v63  ;;  %v274_v14 = vmul.f32 %v474_v0, %v549_v1 }
  0x1d   : > { %v275_v15 = vmul.f32 %v475_v2, %v549_v1  ;;  %v295_v16 = vadd.f32 %v562_v5, %v272_v6  ;;  %v296_v17 = vadd.f32 %v562_v5, %v273_v7  ;;  %v276_v20 = vmul.f32 %v478_v8, %v549_v1 }
  0x1e   : > { %v277_v21 = vmul.f32 %v479_v9, %v549_v1  ;;  %v325_v22 = vadd.f32 %v309_v3, %v293_v10  ;;  %v326_v23 = vadd.f32 %v310_v4, %v294_v11  ;;  %v297_v24 = vadd.f32 %v562_v5, %v274_v14 }
  0x1f   : > { %v298_v25 = vadd.f32 %v562_v5, %v275_v15  ;;  %v327_v28 = vadd.f32 %v311_v12, %v295_v16  ;;  %v328_v29 = vadd.f32 %v312_v13, %v296_v17  ;;  %v299_v30 = vadd.f32 %v562_v5, %v276_v20 }
  0x20   : > { %v300_v31 = vadd.f32 %v562_v5, %v277_v21  ;;  %v341_v32 = vmax.f32 %v325_v22, 0.0  ;;  %v342_v1 = vmax.f32 %v326_v23, 0.0  ;;  %v329_v33 = vadd.f32 %v313_v18, %v297_v24 }
  0x21   : > { %v330_v34 = vadd.f32 %v314_v19, %v298_v25  ;;  %v343_v35 = vmax.f32 %v327_v28, 0.0  ;;  %v344_v36 = vmax.f32 %v328_v29, 0.0  ;;  %v331_v37 = vadd.f32 %v315_v26, %v299_v30 }
  0x22   : > { %v332_v38 = vadd.f32 %v316_v27, %v300_v31  ;;  %357 = vst [vmem:[%s593_s6 + $0x40] sm:$0xff] %v341_v32  ;;  %358 = vst [vmem:[%s593_s6 + $0x48] sm:$0xff] %v342_v1  ;;  %v345_v39 = vmax.f32 %v329_v33, 0.0 }
  0x23   : > { %v346_v40 = vmax.f32 %v330_v34, 0.0  ;;  %359 = vst [vmem:[%s593_s6 + $0x50] sm:$0xff] %v343_v35  ;;  %360 = vst [vmem:[%s593_s6 + $0x58] sm:$0xff] %v344_v36  ;;  %v347_v41 = vmax.f32 %v331_v37, 0.0 }
  0x24   : > { %v348_v5 = vmax.f32 %v332_v38, 0.0  ;;  %361 = vst [vmem:[%s593_s6 + $0x60] sm:$0xff] %v345_v39 }
  0x25   : > { %362 = vst [vmem:[%s593_s6 + $0x68] sm:$0xff] %v346_v40  ;;  %363 = vst [vmem:[%s593_s6 + $0x70] sm:$0xff] %v347_v41 }
  0x26   : > { %364 = vst [vmem:[%s593_s6 + $0x78] sm:$0xff] %v348_v5 }
  0x27 PF: > { %s14_s15 = sadd.s32 1, %s501_s15  }
  0x28   : > { %p11_p4 = scmp.ge.s32.totalorder %s14_s15, 6  }
  0x2a   :  { %13 = sbr.rel (!%p11_p4) target bundleno = 1 (0x1), region = 69 }

// kernel: _lambda_.5
= control target key start
LH: loop header
LB: loop body
LE: loop exit
PB: predicated region body
PF: predicated region fallthrough
CT: control target
= control target key end

     0   :  { %s6795_s18 = smov 0   ;;  %s7581_s0 = inlined_call_operand.vmem [shape: bf16[2,16,16,128], index: 0, kind: input, shape index: {}]   ;;  %s7582_s1 = inlined_call_operand.vmem [shape: f32[1,128], index: 1, kind: input, shape index: {}]   ;;  %s7583_s2 = inlined_call_operand.vmem [shape: f32[1,128], index: 2, kind: input, shape index: {}]   ;;  %s7584_s3 = inlined_call_operand.vmem [shape: bf16[1152,128], index: 3, kind: input, shape index: {}]   ;;  %s7585_s4 = inlined_call_operand.vmem [shape: bf16[512,128], index: 4, kind: output, shape index: {0}]   ;;  %s7586_s5 = inlined_call_operand.vmem [shape: f32[2,2,128], index: 5, kind: output, shape index: {1}]  }
   0x1 LB: > { %s6801_s19 = sadd.s32 4294967295, %s6761_s18   ;;  %p4886_p0 = scmp.ge.s32.totalorder %s6761_s18, 1  ;;  %s6761_s18 = sphi %s6795_s18, %s16_s18  }
   0x2   : > { %p190_p1 = scmp.lt.s32.totalorder %s6761_s18, 3 }
   0x4   : > { %p191_p2 = pnand %p4886_p0, %p190_p1 }
   0x6   : > { %194 = sbr.rel (%p191_p2) target bundleno = 562 (0x232), region = 36 }
   0xb   : > { %v6472_v0 = vld [vmem:[%s7584_s3 + $0x78] sm:$0xff]   ;;  %v6763_v2 = vmov 0.0   ;;  %v6474_v3 = vld [vmem:[%s7584_s3 + $0x70] sm:$0xff]   ;;  %v6764_v5 = vmov 0.0|0.0   ;;  %p222_p3 = scmp.lt.s32.totalorder %s6801_s19, 1  ;;  %v6476_v6 = vld [vmem:[%s7584_s3 + $0x68] sm:$0xff]  }
   0xc   : > { %v6473_v1 = vld [vmem:[%s7584_s3 + $0x38] sm:$0xff]   ;;  %412 = vst [vmem:[#allocation2] sm:$0xff] %v6763_v2  ;;  %413 = vst [vmem:[#allocation2 + $0x8] sm:$0xff] %v6763_v2  ;;  %5927 = vmatprep.subr.bf16.mxu0 %v6472_v0  ;;  %6447 = vmatprep.subr.bf16.mxu1 %v6472_v0  ;;  %v6475_v4 = vld [vmem:[%s7584_s3 + $0x30] sm:$0xff]   ;;  %s4889_s27 = sshll.u32 %s6801_s19, 5  ;;  %vm4792_vm0 = vcmask 1040384  }
   0xd   : > { %414 = vst [vmem:[#allocation2 + $0x10] sm:$0x3] %v6763_v2  ;;  %416 = vst [vmem:[#allocation2 + $0x198] sm:$0xff] %v6763_v2  ;;  %5928 = vmatpush3.bf16.msra.mxu0 %v6473_v1  ;;  %6455 = vmatpush3.bf16.msra.mxu1 %v6473_v1  ;;  %v6477_v7 = vld [vmem:[%s7584_s3 + $0x28] sm:$0xff]   ;;  %s6825_s7 = scalar_select %p222_p3, %s6801_s19, 1  ;;  %v6478_v8 = vld [vmem:[%s7584_s3 + $0x60] sm:$0xff]  }
   0xe   : > { %417 = vst [vmem:[#allocation2 + $0x1a0] sm:$0xff] %v6763_v2  ;;  %418 = vst [vmem:[#allocation2 + $0x1a8] sm:$0x3] %v6763_v2  ;;  %5929 = vmatprep.subr.bf16.mxu0 %v6474_v3  ;;  %6448 = vmatprep.subr.bf16.mxu1 %v6474_v3  ;;  %v6479_v9 = vld [vmem:[%s7584_s3 + $0x20] sm:$0xff]   ;;  %v6480_v10 = vld [vmem:[%s7584_s3 + $0x58] sm:$0xff]   ;;  %p228_p4 = scmp.lt.s32.totalorder %s4889_s27, 63 }
   0xf   : > { %420 = vst [vmem:[#allocation2 + $0x18] sm:$0x1] %v6763_v2  ;;  %421 = vst [vmem:[#allocation2 + $0x30] sm:$0x1] %v6763_v2  ;;  %s5432_s12 = sshll.u32 %s6825_s7, 7  ;;  %v6481_v11 = vld [vmem:[%s7584_s3 + $0x18] sm:$0xff]  }
  0x10   : > { %422 = vst [vmem:[#allocation2 + $0x48] sm:$0x1] %v6763_v2  ;;  %423 = vst [vmem:[#allocation2 + $0x60] sm:$0x1] %v6763_v2  ;;  %s6843_s21 = scalar_lea.vmem %s7581_s0, %s5432_s12  ;;  %v6482_v12 = vld [vmem:[%s7584_s3 + $0x50] sm:$0xff]   ;;  %v6484_v25 = vld [vmem:[%s7584_s3 + $0x48] sm:$0xff]  }
  0x11   : > { %424 = vst [vmem:[#allocation2 + $0x78] sm:$0x1] %v6763_v2  ;;  %425 = vst [vmem:[#allocation2 + $0x90] sm:$0x1] %v6763_v2  ;;  %5930 = vmatpush3.bf16.msra.mxu0 %v6475_v4  ;;  %6456 = vmatpush3.bf16.msra.mxu1 %v6475_v4  ;;  %v5907_v19 = vld [vmem:[%s6843_s21 + $0x58] sm:$0xff]   ;;  %v6483_v21 = vld [vmem:[%s7584_s3 + $0x10] sm:$0xff]  }
  0x12   : > { %426 = vst [vmem:[#allocation2 + $0xa8] sm:$0x1] %v6763_v2  ;;  %427 = vst [vmem:[#allocation2 + $0xc0] sm:$0x1] %v6763_v2  ;;  %5931 = vmatprep.subr.bf16.mxu0 %v6476_v6  ;;  %6449 = vmatprep.subr.bf16.mxu1 %v6476_v6  ;;  %v6852_v20 = vld [vmem:[%s7582_s1] ss:$0 sm:$0xff]  ;;  %v5799_v22 = vunpack.c.l.bf16 %v5907_v19  ;;  %v5800_v23 = vunpack.c.h.bf16 %v5907_v19 }
  0x13   : > { %428 = vst [vmem:[#allocation2 + $0xd8] sm:$0x1] %v6763_v2  ;;  %429 = vst [vmem:[#allocation2 + $0xf0] sm:$0x1] %v6763_v2  ;;  %v680_v14 = vld [vmem:[#allocation2 + $0x1] sm:$0xff]  ;;  %v6494_v44 = vld [vmem:[%s7584_s3 + $0xf8] sm:$0xff]  }
  0x14   : > { %430 = vst [vmem:[#allocation2 + $0x108] sm:$0x1] %v6763_v2  ;;  %431 = vst [vmem:[#allocation2 + $0x120] sm:$0x1] %v6763_v2  ;;  %v681_v15 = vld [vmem:[#allocation2 + $0x9] sm:$0xff]  ;;  %v5465_v17 = vpack.c.bf16 %v680_v14, %v680_v14  ;;  %v331_v26 = vmul.f32 %v5799_v22, %v6852_v20  ;;  %v332_v27 = vmul.f32 %v5800_v23, %v6852_v20  ;;  %v6486_v31 = vld [vmem:[%s7584_s3 + $0x40] sm:$0xff]  }
  0x15   : > { %432 = vst [vmem:[#allocation2 + $0x138] sm:$0x1] %v6763_v2  ;;  %433 = vst [vmem:[#allocation2 + $0x150] sm:$0x1] %v6763_v2  ;;  %5932 = vmatpush3.bf16.msra.mxu0 %v6477_v7  ;;  %6457 = vmatpush3.bf16.msra.mxu1 %v6477_v7  ;;  %v5466_v18 = vpack.c.bf16 %v681_v15, %v681_v15  ;;  %v6860_v24 = vld [vmem:[%s7583_s2] ss:$0 sm:$0xff] }
  0x16   : > { %434 = vst [vmem:[#allocation2 + $0x168] sm:$0x1] %v6763_v2  ;;  %435 = vst [vmem:[#allocation2 + $0x180] sm:$0x1] %v6763_v2  ;;  %5933 = vmatprep.subr.bf16.mxu0 %v6478_v8  ;;  %6450 = vmatprep.subr.bf16.mxu1 %v6478_v8  ;;  %v6485_v28 = vld [vmem:[%s7584_s3 + $0x8] sm:$0xff]   ;;  %v370_v29 = vadd.f32 %v6860_v24, %v331_v26  ;;  %v371_v30 = vadd.f32 %v6860_v24, %v332_v27  ;;  %v5754_v34 = vld [vmem:[%s6843_s21] sm:$0xff]  }
  0x17   : > { %438 = vst [vmem:[#allocation2 + $0x29] sm:$0x1] %v6763_v2  ;;  %439 = vst [vmem:[#allocation2 + $0x41] sm:$0x1] %v6763_v2  ;;  %v5908_v35 = vld [vmem:[%s6843_s21 + $0x60] sm:$0xff]   ;;  %v5755_v36 = vunpack.c.l.bf16 %v5754_v34  ;;  %v5756_v37 = vunpack.c.h.bf16 %v5754_v34  ;;  %v6495_v48 = vld [vmem:[%s7584_s3 + $0x178] sm:$0xff]  }
  0x18   : > { %440 = vst [vmem:[#allocation2 + $0x59] sm:$0x1] %v6763_v2  ;;  %441 = vst [vmem:[#allocation2 + $0x71] sm:$0x1] %v6763_v2  ;;  %v402_v32 = vmax.f32 %v370_v29, 0.0  ;;  %v403_v33 = vmax.f32 %v371_v30, 0.0  ;;  %v5803_v38 = vunpack.c.l.bf16 %v5908_v35  ;;  %v5804_v39 = vunpack.c.h.bf16 %v5908_v35 }
  0x19   : > { %442 = vst [vmem:[#allocation2 + $0x89] sm:$0x1] %v6763_v2  ;;  %443 = vst [vmem:[#allocation2 + $0xa1] sm:$0x1] %v6763_v2  ;;  %5934 = vmatpush3.bf16.msra.mxu0 %v6479_v9  ;;  %6458 = vmatpush3.bf16.msra.mxu1 %v6479_v9  ;;  %v6487_v40 = vld [vmem:[%s7584_s3] sm:$0xff]   ;;  %v309_v45 = vmul.f32 %v5755_v36, %v6852_v20  ;;  %v310_v46 = vmul.f32 %v5756_v37, %v6852_v20  ;;  %v6497_v50 = vld [vmem:[%s7584_s3 + $0x138] sm:$0xff]  }
  0x1a   : > { %444 = vst [vmem:[#allocation2 + $0xb9] sm:$0x1] %v6763_v2  ;;  %445 = vst [vmem:[#allocation2 + $0xd1] sm:$0x1] %v6763_v2  ;;  %5935 = vmatprep.subr.bf16.mxu0 %v6480_v10  ;;  %6451 = vmatprep.subr.bf16.mxu1 %v6480_v10  ;;  %v5489_v41 = vpack.c.bf16 %v402_v32, %v402_v32  ;;  %v5490_v42 = vpack.c.bf16 %v403_v33, %v403_v33  ;;  %v6509_v59 = vld [vmem:[%s7584_s3 + $0x170] sm:$0xff]   ;;  %v5897_v61 = vld [vmem:[%s6843_s21 + $0x8] sm:$0xff]  }
  0x1b   : > { %446 = vst [vmem:[#allocation2 + $0xe9] sm:$0x1] %v6763_v2  ;;  %447 = vst [vmem:[#allocation2 + $0x101] sm:$0x1] %v6763_v2  ;;  %v333_v47 = vmul.f32 %v5803_v38, %v6852_v20  ;;  %v334_v49 = vmul.f32 %v5804_v39, %v6852_v20  ;;  %v348_v51 = vadd.f32 %v6860_v24, %v309_v45  ;;  %v5909_v62 = vld [vmem:[%s6843_s21 + $0x68] sm:$0xff]   ;;  %v5759_v4 = vunpack.c.l.bf16 %v5897_v61  ;;  %v6511_v9 = vld [vmem:[%s7584_s3 + $0x130] sm:$0xff]  }
  0x1c   : > { %448 = vst [vmem:[#allocation2 + $0x119] sm:$0x1] %v6763_v2  ;;  %449 = vst [vmem:[#allocation2 + $0x131] sm:$0x1] %v6763_v2  ;;  %v349_v52 = vadd.f32 %v6860_v24, %v310_v46  ;;  %v5760_v8 = vunpack.c.h.bf16 %v5897_v61  ;;  %v5910_v22 = vld [vmem:[%s6843_s21 + $0x70] sm:$0xff]   ;;  %v6531_v46 = vld [vmem:[%s7584_s3 + $0x128] sm:$0xff]  }
  0x1d   : > { %450 = vst [vmem:[#allocation2 + $0x149] sm:$0x1] %v6763_v2  ;;  %451 = vst [vmem:[#allocation2 + $0x161] sm:$0x1] %v6763_v2  ;;  %5936 = vmatpush3.bf16.msra.mxu0 %v6481_v11  ;;  %6459 = vmatpush3.bf16.msra.mxu1 %v6481_v11  ;;  %v372_v53 = vadd.f32 %v6860_v24, %v333_v47  ;;  %v373_v55 = vadd.f32 %v6860_v24, %v334_v49  ;;  %v380_v56 = vmax.f32 %v348_v51, 0.0  ;;  %s7606_s27 = smov (!%p228_p4, %s4889_s27), 63 }
  0x1e   : > { %452 = vst [vmem:[#allocation2 + $0x179] sm:$0x1] %v6763_v2  ;;  %453 = vst [vmem:[#allocation2 + $0x191] sm:$0x1] %v6763_v2  ;;  %5937 = vmatprep.subr.bf16.mxu0 %v6482_v12  ;;  %6452 = vmatprep.subr.bf16.mxu1 %v6482_v12  ;;  %v381_v57 = vmax.f32 %v349_v52, 0.0  ;;  %v311_v10 = vmul.f32 %v5759_v4, %v6852_v20  ;;  %v5807_v11 = vunpack.c.l.bf16 %v5909_v62  ;;  %v5808_v12 = vunpack.c.h.bf16 %v5909_v62  ;;  %s4890_s19 = sshll.u32 %s7606_s27, 2 }
  0x1f   : > { %419 = vst [vmem:[#allocation2] sm:$0x1] %v6763_v2  ;;  %437 = vst [vmem:[#allocation2 + $0x11] sm:$0x1] %v6763_v2  ;;  %v404_v58 = vmax.f32 %v372_v53, 0.0  ;;  %v405_v60 = vmax.f32 %v373_v55, 0.0  ;;  %v5467_v1 = vpack.c.bf16 %v380_v56, %v380_v56  ;;  %v5811_v27 = vunpack.c.l.bf16 %v5910_v22  ;;  %s7477_s30 = scalar_lea.vmem %s7585_s4, %s4890_s19 }
  0x20   : > { %436 = vst [vmem:[#allocation2 + $0x198] sm:$0x1] %v6763_v2  ;;  %454 = vst [vmem:[#allocation2 + $0x1a9] sm:$0x1] %v6763_v2  ;;  %v5468_v2 = vpack.c.bf16 %v381_v57, %v381_v57  ;;  %v350_v14 = vadd.f32 %v6860_v24, %v311_v10  ;;  %v335_v15 = vmul.f32 %v5807_v11, %v6852_v20  ;;  %v5812_v34 = vunpack.c.h.bf16 %v5910_v22  ;;  %s4891_s6 = sshll.u32 %s6825_s7, 1 }
  0x21   : > { %649 = vst [vmem:[#allocation3 + $0x24] sm:$0xf] %v6764_v5  ;;  %840 = vst [vmem:[#allocation3 + $0x4] sm:$0xf] %v5465_v17  ;;  %5938 = vmatpush3.bf16.msra.mxu0 %v6483_v21  ;;  %6460 = vmatpush3.bf16.msra.mxu1 %v6483_v21  ;;  %v5491_v3 = vpack.c.bf16 %v404_v58, %v404_v58  ;;  %v5492_v7 = vpack.c.bf16 %v405_v60, %v405_v60  ;;  %v5898_v17 = vld [vmem:[%s6843_s21 + $0x10] sm:$0xff]   ;;  %s236_s10 = scalar_lea.vmem %s7586_s5, %s4891_s6 }
  0x22   : > { %841 = vst [vmem:[#allocation3 + $0x28] sm:$0xf] %v5466_v18  ;;  %5939 = vmatprep.subr.bf16.mxu0 %v6484_v25  ;;  %6453 = vmatprep.subr.bf16.mxu1 %v6484_v25  ;;  %478 = vst [vmem:[#allocation2 + $0x121] sm:$0xff] %v402_v32  ;;  %v5763_v19 = vunpack.c.l.bf16 %v5898_v17  ;;  %v5764_v21 = vunpack.c.h.bf16 %v5898_v17  ;;  %v382_v23 = vmax.f32 %v350_v14, 0.0  ;;  %v374_v25 = vadd.f32 %v6860_v24, %v335_v15  ;;  %v6507_v15 = vld [vmem:[%s7584_s3 + $0xa8] sm:$0xff]  }
  0x23   : > { %479 = vst [vmem:[#allocation2 + $0x129] sm:$0xff] %v403_v33  ;;  %864 = vst [vmem:[#allocation3 + $0x364] sm:$0xf] %v5489_v41  ;;  %v6496_v41 = vld [vmem:[%s7584_s3 + $0xb8] sm:$0xff]   ;;  %v337_v51 = vmul.f32 %v5811_v27, %v6852_v20  ;;  %v338_v52 = vmul.f32 %v5812_v34, %v6852_v20 }
  0x24   : > { %865 = vst [vmem:[#allocation3 + $0x388] sm:$0xf] %v5490_v42  ;;  %456 = vst [vmem:[#allocation2 + $0x19] sm:$0xff] %v380_v56  ;;  %v313_v32 = vmul.f32 %v5763_v19, %v6852_v20  ;;  %v314_v33 = vmul.f32 %v5764_v21, %v6852_v20  ;;  %v5469_v39 = vpack.c.bf16 %v382_v23, %v382_v23  ;;  %v6508_v21 = vld [vmem:[%s7584_s3 + $0xe0] sm:$0xff]  }
  0x25   : > { %5940 = vmatpush3.bf16.msra.mxu0 %v6485_v28  ;;  %6461 = vmatpush3.bf16.msra.mxu1 %v6485_v28  ;;  %457 = vst [vmem:[#allocation2 + $0x21] sm:$0xff] %v381_v57  ;;  %480 = vst [vmem:[#allocation2 + $0x139] sm:$0xff] %v404_v58  ;;  %v376_v58 = vadd.f32 %v6860_v24, %v337_v51  ;;  %v5900_v51 = vld [vmem:[%s6843_s21 + $0x20] sm:$0xff]  }
  0x26   : > { %v488_v13 = vld [vmem:[#allocation2] sm:$0xff]  ;;  %5941 = vmatprep.subr.bf16.mxu0 %v6486_v31  ;;  %6454 = vmatprep.subr.bf16.mxu1 %v6486_v31  ;;  %481 = vst [vmem:[#allocation2 + $0x141] sm:$0xff] %v405_v60  ;;  %842 = vst [vmem:[#allocation3 + $0x4c] sm:$0xf] %v5467_v1  ;;  %v352_v49 = vadd.f32 %v6860_v24, %v313_v32  ;;  %v6499_v60 = vld [vmem:[%s7584_s3 + $0xb0] sm:$0xff]  }
  0x27   : > { %v5433_v16 = vpack.c.bf16 %v488_v13, %v488_v13  ;;  %843 = vst [vmem:[#allocation3 + $0x70] sm:$0xf] %v5468_v2  ;;  %866 = vst [vmem:[#allocation3 + $0x3ac] sm:$0xf] %v5491_v3  ;;  %v312_v13 = vmul.f32 %v5760_v8, %v6852_v20  ;;  %v5899_v1 = vld [vmem:[%s6843_s21 + $0x18] sm:$0xff]   ;;  %v872_v2 = vld [vmem:[#allocation2 + $0x2] sm:$0xff] }
  0x28   : > { %867 = vst [vmem:[#allocation3 + $0x3d0] sm:$0xf] %v5492_v7  ;;  %458 = vst [vmem:[#allocation2 + $0x31] sm:$0xff] %v382_v23  ;;  %v384_v56 = vmax.f32 %v352_v49, 0.0  ;;  %v5767_v4 = vunpack.c.l.bf16 %v5899_v1  ;;  %v5497_v7 = vpack.c.bf16 %v872_v2, %v872_v2  ;;  %v6505_v8 = vld [vmem:[%s7584_s3 + $0xe8] sm:$0xff]  }
  0x29   : > { %648 = vst [vmem:[#allocation3] sm:$0xf] %v5433_v16  ;;  %v6490_v43 = vld [vmem:[#allocation3 + $0x4] ss:$36 sps:$4 sm:$0xff]   ;;  %5942 = vmatpush3.bf16.msra.mxu0 %v6487_v40  ;;  %6462 = vmatpush3.bf16.msra.mxu1 %v6487_v40  ;;  %v512_v63 = vld [vmem:[#allocation2 + $0x120] sm:$0xff]  ;;  %v336_v16 = vmul.f32 %v5808_v12, %v6852_v20  ;;  %v351_v18 = vadd.f32 %v6860_v24, %v312_v13  ;;  %v6528_v40 = vld [vmem:[%s7584_s3 + $0x168] sm:$0xff]  }
  0x2a   : > { %3721 = vmatprep.mubr.bf16.mxu0 %v6490_v43  ;;  %6039 = vmatprep.subr.bf16.mxu1 %v6494_v44  ;;  %v513_v0 = vld [vmem:[#allocation2 + $0x128] sm:$0xff]  ;;  %v5457_v5 = vpack.c.bf16 %v512_v63, %v512_v63  ;;  %v406_v44 = vmax.f32 %v374_v25, 0.0  ;;  %844 = vst [vmem:[#allocation3 + $0x94] sm:$0xf] %v5469_v39  ;;  %460 = vst [vmem:[#allocation2 + $0x49] sm:$0xff] %v384_v56  ;;  %v5471_v61 = vpack.c.bf16 %v384_v56, %v384_v56  ;;  %v6542_v39 = vld [vmem:[%s7584_s3 + $0x160] sm:$0xff]  }
  0x2b   : > { %6151 = vmatprep.subr.bf16.mxu0 %v6495_v48  ;;  %v5458_v6 = vpack.c.bf16 %v513_v0, %v513_v0  ;;  %v375_v26 = vadd.f32 %v6860_v24, %v336_v16  ;;  %v490_v28 = vld [vmem:[#allocation2 + $0x18] sm:$0xff]  ;;  %v383_v31 = vmax.f32 %v351_v18, 0.0  ;;  %v6498_v48 = vld [vmem:[%s7584_s3 + $0xf0] sm:$0xff]   ;;  %v408_v63 = vmax.f32 %v376_v58, 0.0  ;;  %1032 = vst [vmem:[#allocation3 + $0x8] sm:$0xf] %v5497_v7 }
  0x2c   : > { %672 = vst [vmem:[#allocation3 + $0x360] sm:$0xf] %v5457_v5  ;;  %v491_v29 = vld [vmem:[#allocation2 + $0x20] sm:$0xff]  ;;  %v514_v30 = vld [vmem:[#allocation2 + $0x138] sm:$0xff]  ;;  %v5435_v35 = vpack.c.bf16 %v490_v28, %v490_v28  ;;  %482 = vst [vmem:[#allocation2 + $0x151] sm:$0xff] %v406_v44  ;;  %v5768_v5 = vunpack.c.h.bf16 %v5899_v1  ;;  %v315_v17 = vmul.f32 %v5767_v4, %v6852_v20 }
  0x2d   : > { %673 = vst [vmem:[#allocation3 + $0x384] sm:$0xf] %v5458_v6  ;;  %v5436_v36 = vpack.c.bf16 %v491_v29, %v491_v29  ;;  %v515_v37 = vld [vmem:[#allocation2 + $0x140] sm:$0xff]  ;;  %v5459_v38 = vpack.c.bf16 %v514_v30, %v514_v30  ;;  %459 = vst [vmem:[#allocation2 + $0x39] sm:$0xff] %v383_v31  ;;  %v5470_v43 = vpack.c.bf16 %v383_v31, %v383_v31  ;;  %v407_v45 = vmax.f32 %v375_v26, 0.0  ;;  %v873_v6 = vld [vmem:[#allocation2 + $0xa] sm:$0xff] }
  0x2e   : > { %v5460_v42 = vpack.c.bf16 %v515_v37, %v515_v37  ;;  %650 = vst [vmem:[#allocation3 + $0x48] sm:$0xf] %v5435_v35  ;;  %1224 = vst [vmem:[#allocation3 + $0xc] sm:$0xf] %v5435_v35  ;;  %v6493_v53 = vld [vmem:[#allocation3 + $0x364] ss:$36 sps:$4 sm:$0xff]   ;;  %v5495_v11 = vpack.c.bf16 %v408_v63, %v408_v63  ;;  %v5498_v13 = vpack.c.bf16 %v873_v6, %v873_v6 }
  0x2f   : > { %651 = vst [vmem:[#allocation3 + $0x6c] sm:$0xf] %v5436_v36  ;;  %674 = vst [vmem:[#allocation3 + $0x3a8] sm:$0xf] %v5459_v38  ;;  %v5494_v55 = vpack.c.bf16 %v407_v45, %v407_v45  ;;  %3817 = vmatprep.mubr.bf16.mxu1 %v6493_v53  ;;  %v492_v3 = vld [vmem:[#allocation2 + $0x30] sm:$0xff]  ;;  %v316_v18 = vmul.f32 %v5768_v5, %v6852_v20  ;;  %v354_v26 = vadd.f32 %v6860_v24, %v315_v17  ;;  %v6510_v30 = vld [vmem:[%s7584_s3 + $0xa0] sm:$0xff]  }
  0x30   : > { %v6488_v54 = vld [vmem:[#allocation3] ss:$36 sps:$4 sm:$0xff]   ;;  %1225 = vst [vmem:[#allocation3 + $0x30] sm:$0xf] %v5436_v36  ;;  %675 = vst [vmem:[#allocation3 + $0x3cc] sm:$0xf] %v5460_v42  ;;  %v5437_v10 = vpack.c.bf16 %v492_v3, %v492_v3  ;;  %v5771_v53 = vunpack.c.l.bf16 %v5900_v51 }
  0x31   : > { %3722 = vmatmul.mubr.bf16.vlgmr.msra.gmra.mxu0 %v6488_v54  ;;  %845 = vst [vmem:[#allocation3 + $0xb8] sm:$0xf] %v5470_v43  ;;  %483 = vst [vmem:[#allocation2 + $0x159] sm:$0xff] %v407_v45  ;;  %v5493_v54 = vpack.c.bf16 %v406_v44, %v406_v44  ;;  %v6500_v14 = vld [vmem:[#allocation3 + $0x4c] ss:$36 sps:$4 sm:$0xff]   ;;  %v355_v27 = vadd.f32 %v6860_v24, %v316_v18  ;;  %v494_v32 = vld [vmem:[#allocation2 + $0x48] sm:$0xff] }
  0x32   : > { %6152 = vmatpush3.bf16.msra.mxu0 %v6497_v50  ;;  %v353_v50 = vadd.f32 %v6860_v24, %v314_v33  ;;  %869 = vst [vmem:[#allocation3 + $0x418] sm:$0xf] %v5494_v55  ;;  %846 = vst [vmem:[#allocation3 + $0xdc] sm:$0xf] %v5471_v61  ;;  %3729 = vmatprep.mubr.bf16.mxu0 %v6500_v14  ;;  %v6503_v22 = vld [vmem:[#allocation3 + $0x3ac] ss:$36 sps:$4 sm:$0xff]   ;;  %v5439_v37 = vpack.c.bf16 %v494_v32, %v494_v32 }
  0x33   : > { %6153 = vmatprep.subr.bf16.mxu0 %v6509_v59  ;;  %v377_v59 = vadd.f32 %v6860_v24, %v338_v52  ;;  %868 = vst [vmem:[#allocation3 + $0x3f4] sm:$0xf] %v5493_v54  ;;  %484 = vst [vmem:[#allocation2 + $0x169] sm:$0xff] %v408_v63  ;;  %v516_v25 = vld [vmem:[#allocation2 + $0x150] sm:$0xff]  ;;  %v386_v34 = vmax.f32 %v354_v26, 0.0  ;;  %v387_v35 = vmax.f32 %v355_v27, 0.0  ;;  %v5772_v54 = vunpack.c.h.bf16 %v5900_v51 }
  0x34   : > { %v6491_v47 = vld [vmem:[#allocation3 + $0x360] ss:$36 sps:$4 sm:$0xff]   ;;  %v385_v57 = vmax.f32 %v353_v50, 0.0  ;;  %652 = vst [vmem:[#allocation3 + $0x90] sm:$0xf] %v5437_v10  ;;  %v5461_v29 = vpack.c.bf16 %v516_v25, %v516_v25  ;;  %v6517_v36 = vld [vmem:[%s7584_s3 + $0xd8] sm:$0xff]   ;;  %v317_v4 = vmul.f32 %v5771_v53, %v6852_v20 }
  0x35   : > { %3818 = vmatmul.mubr.bf16.vlgmr.msra.gmra.mxu1 %v6491_v47  ;;  %v409_v0 = vmax.f32 %v377_v59, 0.0  ;;  %870 = vst [vmem:[#allocation3 + $0x43c] sm:$0xf] %v5495_v11  ;;  %1033 = vst [vmem:[#allocation3 + $0x2c] sm:$0xf] %v5498_v13  ;;  %v5473_v42 = vpack.c.bf16 %v386_v34, %v386_v34  ;;  %v5474_v43 = vpack.c.bf16 %v387_v35, %v387_v35  ;;  %v6519_v47 = vld [vmem:[%s7584_s3 + $0x98] sm:$0xff]  }
  0x36   : > { %6154 = vmatpush3.bf16.msra.mxu0 %v6511_v9  ;;  %461 = vst [vmem:[#allocation2 + $0x51] sm:$0xff] %v385_v57  ;;  %v5472_v62 = vpack.c.bf16 %v385_v57, %v385_v57  ;;  %6040 = vmatpush3.bf16.msra.mxu1 %v6496_v41  ;;  %v493_v9 = vld [vmem:[#allocation2 + $0x38] sm:$0xff]  ;;  %1226 = vst [vmem:[#allocation3 + $0x54] sm:$0xf] %v5437_v10  ;;  %v6520_v50 = vld [vmem:[%s7584_s3 + $0xd0] sm:$0xff]   ;;  %v318_v5 = vmul.f32 %v5772_v54, %v6852_v20 }
  0x37   : > { %6155 = vmatprep.subr.bf16.mxu0 %v6528_v40  ;;  %6041 = vmatprep.subr.bf16.mxu1 %v6498_v48  ;;  %485 = vst [vmem:[#allocation2 + $0x171] sm:$0xff] %v409_v0  ;;  %v5496_v12 = vpack.c.bf16 %v409_v0, %v409_v0  ;;  %v5438_v16 = vpack.c.bf16 %v493_v9, %v493_v9  ;;  %v6502_v19 = vld [vmem:[#allocation3 + $0x48] ss:$36 sps:$4 sm:$0xff]   ;;  %676 = vst [vmem:[#allocation3 + $0x3f0] sm:$0xf] %v5461_v29  ;;  %v875_v55 = vld [vmem:[#allocation2 + $0x22] sm:$0xff] }
  0x38   : > { %847 = vst [vmem:[#allocation3 + $0x100] sm:$0xf] %v5472_v62  ;;  %v6506_v23 = vld [vmem:[#allocation3 + $0x3a8] ss:$36 sps:$4 sm:$0xff]   ;;  %3825 = vmatprep.mubr.bf16.mxu1 %v6503_v22  ;;  %462 = vst [vmem:[#allocation2 + $0x61] sm:$0xff] %v386_v34  ;;  %v5901_v57 = vld [vmem:[%s6843_s21 + $0x28] sm:$0xff]   ;;  %v356_v13 = vadd.f32 %v6860_v24, %v317_v4  ;;  %v357_v14 = vadd.f32 %v6860_v24, %v318_v5 }
  0x39   : > { %871 = vst [vmem:[#allocation3 + $0x460] sm:$0xf] %v5496_v12  ;;  %653 = vst [vmem:[#allocation3 + $0xb4] sm:$0xf] %v5438_v16  ;;  %3730 = vmatmul.mubr.bf16.gmra.mxu0 %v6502_v19  ;;  %v517_v28 = vld [vmem:[#allocation2 + $0x158] sm:$0xff]  ;;  %v6521_v59 = vld [vmem:[%s7584_s3 + $0x90] sm:$0xff]   ;;  %v5775_v61 = vunpack.c.l.bf16 %v5901_v57  ;;  %v5776_v62 = vunpack.c.h.bf16 %v5901_v57 }
  0x3a   : > { %6156 = vmatpush3.bf16.msra.mxu0 %v6531_v46  ;;  %6042 = vmatpush3.bf16.msra.mxu1 %v6499_v60  ;;  %1227 = vst [vmem:[#allocation3 + $0x78] sm:$0xf] %v5438_v16  ;;  %v5462_v31 = vpack.c.bf16 %v517_v28, %v517_v28  ;;  %v518_v40 = vld [vmem:[#allocation2 + $0x168] sm:$0xff]  ;;  %463 = vst [vmem:[#allocation2 + $0x69] sm:$0xff] %v387_v35  ;;  %v6543_v46 = vld [vmem:[%s7584_s3 + $0x120] sm:$0xff]   ;;  %v5500_v60 = vpack.c.bf16 %v875_v55, %v875_v55  ;;  %v389_v22 = vmax.f32 %v357_v14, 0.0 }
  0x3b   : > { %6043 = vmatprep.subr.bf16.mxu1 %v6505_v8  ;;  %654 = vst [vmem:[#allocation3 + $0xd8] sm:$0xf] %v5439_v37  ;;  %v5463_v44 = vpack.c.bf16 %v518_v40, %v518_v40  ;;  %6157 = vmatprep.subr.bf16.mxu0 %v6542_v39  ;;  %1228 = vst [vmem:[#allocation3 + $0x9c] sm:$0xf] %v5439_v37  ;;  %v6512_v48 = vld [vmem:[#allocation3 + $0x94] ss:$36 sps:$4 sm:$0xff]   ;;  %v319_v8 = vmul.f32 %v5775_v61, %v6852_v20 }
  0x3c   : > { %677 = vst [vmem:[#allocation3 + $0x414] sm:$0xf] %v5462_v31  ;;  %848 = vst [vmem:[#allocation3 + $0x124] sm:$0xf] %v5473_v42  ;;  %v874_v52 = vld [vmem:[#allocation2 + $0x1a] sm:$0xff]  ;;  %3737 = vmatprep.mubr.bf16.mxu0 %v6512_v48  ;;  %v876_v58 = vld [vmem:[#allocation2 + $0x32] sm:$0xff]  ;;  %v320_v9 = vmul.f32 %v5776_v62, %v6852_v20 }
  0x3d   : > { %v495_v33 = vld [vmem:[#allocation2 + $0x50] sm:$0xff]  ;;  %3826 = vmatmul.mubr.bf16.gmra.mxu1 %v6506_v23  ;;  %849 = vst [vmem:[#allocation3 + $0x148] sm:$0xf] %v5474_v43  ;;  %678 = vst [vmem:[#allocation3 + $0x438] sm:$0xf] %v5463_v44  ;;  %v5499_v56 = vpack.c.bf16 %v874_v52, %v874_v52  ;;  %v877_v63 = vld [vmem:[#allocation2 + $0x3a] sm:$0xff]  ;;  %v5501_v0 = vpack.c.bf16 %v876_v58, %v876_v58  ;;  %v358_v18 = vadd.f32 %v6860_v24, %v319_v8 }
  0x3e   : > { %v5440_v38 = vpack.c.bf16 %v495_v33, %v495_v33  ;;  %6044 = vmatpush3.bf16.msra.mxu1 %v6507_v15  ;;  %v519_v41 = vld [vmem:[#allocation2 + $0x170] sm:$0xff]  ;;  %6158 = vmatpush3.bf16.msra.mxu0 %v6543_v46  ;;  %v6515_v1 = vld [vmem:[#allocation3 + $0x3f4] ss:$36 sps:$4 sm:$0xff]   ;;  %v5502_v6 = vpack.c.bf16 %v877_v63, %v877_v63  ;;  %1035 = vst [vmem:[#allocation3 + $0x74] sm:$0xf] %v5500_v60  ;;  %v6555_v27 = vld [vmem:[%s7584_s3 + $0x158] sm:$0xff]  }
  0x3f   : > { %6045 = vmatprep.subr.bf16.mxu1 %v6508_v21  ;;  %v5464_v45 = vpack.c.bf16 %v519_v41, %v519_v41  ;;  %v6527_v3 = vld [vmem:[%s7584_s3 + $0xc8] sm:$0xff]   ;;  %1034 = vst [vmem:[#allocation3 + $0x50] sm:$0xf] %v5499_v56  ;;  %1608 = vst [vmem:[#allocation3 + $0x14] sm:$0xf] %v5499_v56  ;;  %3833 = vmatprep.mubr.bf16.mxu1 %v6515_v1  ;;  %v496_v11 = vld [vmem:[#allocation2 + $0x60] sm:$0xff]  ;;  %v359_v23 = vadd.f32 %v6860_v24, %v320_v9 }
  0x40   : > { %655 = vst [vmem:[#allocation3 + $0xfc] sm:$0xf] %v5440_v38  ;;  %1229 = vst [vmem:[#allocation3 + $0xc0] sm:$0xf] %v5440_v38  ;;  %v6514_v49 = vld [vmem:[#allocation3 + $0x90] ss:$36 sps:$4 sm:$0xff]   ;;  %v5441_v16 = vpack.c.bf16 %v496_v11, %v496_v11  ;;  %6159 = vmatprep.subr.bf16.mxu0 %v6555_v27 }
  0x41   : > { %679 = vst [vmem:[#allocation3 + $0x45c] sm:$0xf] %v5464_v45  ;;  %3738 = vmatmul.mubr.bf16.gmra.mxu0 %v6514_v49  ;;  %v6522_v7 = vld [vmem:[#allocation3 + $0xdc] ss:$36 sps:$4 sm:$0xff]   ;;  %1036 = vst [vmem:[#allocation3 + $0x98] sm:$0xf] %v5501_v0 }
  0x42   : > { %6046 = vmatpush3.bf16.msra.mxu1 %v6510_v30  ;;  %1609 = vst [vmem:[#allocation3 + $0x38] sm:$0xf] %v5500_v60  ;;  %1610 = vst [vmem:[#allocation3 + $0x5c] sm:$0xf] %v5501_v0  ;;  %v497_v12 = vld [vmem:[#allocation2 + $0x68] sm:$0xff]  ;;  %3745 = vmatprep.mubr.bf16.mxu0 %v6522_v7  ;;  %v388_v21 = vmax.f32 %v356_v13, 0.0  ;;  %v5476_v30 = vpack.c.bf16 %v389_v22, %v389_v22 }
  0x43   : > { %6047 = vmatprep.subr.bf16.mxu1 %v6517_v36  ;;  %v6518_v2 = vld [vmem:[#allocation3 + $0x3f0] ss:$36 sps:$4 sm:$0xff]   ;;  %1037 = vst [vmem:[#allocation3 + $0xbc] sm:$0xf] %v5502_v6  ;;  %1611 = vst [vmem:[#allocation3 + $0x80] sm:$0xf] %v5502_v6  ;;  %v5442_v17 = vpack.c.bf16 %v497_v12, %v497_v12 }
  0x44   : > { %v6525_v15 = vld [vmem:[#allocation3 + $0x43c] ss:$36 sps:$4 sm:$0xff]   ;;  %656 = vst [vmem:[#allocation3 + $0x120] sm:$0xf] %v5441_v16  ;;  %v390_v26 = vmax.f32 %v358_v18, 0.0  ;;  %v6532_v28 = vld [vmem:[%s7584_s3 + $0xc0] sm:$0xff]   ;;  %v5475_v29 = vpack.c.bf16 %v388_v21, %v388_v21 }
  0x45   : > { %3834 = vmatmul.mubr.bf16.gmra.mxu1 %v6518_v2  ;;  %v6530_v19 = vld [vmem:[%s7584_s3 + $0x88] sm:$0xff]   ;;  %657 = vst [vmem:[#allocation3 + $0x144] sm:$0xf] %v5442_v17  ;;  %1230 = vst [vmem:[#allocation3 + $0xe4] sm:$0xf] %v5441_v16  ;;  %v391_v31 = vmax.f32 %v359_v23, 0.0 }
  0x46   : > { %6048 = vmatpush3.bf16.msra.mxu1 %v6519_v47  ;;  %3841 = vmatprep.mubr.bf16.mxu1 %v6525_v15  ;;  %1231 = vst [vmem:[#allocation3 + $0x108] sm:$0xf] %v5442_v17  ;;  %464 = vst [vmem:[#allocation2 + $0x79] sm:$0xff] %v388_v21  ;;  %v5477_v32 = vpack.c.bf16 %v390_v26, %v390_v26  ;;  %v6558_v33 = vld [vmem:[%s7584_s3 + $0x118] sm:$0xff]   ;;  %v6533_v36 = vld [vmem:[%s7584_s3 + $0x80] sm:$0xff]  }
  0x47   : > { %6049 = vmatprep.subr.bf16.mxu1 %v6520_v50  ;;  %v6524_v10 = vld [vmem:[#allocation3 + $0xd8] ss:$36 sps:$4 sm:$0xff]   ;;  %465 = vst [vmem:[#allocation2 + $0x81] sm:$0xff] %v389_v22  ;;  %466 = vst [vmem:[#allocation2 + $0x91] sm:$0xff] %v390_v26  ;;  %v6539_v34 = vld [vmem:[#allocation3 + $0xc] ss:$36 sps:$4 sm:$0xff]   ;;  %v5478_v35 = vpack.c.bf16 %v391_v31, %v391_v31  ;;  %6160 = vmatpush3.bf16.msra.mxu0 %v6558_v33 }
  0x48   : > { %v6529_v25 = vld [vmem:[#allocation3 + $0x438] ss:$36 sps:$4 sm:$0xff]   ;;  %850 = vst [vmem:[#allocation3 + $0x16c] sm:$0xf] %v5475_v29  ;;  %851 = vst [vmem:[#allocation3 + $0x190] sm:$0xf] %v5476_v30 }
  0x49   : > { %3746 = vmatmul.mubr.bf16.gmra.mxu0 %v6524_v10  ;;  %467 = vst [vmem:[#allocation2 + $0x99] sm:$0xff] %v391_v31  ;;  %852 = vst [vmem:[#allocation3 + $0x1b4] sm:$0xf] %v5477_v32  ;;  %v6540_v37 = vld [vmem:[%s7584_s3 + $0x1f8] sm:$0xff]   ;;  %v5902_v38 = vld [vmem:[%s6843_s21 + $0x30] sm:$0xff]  }
  0x4a   : > { %6050 = vmatpush3.bf16.msra.mxu1 %v6521_v59  ;;  %853 = vst [vmem:[#allocation3 + $0x1d8] sm:$0xf] %v5478_v35  ;;  %v878_v39 = vld [vmem:[#allocation2 + $0x4a] sm:$0xff]  ;;  %v879_v40 = vld [vmem:[#allocation2 + $0x52] sm:$0xff]  ;;  %v5779_v42 = vunpack.c.l.bf16 %v5902_v38  ;;  %v5780_v43 = vunpack.c.h.bf16 %v5902_v38  ;;  %v880_v4 = vld [vmem:[#allocation2 + $0x62] sm:$0xff] }
  0x4b   : > { %6051 = vmatprep.subr.bf16.mxu1 %v6527_v3  ;;  %v6534_v41 = vld [vmem:[#allocation3 + $0x124] ss:$36 sps:$4 sm:$0xff]   ;;  %v5503_v44 = vpack.c.bf16 %v878_v39, %v878_v39  ;;  %v5504_v45 = vpack.c.bf16 %v879_v40, %v879_v40  ;;  %v6547_v53 = vld [vmem:[#allocation3 + $0x54] ss:$36 sps:$4 sm:$0xff]   ;;  %v5505_v7 = vpack.c.bf16 %v880_v4, %v880_v4  ;;  %v6553_v26 = vld [vmem:[#allocation3 + $0x9c] ss:$36 sps:$4 sm:$0xff]  }
  0x4c   : > { %v6536_v46 = vld [vmem:[#allocation3 + $0x120] ss:$36 sps:$4 sm:$0xff]   ;;  %v6537_v47 = vld [vmem:[#allocation3 + $0x8] ss:$36 sps:$4 sm:$0xff]   ;;  %3753 = vmatprep.mubr.bf16.mxu0 %v6534_v41  ;;  %v321_v55 = vmul.f32 %v5779_v42, %v6852_v20  ;;  %v322_v59 = vmul.f32 %v5780_v43, %v6852_v20  ;;  %v5904_v13 = vld [vmem:[%s6843_s21 + $0x40] sm:$0xff]  }
  0x4d   : > { %3842 = vmatmul.mubr.bf16.gmra.mxu1 %v6529_v25  ;;  %v498_v48 = vld [vmem:[#allocation2 + $0x78] sm:$0xff]  ;;  %1038 = vst [vmem:[#allocation3 + $0xe0] sm:$0xf] %v5503_v44  ;;  %1039 = vst [vmem:[#allocation3 + $0x104] sm:$0xf] %v5504_v45  ;;  %v6556_v58 = vld [vmem:[%s7584_s3 + $0x1f0] sm:$0xff]   ;;  %v5787_v15 = vunpack.c.l.bf16 %v5904_v13  ;;  %v5788_v16 = vunpack.c.h.bf16 %v5904_v13 }
  0x4e   : > { %6052 = vmatpush3.bf16.msra.mxu1 %v6530_v19  ;;  %3882 = vmatprep.mubr.bf16.mxu1 %v6539_v34  ;;  %v499_v49 = vld [vmem:[#allocation2 + $0x80] sm:$0xff]  ;;  %v6541_v50 = vld [vmem:[%s7584_s3 + $0x1b8] sm:$0xff]   ;;  %v5443_v51 = vpack.c.bf16 %v498_v48, %v498_v48  ;;  %v500_v54 = vld [vmem:[#allocation2 + $0x90] sm:$0xff]  ;;  %1612 = vst [vmem:[#allocation3 + $0xa4] sm:$0xf] %v5503_v44  ;;  %v360_v62 = vadd.f32 %v6860_v24, %v321_v55 }
  0x4f   : > { %6053 = vmatprep.subr.bf16.mxu1 %v6532_v28  ;;  %v5444_v52 = vpack.c.bf16 %v499_v49, %v499_v49  ;;  %1613 = vst [vmem:[#allocation3 + $0xc8] sm:$0xf] %v5504_v45  ;;  %v5445_v57 = vpack.c.bf16 %v500_v54, %v500_v54  ;;  %v6566_v60 = vld [vmem:[%s7584_s3 + $0x150] sm:$0xff]   ;;  %v5903_v0 = vld [vmem:[%s6843_s21 + $0x38] sm:$0xff]   ;;  %v361_v1 = vadd.f32 %v6860_v24, %v322_v59  ;;  %1040 = vst [vmem:[#allocation3 + $0x128] sm:$0xf] %v5505_v7 }
  0x50   : > { %v501_v56 = vld [vmem:[#allocation2 + $0x98] sm:$0xff]  ;;  %658 = vst [vmem:[#allocation3 + $0x168] sm:$0xf] %v5443_v51  ;;  %v6567_v63 = vld [vmem:[%s7584_s3 + $0x110] sm:$0xff]   ;;  %1232 = vst [vmem:[#allocation3 + $0x12c] sm:$0xf] %v5443_v51  ;;  %6161 = vmatprep.subr.bf16.mxu0 %v6566_v60  ;;  %v5783_v2 = vunpack.c.l.bf16 %v5903_v0  ;;  %v5784_v3 = vunpack.c.h.bf16 %v5903_v0 }
  0x51   : > { %3754 = vmatmul.mubr.bf16.gmra.mxu0 %v6536_v46  ;;  %659 = vst [vmem:[#allocation3 + $0x18c] sm:$0xf] %v5444_v52  ;;  %v5446_v61 = vpack.c.bf16 %v501_v56, %v501_v56  ;;  %1233 = vst [vmem:[#allocation3 + $0x150] sm:$0xf] %v5444_v52  ;;  %v881_v5 = vld [vmem:[#allocation2 + $0x6a] sm:$0xff]  ;;  %v392_v6 = vmax.f32 %v360_v62, 0.0 }
  0x52   : > { %6054 = vmatpush3.bf16.msra.mxu1 %v6533_v36  ;;  %660 = vst [vmem:[#allocation3 + $0x1b0] sm:$0xf] %v5445_v57  ;;  %1234 = vst [vmem:[#allocation3 + $0x174] sm:$0xf] %v5445_v57  ;;  %6162 = vmatpush3.bf16.msra.mxu0 %v6567_v63  ;;  %v5506_v8 = vpack.c.bf16 %v881_v5, %v881_v5  ;;  %v6559_v9 = vld [vmem:[%s7584_s3 + $0x1b0] sm:$0xff]   ;;  %v393_v10 = vmax.f32 %v361_v1, 0.0  ;;  %v323_v11 = vmul.f32 %v5783_v2, %v6852_v20 }
  0x53   : > { %6263 = vmatprep.subr.bf16.mxu1 %v6540_v37  ;;  %661 = vst [vmem:[#allocation3 + $0x1d4] sm:$0xf] %v5446_v61  ;;  %1235 = vst [vmem:[#allocation3 + $0x198] sm:$0xf] %v5446_v61  ;;  %v324_v12 = vmul.f32 %v5784_v3, %v6852_v20  ;;  %v5479_v14 = vpack.c.bf16 %v392_v6, %v392_v6  ;;  %v882_v17 = vld [vmem:[#allocation2 + $0x7a] sm:$0xff]  ;;  %v883_v18 = vld [vmem:[#allocation2 + $0x82] sm:$0xff] }
  0x54   : > { %468 = vst [vmem:[#allocation2 + $0xa9] sm:$0xff] %v392_v6  ;;  %1041 = vst [vmem:[#allocation3 + $0x14c] sm:$0xf] %v5506_v8  ;;  %v6549_v19 = vld [vmem:[#allocation3 + $0x50] ss:$36 sps:$4 sm:$0xff]   ;;  %v5480_v21 = vpack.c.bf16 %v393_v10, %v393_v10  ;;  %v362_v22 = vadd.f32 %v6860_v24, %v323_v11  ;;  %v6573_v23 = vld [vmem:[%s7584_s3 + $0x1e8] sm:$0xff]   ;;  %v5507_v25 = vpack.c.bf16 %v882_v17, %v882_v17 }
  0x55   : > { %3883 = vmatmul.mubr.bf16.vlgmr.msra.gmra.mxu1 %v6537_v47  ;;  %1614 = vst [vmem:[#allocation3 + $0xec] sm:$0xf] %v5505_v7  ;;  %1615 = vst [vmem:[#allocation3 + $0x110] sm:$0xf] %v5506_v8  ;;  %v363_v20 = vadd.f32 %v6860_v24, %v324_v12  ;;  %v6575_v27 = vld [vmem:[%s7584_s3 + $0x1a8] sm:$0xff]   ;;  %v5508_v30 = vpack.c.bf16 %v883_v18, %v883_v18  ;;  %v884_v57 = vld [vmem:[#allocation2 + $0x92] sm:$0xff] }
  0x56   : > { %6264 = vmatpush3.bf16.msra.mxu1 %v6541_v50  ;;  %3890 = vmatprep.mubr.bf16.mxu1 %v6547_v53  ;;  %469 = vst [vmem:[#allocation2 + $0xb1] sm:$0xff] %v393_v10  ;;  %854 = vst [vmem:[#allocation3 + $0x1fc] sm:$0xf] %v5479_v14  ;;  %v7039_v28 = vld [vmem:[%s7582_s1] ss:$0 sm:$0xff]  ;;  %v6581_v31 = vld [vmem:[%s7584_s3 + $0x148] sm:$0xff]   ;;  %v5509_v59 = vpack.c.bf16 %v884_v57, %v884_v57 }
  0x57   : > { %6265 = vmatprep.subr.bf16.mxu1 %v6556_v58  ;;  %v325_v29 = vmul.f32 %v7039_v28, %v5787_v15  ;;  %v326_v24 = vmul.f32 %v7039_v28, %v5788_v16  ;;  %v6544_v32 = vld [vmem:[#allocation3 + $0x16c] ss:$36 sps:$4 sm:$0xff]   ;;  %855 = vst [vmem:[#allocation3 + $0x220] sm:$0xf] %v5480_v21  ;;  %v394_v33 = vmax.f32 %v362_v22, 0.0  ;;  %v395_v34 = vmax.f32 %v363_v20, 0.0  ;;  %6163 = vmatprep.subr.bf16.mxu0 %v6581_v31 }
  0x58   : > { %1042 = vst [vmem:[#allocation3 + $0x170] sm:$0xf] %v5507_v25  ;;  %1616 = vst [vmem:[#allocation3 + $0x134] sm:$0xf] %v5507_v25  ;;  %v6546_v35 = vld [vmem:[#allocation3 + $0x168] ss:$36 sps:$4 sm:$0xff]   ;;  %3761 = vmatprep.mubr.bf16.mxu0 %v6544_v32 }
  0x59   : > { %v7049_v36 = vld [vmem:[%s7583_s2] ss:$0 sm:$0xff]  ;;  %1043 = vst [vmem:[#allocation3 + $0x194] sm:$0xf] %v5508_v30  ;;  %1617 = vst [vmem:[#allocation3 + $0x158] sm:$0xf] %v5508_v30  ;;  %v5481_v40 = vpack.c.bf16 %v394_v33, %v394_v33  ;;  %v5482_v41 = vpack.c.bf16 %v395_v34, %v395_v34  ;;  %3762 = vmatmul.mubr.bf16.gmra.mxu0 %v6546_v35 }
  0x5a   : > { %6266 = vmatpush3.bf16.msra.mxu1 %v6559_v9  ;;  %v364_v37 = vadd.f32 %v7049_v36, %v325_v29  ;;  %v365_v38 = vadd.f32 %v7049_v36, %v326_v24  ;;  %v6550_v39 = vld [vmem:[#allocation3 + $0x1b4] ss:$36 sps:$4 sm:$0xff]   ;;  %470 = vst [vmem:[#allocation2 + $0xc1] sm:$0xff] %v394_v33  ;;  %471 = vst [vmem:[#allocation2 + $0xc9] sm:$0xff] %v395_v34  ;;  %v885_v58 = vld [vmem:[#allocation2 + $0x9a] sm:$0xff] }
  0x5b   : > { %6267 = vmatprep.subr.bf16.mxu1 %v6573_v23  ;;  %v6583_v44 = vld [vmem:[%s7584_s3 + $0x108] sm:$0xff]   ;;  %3769 = vmatprep.mubr.bf16.mxu0 %v6550_v39  ;;  %856 = vst [vmem:[#allocation3 + $0x244] sm:$0xf] %v5481_v40  ;;  %857 = vst [vmem:[#allocation3 + $0x268] sm:$0xf] %v5482_v41  ;;  %v5510_v60 = vpack.c.bf16 %v885_v58, %v885_v58  ;;  %v6589_v61 = vld [vmem:[%s7584_s3 + $0x1e0] sm:$0xff]  }
  0x5c   : > { %v396_v42 = vmax.f32 %v364_v37, 0.0  ;;  %v397_v43 = vmax.f32 %v365_v38, 0.0  ;;  %v5905_v45 = vld [vmem:[%s6843_s21 + $0x48] sm:$0xff]   ;;  %v6552_v49 = vld [vmem:[#allocation3 + $0x1b0] ss:$36 sps:$4 sm:$0xff]   ;;  %6164 = vmatpush3.bf16.msra.mxu0 %v6583_v44  ;;  %v5906_v17 = vld [vmem:[%s6843_s21 + $0x50] sm:$0xff]  }
  0x5d   : > { %3891 = vmatmul.mubr.bf16.gmra.mxu1 %v6549_v19  ;;  %v502_v46 = vld [vmem:[#allocation2 + $0xa8] sm:$0xff]  ;;  %v5791_v47 = vunpack.c.l.bf16 %v5905_v45  ;;  %v5792_v48 = vunpack.c.h.bf16 %v5905_v45  ;;  %v503_v50 = vld [vmem:[#allocation2 + $0xb0] sm:$0xff]  ;;  %1044 = vst [vmem:[#allocation3 + $0x1b8] sm:$0xf] %v5509_v59  ;;  %1045 = vst [vmem:[#allocation3 + $0x1dc] sm:$0xf] %v5510_v60  ;;  %v5795_v19 = vunpack.c.l.bf16 %v5906_v17  ;;  %v5796_v21 = vunpack.c.h.bf16 %v5906_v17 }
  0x5e   : > { %3898 = vmatprep.mubr.bf16.mxu1 %v6553_v26  ;;  %v5447_v51 = vpack.c.bf16 %v502_v46, %v502_v46  ;;  %6268 = vmatpush3.bf16.msra.mxu1 %v6575_v27  ;;  %472 = vst [vmem:[#allocation2 + $0xd9] sm:$0xff] %v396_v42  ;;  %473 = vst [vmem:[#allocation2 + $0xe1] sm:$0xff] %v397_v43  ;;  %v5483_v52 = vpack.c.bf16 %v396_v42, %v396_v42  ;;  %v6557_v62 = vld [vmem:[#allocation3 + $0x98] ss:$36 sps:$4 sm:$0xff]   ;;  %v6563_v63 = vld [vmem:[#allocation3 + $0xe4] ss:$36 sps:$4 sm:$0xff]  }
  0x5f   : > { %v5484_v53 = vpack.c.bf16 %v397_v43, %v397_v43  ;;  %v5448_v54 = vpack.c.bf16 %v503_v50, %v503_v50  ;;  %v327_v55 = vmul.f32 %v7039_v28, %v5791_v47  ;;  %v328_v56 = vmul.f32 %v7039_v28, %v5792_v48  ;;  %6269 = vmatprep.subr.bf16.mxu1 %v6589_v61  ;;  %v6591_v8 = vld [vmem:[%s7584_s3 + $0x1a0] sm:$0xff]   ;;  %v886_v18 = vld [vmem:[#allocation2 + $0xaa] sm:$0xff]  ;;  %v887_v22 = vld [vmem:[#allocation2 + $0xb2] sm:$0xff] }
  0x60   : > { %662 = vst [vmem:[#allocation3 + $0x1f8] sm:$0xf] %v5447_v51  ;;  %858 = vst [vmem:[#allocation3 + $0x28c] sm:$0xf] %v5483_v52  ;;  %v6592_v9 = vld [vmem:[%s7584_s3 + $0x140] sm:$0xff]   ;;  %v5511_v20 = vpack.c.bf16 %v886_v18, %v886_v18  ;;  %v5512_v27 = vpack.c.bf16 %v887_v22, %v887_v22  ;;  %v329_v30 = vmul.f32 %v7039_v28, %v5795_v19  ;;  %v6608_v57 = vld [vmem:[%s7584_s3 + $0x198] sm:$0xff]  }
  0x61   : > { %859 = vst [vmem:[#allocation3 + $0x2b0] sm:$0xf] %v5484_v53  ;;  %1236 = vst [vmem:[#allocation3 + $0x1bc] sm:$0xf] %v5447_v51  ;;  %v366_v0 = vadd.f32 %v7049_v36, %v327_v55  ;;  %v367_v1 = vadd.f32 %v7049_v36, %v328_v56  ;;  %v504_v2 = vld [vmem:[#allocation2 + $0xc0] sm:$0xff]  ;;  %v505_v3 = vld [vmem:[#allocation2 + $0xc8] sm:$0xff]  ;;  %3770 = vmatmul.mubr.bf16.gmra.mxu0 %v6552_v49  ;;  %6165 = vmatprep.subr.bf16.mxu0 %v6592_v9 }
  0x62   : > { %1432 = vst [vmem:[#allocation3 + $0x250] sm:$0xf] %v5483_v52  ;;  %1433 = vst [vmem:[#allocation3 + $0x274] sm:$0xf] %v5484_v53  ;;  %v5449_v4 = vpack.c.bf16 %v504_v2, %v504_v2  ;;  %v5450_v5 = vpack.c.bf16 %v505_v3, %v505_v3  ;;  %6270 = vmatpush3.bf16.msra.mxu1 %v6591_v8  ;;  %v6593_v16 = vld [vmem:[%s7584_s3 + $0x100] sm:$0xff]   ;;  %v330_v31 = vmul.f32 %v7039_v28, %v5796_v21  ;;  %v889_v39 = vld [vmem:[#allocation2 + $0xca] sm:$0xff] }
  0x63   : > { %663 = vst [vmem:[#allocation3 + $0x21c] sm:$0xf] %v5448_v54  ;;  %1237 = vst [vmem:[#allocation3 + $0x1e0] sm:$0xf] %v5448_v54  ;;  %v398_v6 = vmax.f32 %v366_v0, 0.0  ;;  %v399_v7 = vmax.f32 %v367_v1, 0.0  ;;  %6166 = vmatpush3.bf16.msra.mxu0 %v6593_v16  ;;  %v368_v35 = vadd.f32 %v7049_v36, %v329_v30  ;;  %v5514_v42 = vpack.c.bf16 %v889_v39, %v889_v39 }
  0x64   : > { %1618 = vst [vmem:[#allocation3 + $0x17c] sm:$0xf] %v5509_v59  ;;  %1619 = vst [vmem:[#allocation3 + $0x1a0] sm:$0xf] %v5510_v60  ;;  %v1256_v23 = vld [vmem:[#allocation2 + $0x19] sm:$0xff]  ;;  %v1257_v33 = vld [vmem:[#allocation2 + $0x21] sm:$0xff]  ;;  %v369_v37 = vadd.f32 %v7049_v36, %v330_v31 }
  0x65   : > { %3899 = vmatmul.mubr.bf16.gmra.mxu1 %v6557_v62  ;;  %664 = vst [vmem:[#allocation3 + $0x240] sm:$0xf] %v5449_v4  ;;  %665 = vst [vmem:[#allocation3 + $0x264] sm:$0xf] %v5450_v5  ;;  %v506_v10 = vld [vmem:[#allocation2 + $0xd8] sm:$0xff]  ;;  %v507_v11 = vld [vmem:[#allocation2 + $0xe0] sm:$0xff]  ;;  %v5485_v12 = vpack.c.bf16 %v398_v6, %v398_v6  ;;  %v5486_v13 = vpack.c.bf16 %v399_v7, %v399_v7  ;;  %v5561_v29 = vpack.c.bf16 %v1256_v23, %v1256_v23 }
  0x66   : > { %474 = vst [vmem:[#allocation2 + $0xf1] sm:$0xff] %v398_v6  ;;  %475 = vst [vmem:[#allocation2 + $0xf9] sm:$0xff] %v399_v7  ;;  %3906 = vmatprep.mubr.bf16.mxu1 %v6563_v63  ;;  %v5451_v14 = vpack.c.bf16 %v506_v10, %v506_v10  ;;  %v5452_v15 = vpack.c.bf16 %v507_v11, %v507_v11  ;;  %v6560_v25 = vld [vmem:[#allocation3 + $0x1fc] ss:$36 sps:$4 sm:$0xff]   ;;  %v6571_v32 = vld [vmem:[#allocation3 + $0x12c] ss:$36 sps:$4 sm:$0xff]   ;;  %v5562_v38 = vpack.c.bf16 %v1257_v33, %v1257_v33 }
  0x67   : > { %1238 = vst [vmem:[#allocation3 + $0x204] sm:$0xf] %v5449_v4  ;;  %1239 = vst [vmem:[#allocation3 + $0x228] sm:$0xf] %v5450_v5  ;;  %v6565_v24 = vld [vmem:[#allocation3 + $0xe0] ss:$36 sps:$4 sm:$0xff]   ;;  %3777 = vmatprep.mubr.bf16.mxu0 %v6560_v25 }
  0x68   : > { %860 = vst [vmem:[#allocation3 + $0x2d4] sm:$0xf] %v5485_v12  ;;  %861 = vst [vmem:[#allocation3 + $0x2f8] sm:$0xf] %v5486_v13  ;;  %v888_v34 = vld [vmem:[#allocation2 + $0xc2] sm:$0xff]  ;;  %v400_v45 = vmax.f32 %v368_v35, 0.0 }
  0x69   : > { %1434 = vst [vmem:[#allocation3 + $0x298] sm:$0xf] %v5485_v12  ;;  %1435 = vst [vmem:[#allocation3 + $0x2bc] sm:$0xf] %v5486_v13  ;;  %v5513_v40 = vpack.c.bf16 %v888_v34, %v888_v34  ;;  %v6568_v41 = vld [vmem:[#allocation3 + $0x244] ss:$36 sps:$4 sm:$0xff]  }
  0x6a   : > { %v6562_v26 = vld [vmem:[#allocation3 + $0x1f8] ss:$36 sps:$4 sm:$0xff]   ;;  %666 = vst [vmem:[#allocation3 + $0x288] sm:$0xf] %v5451_v14  ;;  %667 = vst [vmem:[#allocation3 + $0x2ac] sm:$0xf] %v5452_v15  ;;  %v5487_v51 = vpack.c.bf16 %v400_v45, %v400_v45 }
  0x6b   : > { %1240 = vst [vmem:[#allocation3 + $0x24c] sm:$0xf] %v5451_v14  ;;  %1241 = vst [vmem:[#allocation3 + $0x270] sm:$0xf] %v5452_v15  ;;  %3778 = vmatmul.mubr.bf16.gmra.mxu0 %v6562_v26  ;;  %v401_v46 = vmax.f32 %v369_v37, 0.0  ;;  %v6605_v49 = vld [vmem:[%s7584_s3 + $0x1d8] sm:$0xff]  }
  0x6c   : > { %1046 = vst [vmem:[#allocation3 + $0x200] sm:$0xf] %v5511_v20  ;;  %1620 = vst [vmem:[#allocation3 + $0x1c4] sm:$0xf] %v5511_v20  ;;  %3785 = vmatprep.mubr.bf16.mxu0 %v6568_v41  ;;  %v6574_v50 = vld [vmem:[#allocation3 + $0x128] ss:$36 sps:$4 sm:$0xff]   ;;  %6271 = vmatprep.subr.bf16.mxu1 %v6605_v49 }
  0x6d   : > { %1047 = vst [vmem:[#allocation3 + $0x224] sm:$0xf] %v5512_v27  ;;  %1416 = vst [vmem:[#allocation3 + $0x10] sm:$0xf] %v5561_v29  ;;  %3907 = vmatmul.mubr.bf16.gmra.mxu1 %v6565_v24  ;;  %v508_v43 = vld [vmem:[#allocation2 + $0xf0] sm:$0xff]  ;;  %v509_v44 = vld [vmem:[#allocation2 + $0xf8] sm:$0xff]  ;;  %v5488_v52 = vpack.c.bf16 %v401_v46, %v401_v46 }
  0x6e   : > { %1621 = vst [vmem:[#allocation3 + $0x1e8] sm:$0xf] %v5512_v27  ;;  %1417 = vst [vmem:[#allocation3 + $0x34] sm:$0xf] %v5562_v38  ;;  %3914 = vmatprep.mubr.bf16.mxu1 %v6571_v32  ;;  %v5453_v47 = vpack.c.bf16 %v508_v43, %v508_v43  ;;  %v5454_v48 = vpack.c.bf16 %v509_v44, %v509_v44  ;;  %v6570_v53 = vld [vmem:[#allocation3 + $0x240] ss:$36 sps:$4 sm:$0xff]   ;;  %6272 = vmatpush3.bf16.msra.mxu1 %v6608_v57 }
  0x6f   : > { %1048 = vst [vmem:[#allocation3 + $0x248] sm:$0xf] %v5513_v40  ;;  %1622 = vst [vmem:[#allocation3 + $0x20c] sm:$0xf] %v5513_v40  ;;  %v7084_v54 = vld [vmem:[%s7584_s3 + $0x238] sm:$0xff]   ;;  %v891_v7 = vld [vmem:[#allocation2 + $0xe2] sm:$0xff] }
  0x70   : > { %1049 = vst [vmem:[#allocation3 + $0x26c] sm:$0xf] %v5514_v42  ;;  %1623 = vst [vmem:[#allocation3 + $0x230] sm:$0xf] %v5514_v42  ;;  %v6576_v55 = vld [vmem:[#allocation3 + $0x28c] ss:$36 sps:$4 sm:$0xff]   ;;  %6399 = vmatprep.subr.bf16.mxu0 %v7084_v54  ;;  %v5516_v9 = vpack.c.bf16 %v891_v7, %v891_v7 }
  0x71   : > { %476 = vst [vmem:[#allocation2 + $0x109] sm:$0xff] %v400_v45  ;;  %477 = vst [vmem:[#allocation2 + $0x111] sm:$0xff] %v401_v46  ;;  %v6579_v56 = vld [vmem:[#allocation3 + $0x174] ss:$36 sps:$4 sm:$0xff]   ;;  %v1258_v58 = vld [vmem:[#allocation2 + $0x31] sm:$0xff] }
  0x72   : > { %668 = vst [vmem:[#allocation3 + $0x2d0] sm:$0xf] %v5453_v47  ;;  %669 = vst [vmem:[#allocation3 + $0x2f4] sm:$0xf] %v5454_v48  ;;  %v1259_v59 = vld [vmem:[#allocation2 + $0x39] sm:$0xff]  ;;  %v5563_v60 = vpack.c.bf16 %v1258_v58, %v1258_v58  ;;  %v1260_v10 = vld [vmem:[#allocation2 + $0x49] sm:$0xff] }
  0x73   : > { %1242 = vst [vmem:[#allocation3 + $0x294] sm:$0xf] %v5453_v47  ;;  %1243 = vst [vmem:[#allocation3 + $0x2b8] sm:$0xf] %v5454_v48  ;;  %3786 = vmatmul.mubr.bf16.gmra.mxu0 %v6570_v53  ;;  %v5564_v61 = vpack.c.bf16 %v1259_v59, %v1259_v59  ;;  %v6578_v0 = vld [vmem:[#allocation3 + $0x288] ss:$36 sps:$4 sm:$0xff]   ;;  %v5565_v13 = vpack.c.bf16 %v1260_v10, %v1260_v10 }
  0x74   : > { %862 = vst [vmem:[#allocation3 + $0x31c] sm:$0xf] %v5487_v51  ;;  %863 = vst [vmem:[#allocation3 + $0x340] sm:$0xf] %v5488_v52  ;;  %3793 = vmatprep.mubr.bf16.mxu0 %v6576_v55  ;;  %v6582_v1 = vld [vmem:[#allocation3 + $0x170] ss:$36 sps:$4 sm:$0xff]  }
  0x75   : > { %1436 = vst [vmem:[#allocation3 + $0x2e0] sm:$0xf] %v5487_v51  ;;  %1437 = vst [vmem:[#allocation3 + $0x304] sm:$0xf] %v5488_v52  ;;  %3915 = vmatmul.mubr.bf16.gmra.mxu1 %v6574_v50  ;;  %v6584_v4 = vld [vmem:[#allocation3 + $0x2d4] ss:$36 sps:$4 sm:$0xff]  }
  0x76   : > { %3922 = vmatprep.mubr.bf16.mxu1 %v6579_v56  ;;  %1418 = vst [vmem:[#allocation3 + $0x58] sm:$0xf] %v5563_v60  ;;  %1419 = vst [vmem:[#allocation3 + $0x7c] sm:$0xf] %v5564_v61  ;;  %v6587_v5 = vld [vmem:[#allocation3 + $0x1bc] ss:$36 sps:$4 sm:$0xff]  }
  0x77   : > { %1993 = vst [vmem:[#allocation3 + $0x1c] sm:$0xf] %v5563_v60  ;;  %1994 = vst [vmem:[#allocation3 + $0x40] sm:$0xf] %v5564_v61  ;;  %v890_v6 = vld [vmem:[#allocation2 + $0xda] sm:$0xff]  ;;  %v1261_v11 = vld [vmem:[#allocation2 + $0x51] sm:$0xff] }
  0x78   : > { %v510_v62 = vld [vmem:[#allocation2 + $0x108] sm:$0xff]  ;;  %v511_v63 = vld [vmem:[#allocation2 + $0x110] sm:$0xff]  ;;  %v5515_v8 = vpack.c.bf16 %v890_v6, %v890_v6  ;;  %v5566_v14 = vpack.c.bf16 %v1261_v11, %v1261_v11  ;;  %v893_v15 = vld [vmem:[#allocation2 + $0xfa] sm:$0xff]  ;;  %1051 = vst [vmem:[#allocation3 + $0x2b4] sm:$0xf] %v5516_v9 }
  0x79   : > { %v5455_v2 = vpack.c.bf16 %v510_v62, %v510_v62  ;;  %v5456_v3 = vpack.c.bf16 %v511_v63, %v511_v63  ;;  %v892_v12 = vld [vmem:[#allocation2 + $0xf2] sm:$0xff]  ;;  %v5518_v17 = vpack.c.bf16 %v893_v15, %v893_v15  ;;  %1625 = vst [vmem:[#allocation3 + $0x278] sm:$0xf] %v5516_v9  ;;  %1420 = vst [vmem:[#allocation3 + $0xa0] sm:$0xf] %v5565_v13  ;;  %v1262_v21 = vld [vmem:[#allocation2 + $0x61] sm:$0xff] }
  0x7a   : > { %v5517_v16 = vpack.c.bf16 %v892_v12, %v892_v12  ;;  %1050 = vst [vmem:[#allocation3 + $0x290] sm:$0xf] %v5515_v8  ;;  %v6620_v18 = vld [vmem:[%s7584_s3 + $0x1d0] sm:$0xff]   ;;  %1624 = vst [vmem:[#allocation3 + $0x254] sm:$0xf] %v5515_v8  ;;  %v5567_v23 = vpack.c.bf16 %v1262_v21, %v1262_v21  ;;  %v1086_v32 = vld [vmem:[#allocation2 + $0x120] sm:$0xff] }
  0x7b   : > { %670 = vst [vmem:[#allocation3 + $0x318] sm:$0xf] %v5455_v2  ;;  %671 = vst [vmem:[#allocation3 + $0x33c] sm:$0xf] %v5456_v3  ;;  %3794 = vmatmul.mubr.bf16.gmra.mxu0 %v6578_v0  ;;  %6273 = vmatprep.subr.bf16.mxu1 %v6620_v18  ;;  %v6623_v19 = vld [vmem:[%s7584_s3 + $0x190] sm:$0xff]   ;;  %v1087_v33 = vld [vmem:[#allocation2 + $0x128] sm:$0xff]  ;;  %v5551_v35 = vpack.c.bf16 %v1086_v32, %v1086_v32 }
  0x7c   : > { %1244 = vst [vmem:[#allocation3 + $0x2dc] sm:$0xf] %v5455_v2  ;;  %1245 = vst [vmem:[#allocation3 + $0x300] sm:$0xf] %v5456_v3  ;;  %3801 = vmatprep.mubr.bf16.mxu0 %v6584_v4  ;;  %v6590_v22 = vld [vmem:[#allocation3 + $0x1b8] ss:$36 sps:$4 sm:$0xff]   ;;  %6274 = vmatpush3.bf16.msra.mxu1 %v6623_v19  ;;  %v5552_v37 = vpack.c.bf16 %v1087_v33, %v1087_v33 }
  0x7d   : > { %1421 = vst [vmem:[#allocation3 + $0xc4] sm:$0xf] %v5566_v14  ;;  %1052 = vst [vmem:[#allocation3 + $0x2d8] sm:$0xf] %v5517_v16  ;;  %3923 = vmatmul.mubr.bf16.gmra.mxu1 %v6582_v1  ;;  %v1263_v20 = vld [vmem:[#allocation2 + $0x69] sm:$0xff]  ;;  %v895_v26 = vld [vmem:[#allocation2 + $0x112] sm:$0xff] }
  0x7e   : > { %1626 = vst [vmem:[#allocation3 + $0x29c] sm:$0xf] %v5517_v16  ;;  %1995 = vst [vmem:[#allocation3 + $0x64] sm:$0xf] %v5565_v13  ;;  %3930 = vmatprep.mubr.bf16.mxu1 %v6587_v5  ;;  %v894_v25 = vld [vmem:[#allocation2 + $0x10a] sm:$0xff]  ;;  %v5568_v29 = vpack.c.bf16 %v1263_v20, %v1263_v20  ;;  %v5520_v30 = vpack.c.bf16 %v895_v26, %v895_v26  ;;  %v1264_v39 = vld [vmem:[#allocation2 + $0x79] sm:$0xff] }
  0x7f   : > { %1996 = vst [vmem:[#allocation3 + $0x88] sm:$0xf] %v5566_v14  ;;  %1053 = vst [vmem:[#allocation3 + $0x2fc] sm:$0xf] %v5518_v17  ;;  %v6586_v27 = vld [vmem:[#allocation3 + $0x2d0] ss:$36 sps:$4 sm:$0xff]   ;;  %v5519_v24 = vpack.c.bf16 %v894_v25, %v894_v25  ;;  %v5569_v43 = vpack.c.bf16 %v1264_v39, %v1264_v39 }
  0x80   : > { %1627 = vst [vmem:[#allocation3 + $0x2c0] sm:$0xf] %v5518_v17  ;;  %v6594_v31 = vld [vmem:[#allocation3 + $0x31c] ss:$36 sps:$4 sm:$0xff]   ;;  %1422 = vst [vmem:[#allocation3 + $0xe8] sm:$0xf] %v5567_v23 }
  0x81   : > { %1997 = vst [vmem:[#allocation3 + $0xac] sm:$0xf] %v5567_v23  ;;  %v6597_v34 = vld [vmem:[#allocation3 + $0x204] ss:$36 sps:$4 sm:$0xff]   ;;  %1423 = vst [vmem:[#allocation3 + $0x10c] sm:$0xf] %v5568_v29 }
  0x82   : > { %1054 = vst [vmem:[#allocation3 + $0x320] sm:$0xf] %v5519_v24  ;;  %1055 = vst [vmem:[#allocation3 + $0x344] sm:$0xf] %v5520_v30  ;;  %v6596_v38 = vld [vmem:[#allocation3 + $0x318] ss:$36 sps:$4 sm:$0xff]  }
  0x83   : > { %1628 = vst [vmem:[#allocation3 + $0x2e4] sm:$0xf] %v5519_v24  ;;  %1629 = vst [vmem:[#allocation3 + $0x308] sm:$0xf] %v5520_v30  ;;  %3802 = vmatmul.mubr.bf16.gmra.mxu0 %v6586_v27  ;;  %v1265_v40 = vld [vmem:[#allocation2 + $0x81] sm:$0xff]  ;;  %v897_v45 = vld [vmem:[#allocation2 + $0x12a] sm:$0xff] }
  0x84   : > { %1998 = vst [vmem:[#allocation3 + $0xd0] sm:$0xf] %v5568_v29  ;;  %1246 = vst [vmem:[#allocation3 + $0x324] sm:$0xf] %v5551_v35  ;;  %3809 = vmatprep.mubr.bf16.mxu0 %v6594_v31  ;;  %v896_v41 = vld [vmem:[#allocation2 + $0x122] sm:$0xff]  ;;  %v5570_v44 = vpack.c.bf16 %v1265_v40, %v1265_v40  ;;  %v1088_v47 = vld [vmem:[#allocation2 + $0x138] sm:$0xff]  ;;  %v5522_v49 = vpack.c.bf16 %v897_v45, %v897_v45 }
  0x85   : > { %1247 = vst [vmem:[#allocation3 + $0x348] sm:$0xf] %v5552_v37  ;;  %3931 = vmatmul.mubr.bf16.gmra.mxu1 %v6590_v22  ;;  %v6599_v42 = vld [vmem:[#allocation3 + $0x200] ss:$36 sps:$4 sm:$0xff]   ;;  %v5521_v46 = vpack.c.bf16 %v896_v41, %v896_v41  ;;  %v1089_v48 = vld [vmem:[#allocation2 + $0x140] sm:$0xff]  ;;  %v5553_v50 = vpack.c.bf16 %v1088_v47, %v1088_v47  ;;  %v6635_v55 = vld [vmem:[%s7584_s3 + $0x1c8] sm:$0xff]  }
  0x86   : > { %3938 = vmatprep.mubr.bf16.mxu1 %v6597_v34  ;;  %v5554_v51 = vpack.c.bf16 %v1089_v48, %v1089_v48  ;;  %v6602_v52 = vld [vmem:[#allocation3 + $0x14] ss:$36 sps:$4 sm:$0xff]   ;;  %v6603_v53 = vld [vmem:[#allocation3 + $0x24c] ss:$36 sps:$4 sm:$0xff]   ;;  %1424 = vst [vmem:[#allocation3 + $0x130] sm:$0xf] %v5569_v43  ;;  %6275 = vmatprep.subr.bf16.mxu1 %v6635_v55 }
  0x87   : > { %1425 = vst [vmem:[#allocation3 + $0x154] sm:$0xf] %v5570_v44  ;;  %1056 = vst [vmem:[#allocation3 + $0x368] sm:$0xf] %v5521_v46  ;;  %v6638_v56 = vld [vmem:[%s7584_s3 + $0x188] sm:$0xff]   ;;  %v1266_v57 = vld [vmem:[#allocation2 + $0x91] sm:$0xff] }
  0x88   : > { %1630 = vst [vmem:[#allocation3 + $0x32c] sm:$0xf] %v5521_v46  ;;  %1999 = vst [vmem:[#allocation3 + $0xf4] sm:$0xf] %v5569_v43  ;;  %v6600_v58 = vld [vmem:[#allocation3 + $0x10] ss:$36 sps:$4 sm:$0xff]   ;;  %v5571_v60 = vpack.c.bf16 %v1266_v57, %v1266_v57  ;;  %6276 = vmatpush3.bf16.msra.mxu1 %v6638_v56 }
  0x89   : > { %2000 = vst [vmem:[#allocation3 + $0x118] sm:$0xf] %v5570_v44  ;;  %1057 = vst [vmem:[#allocation3 + $0x38c] sm:$0xf] %v5522_v49  ;;  %v1267_v59 = vld [vmem:[#allocation2 + $0x99] sm:$0xff]  ;;  %v899_v62 = vld [vmem:[#allocation2 + $0x142] sm:$0xff] }
  0x8a   : > { %1248 = vst [vmem:[#allocation3 + $0x36c] sm:$0xf] %v5553_v50  ;;  %1249 = vst [vmem:[#allocation3 + $0x390] sm:$0xf] %v5554_v51  ;;  %v898_v61 = vld [vmem:[#allocation2 + $0x13a] sm:$0xff]  ;;  %v5572_v63 = vpack.c.bf16 %v1267_v59, %v1267_v59  ;;  %v5524_v1 = vpack.c.bf16 %v899_v62, %v899_v62  ;;  %v1090_v2 = vld [vmem:[#allocation2 + $0x150] sm:$0xff] }
  0x8b   : > { %1631 = vst [vmem:[#allocation3 + $0x350] sm:$0xf] %v5522_v49  ;;  %3810 = vmatmul.mubr.bf16.gmra.mxu0 %v6596_v38  ;;  %v5523_v0 = vpack.c.bf16 %v898_v61, %v898_v61  ;;  %v1091_v3 = vld [vmem:[#allocation2 + $0x158] sm:$0xff]  ;;  %v1268_v4 = vld [vmem:[#allocation2 + $0xa9] sm:$0xff]  ;;  %1426 = vst [vmem:[#allocation3 + $0x178] sm:$0xf] %v5571_v60  ;;  %v5555_v6 = vpack.c.bf16 %v1090_v2, %v1090_v2 }
  0x8c   : > { %4043 = vmatprep.mubr.bf16.mxu0 %v6602_v52  ;;  %v6607_v5 = vld [vmem:[#allocation3 + $0x248] ss:$36 sps:$4 sm:$0xff]   ;;  %v5556_v7 = vpack.c.bf16 %v1091_v3, %v1091_v3  ;;  %v5573_v8 = vpack.c.bf16 %v1268_v4, %v1268_v4  ;;  %2001 = vst [vmem:[#allocation3 + $0x13c] sm:$0xf] %v5571_v60  ;;  %v6621_v9 = vld [vmem:[%s7584_s3 + $0x230] sm:$0xff]   ;;  %v1092_v16 = vld [vmem:[#allocation2 + $0x168] sm:$0xff] }
  0x8d   : > { %3939 = vmatmul.mubr.bf16.gmra.mxu1 %v6599_v42  ;;  %1427 = vst [vmem:[#allocation3 + $0x19c] sm:$0xf] %v5572_v63  ;;  %1058 = vst [vmem:[#allocation3 + $0x3b0] sm:$0xf] %v5523_v0  ;;  %v6609_v10 = vld [vmem:[#allocation3 + $0x5c] ss:$36 sps:$4 sm:$0xff]   ;;  %v5557_v21 = vpack.c.bf16 %v1092_v16, %v1092_v16 }
  0x8e   : > { %3946 = vmatprep.mubr.bf16.mxu1 %v6603_v53  ;;  %1059 = vst [vmem:[#allocation3 + $0x3d4] sm:$0xf] %v5524_v1  ;;  %1632 = vst [vmem:[#allocation3 + $0x374] sm:$0xf] %v5523_v0  ;;  %v6611_v11 = vld [vmem:[#allocation3 + $0x294] ss:$36 sps:$4 sm:$0xff]  }
  0x8f   : > { %1633 = vst [vmem:[#allocation3 + $0x398] sm:$0xf] %v5524_v1  ;;  %2002 = vst [vmem:[#allocation3 + $0x160] sm:$0xf] %v5572_v63  ;;  %v1269_v12 = vld [vmem:[#allocation2 + $0xb1] sm:$0xff]  ;;  %v901_v15 = vld [vmem:[#allocation2 + $0x15a] sm:$0xff] }
  0x90   : > { %1250 = vst [vmem:[#allocation3 + $0x3b4] sm:$0xf] %v5555_v6  ;;  %1251 = vst [vmem:[#allocation3 + $0x3d8] sm:$0xf] %v5556_v7  ;;  %v5574_v13 = vpack.c.bf16 %v1269_v12, %v1269_v12  ;;  %v900_v14 = vld [vmem:[#allocation2 + $0x152] sm:$0xff]  ;;  %v5526_v18 = vpack.c.bf16 %v901_v15, %v901_v15  ;;  %v6650_v20 = vld [vmem:[%s7584_s3 + $0x1c0] sm:$0xff]  }
  0x91   : > { %1428 = vst [vmem:[#allocation3 + $0x1c0] sm:$0xf] %v5573_v8  ;;  %2003 = vst [vmem:[#allocation3 + $0x184] sm:$0xf] %v5573_v8  ;;  %v5525_v17 = vpack.c.bf16 %v900_v14, %v900_v14  ;;  %v1093_v19 = vld [vmem:[#allocation2 + $0x170] sm:$0xff]  ;;  %v6636_v25 = vld [vmem:[%s7584_s3 + $0x228] sm:$0xff]   ;;  %6277 = vmatprep.subr.bf16.mxu1 %v6650_v20 }
  0x92   : > { %1429 = vst [vmem:[#allocation3 + $0x1e4] sm:$0xf] %v5574_v13  ;;  %v5558_v22 = vpack.c.bf16 %v1093_v19, %v1093_v19  ;;  %2004 = vst [vmem:[#allocation3 + $0x1a8] sm:$0xf] %v5574_v13  ;;  %v6613_v23 = vld [vmem:[#allocation3 + $0x58] ss:$36 sps:$4 sm:$0xff]  }
  0x93   : > { %4044 = vmatmul.mubr.bf16.vlgmr.msra.gmra.mxu0 %v6600_v58  ;;  %1060 = vst [vmem:[#allocation3 + $0x3f8] sm:$0xf] %v5525_v17  ;;  %1061 = vst [vmem:[#allocation3 + $0x41c] sm:$0xf] %v5526_v18  ;;  %v1270_v26 = vld [vmem:[#allocation2 + $0xc1] sm:$0xff]  ;;  %v1271_v32 = vld [vmem:[#allocation2 + $0xc9] sm:$0xff] }
  0x94   : > { %6400 = vmatpush3.bf16.msra.mxu0 %v7084_v54  ;;  %4051 = vmatprep.mubr.bf16.mxu0 %v6609_v10  ;;  %1252 = vst [vmem:[#allocation3 + $0x3fc] sm:$0xf] %v5557_v21  ;;  %1634 = vst [vmem:[#allocation3 + $0x3bc] sm:$0xf] %v5525_v17  ;;  %v6653_v54 = vld [vmem:[%s7584_s3 + $0x180] sm:$0xff]   ;;  %v5575_v24 = vpack.c.bf16 %v1270_v26, %v1270_v26  ;;  %v5576_v33 = vpack.c.bf16 %v1271_v32, %v1271_v32  ;;  %v5911_v34 = vld [vmem:[%s6843_s21 + $0x78] sm:$0xff]  }
  0x95   : > { %3947 = vmatmul.mubr.bf16.gmra.mxu1 %v6607_v5  ;;  %1635 = vst [vmem:[#allocation3 + $0x3e0] sm:$0xf] %v5526_v18  ;;  %6401 = vmatprep.subr.bf16.mxu0 %v6621_v9  ;;  %1253 = vst [vmem:[#allocation3 + $0x420] sm:$0xf] %v5558_v22  ;;  %v6614_v27 = vld [vmem:[#allocation3 + $0x290] ss:$36 sps:$4 sm:$0xff]   ;;  %v5815_v38 = vunpack.c.l.bf16 %v5911_v34  ;;  %v5816_v39 = vunpack.c.h.bf16 %v5911_v34 }
  0x96   : > { %3954 = vmatprep.mubr.bf16.mxu1 %v6611_v11  ;;  %v6615_v29 = vld [vmem:[#allocation3 + $0xa4] ss:$36 sps:$4 sm:$0xff]   ;;  %v6617_v30 = vld [vmem:[#allocation3 + $0x2dc] ss:$36 sps:$4 sm:$0xff]   ;;  %6278 = vmatpush3.bf16.msra.mxu1 %v6653_v54  ;;  %v6651_v31 = vld [vmem:[%s7584_s3 + $0x220] sm:$0xff]  }
  0x97   : > { %1430 = vst [vmem:[#allocation3 + $0x208] sm:$0xf] %v5575_v24  ;;  %2005 = vst [vmem:[#allocation3 + $0x1cc] sm:$0xf] %v5575_v24  ;;  %v902_v35 = vld [vmem:[#allocation2 + $0x16a] sm:$0xff]  ;;  %v903_v37 = vld [vmem:[#allocation2 + $0x172] sm:$0xff]  ;;  %v339_v43 = vmul.f32 %v7039_v28, %v5815_v38  ;;  %v340_v44 = vmul.f32 %v7039_v28, %v5816_v39 }
  0x98   : > { %6402 = vmatpush3.bf16.msra.mxu0 %v6621_v9  ;;  %v5527_v40 = vpack.c.bf16 %v902_v35, %v902_v35  ;;  %v5528_v41 = vpack.c.bf16 %v903_v37, %v903_v37  ;;  %1431 = vst [vmem:[#allocation3 + $0x22c] sm:$0xf] %v5576_v33  ;;  %2006 = vst [vmem:[#allocation3 + $0x1f0] sm:$0xf] %v5576_v33  ;;  %v6619_v42 = vld [vmem:[#allocation3 + $0xa0] ss:$36 sps:$4 sm:$0xff]  }
  0x99   : > { %6403 = vmatprep.subr.bf16.mxu0 %v6636_v25  ;;  %v6622_v45 = vld [vmem:[#allocation3 + $0x2d8] ss:$36 sps:$4 sm:$0xff]   ;;  %v6624_v46 = vld [vmem:[#allocation3 + $0xec] ss:$36 sps:$4 sm:$0xff]   ;;  %v1641_v47 = vld [vmem:[#allocation2 + $0x30] sm:$0xff]  ;;  %v378_v48 = vadd.f32 %v7049_v36, %v339_v43  ;;  %v379_v49 = vadd.f32 %v7049_v36, %v340_v44 }
  0x9a   : > { %1062 = vst [vmem:[#allocation3 + $0x440] sm:$0xf] %v5527_v40  ;;  %1063 = vst [vmem:[#allocation3 + $0x464] sm:$0xf] %v5528_v41  ;;  %v1642_v50 = vld [vmem:[#allocation2 + $0x38] sm:$0xff]  ;;  %v5625_v51 = vpack.c.bf16 %v1641_v47, %v1641_v47  ;;  %v1643_v57 = vld [vmem:[#allocation2 + $0x48] sm:$0xff] }
  0x9b   : > { %4052 = vmatmul.mubr.bf16.gmra.mxu0 %v6613_v23  ;;  %1636 = vst [vmem:[#allocation3 + $0x404] sm:$0xf] %v5527_v40  ;;  %1637 = vst [vmem:[#allocation3 + $0x428] sm:$0xf] %v5528_v41  ;;  %v5626_v52 = vpack.c.bf16 %v1642_v50, %v1642_v50  ;;  %v6666_v53 = vld [vmem:[%s7584_s3 + $0x218] sm:$0xff]   ;;  %v410_v55 = vmax.f32 %v378_v48, 0.0  ;;  %v5627_v59 = vpack.c.bf16 %v1643_v57, %v1643_v57 }
  0x9c   : > { %4059 = vmatprep.mubr.bf16.mxu0 %v6615_v29  ;;  %6404 = vmatpush3.bf16.msra.mxu0 %v6636_v25  ;;  %v6626_v28 = vld [vmem:[#allocation3 + $0x324] ss:$36 sps:$4 sm:$0xff]   ;;  %v411_v56 = vmax.f32 %v379_v49, 0.0  ;;  %1801 = vst [vmem:[#allocation3 + $0x18] sm:$0xf] %v5625_v51  ;;  %v1645_v63 = vld [vmem:[#allocation2 + $0x60] sm:$0xff] }
  0x9d   : > { %3955 = vmatmul.mubr.bf16.gmra.mxu1 %v6614_v27  ;;  %6405 = vmatprep.subr.bf16.mxu0 %v6651_v31  ;;  %1802 = vst [vmem:[#allocation3 + $0x3c] sm:$0xf] %v5626_v52  ;;  %v1644_v58 = vld [vmem:[#allocation2 + $0x50] sm:$0xff]  ;;  %486 = vst [vmem:[#allocation2 + $0x181] sm:$0xff] %v410_v55  ;;  %v5591_v60 = vpack.c.bf16 %v410_v55, %v410_v55  ;;  %v6628_v62 = vld [vmem:[#allocation3 + $0xe8] ss:$36 sps:$4 sm:$0xff]   ;;  %v5629_v3 = vpack.c.bf16 %v1645_v63, %v1645_v63 }
  0x9e   : > { %3962 = vmatprep.mubr.bf16.mxu1 %v6617_v30  ;;  %487 = vst [vmem:[#allocation2 + $0x189] sm:$0xff] %v411_v56  ;;  %v5628_v36 = vpack.c.bf16 %v1644_v58, %v1644_v58  ;;  %v5592_v61 = vpack.c.bf16 %v411_v56, %v411_v56  ;;  %1803 = vst [vmem:[#allocation3 + $0x60] sm:$0xf] %v5627_v59  ;;  %v1646_v0 = vld [vmem:[#allocation2 + $0x68] sm:$0xff]  ;;  %v6629_v1 = vld [vmem:[#allocation3 + $0x320] ss:$36 sps:$4 sm:$0xff]  }
  0x9f   : > { %1446 = vst [vmem:[#allocation3 + $0x448] sm:$0xf] %v5591_v60  ;;  %v6630_v2 = vld [vmem:[#allocation3 + $0x134] ss:$36 sps:$4 sm:$0xff]   ;;  %v5630_v4 = vpack.c.bf16 %v1646_v0, %v1646_v0  ;;  %v6678_v5 = vld [vmem:[%s7584_s3 + $0x210] sm:$0xff]   ;;  %v1647_v9 = vld [vmem:[#allocation2 + $0x78] sm:$0xff] }
  0xa0   : > { %6406 = vmatpush3.bf16.msra.mxu0 %v6651_v31  ;;  %1804 = vst [vmem:[#allocation3 + $0x84] sm:$0xf] %v5628_v36  ;;  %1447 = vst [vmem:[#allocation3 + $0x46c] sm:$0xf] %v5592_v61  ;;  %v1278_v6 = vld [vmem:[#allocation2 + $0x121] sm:$0xff]  ;;  %v1279_v7 = vld [vmem:[#allocation2 + $0x129] sm:$0xff]  ;;  %v5631_v12 = vpack.c.bf16 %v1647_v9, %v1647_v9 }
  0xa1   : > { %6407 = vmatprep.subr.bf16.mxu0 %v6666_v53  ;;  %v5583_v8 = vpack.c.bf16 %v1278_v6, %v1278_v6  ;;  %v1648_v10 = vld [vmem:[#allocation2 + $0x80] sm:$0xff]  ;;  %1805 = vst [vmem:[#allocation3 + $0xa8] sm:$0xf] %v5629_v3  ;;  %1806 = vst [vmem:[#allocation3 + $0xcc] sm:$0xf] %v5630_v4  ;;  %v5584_v11 = vpack.c.bf16 %v1279_v7, %v1279_v7  ;;  %v1649_v22 = vld [vmem:[#allocation2 + $0x90] sm:$0xff] }
  0xa2   : > { %v5632_v13 = vpack.c.bf16 %v1648_v10, %v1648_v10  ;;  %v1280_v14 = vld [vmem:[#allocation2 + $0x139] sm:$0xff]  ;;  %v1281_v15 = vld [vmem:[#allocation2 + $0x141] sm:$0xff]  ;;  %1807 = vst [vmem:[#allocation3 + $0xf0] sm:$0xf] %v5631_v12  ;;  %v5633_v54 = vpack.c.bf16 %v1649_v22, %v1649_v22  ;;  %v1282_v24 = vld [vmem:[#allocation2 + $0x151] sm:$0xff] }
  0xa3   : > { %4060 = vmatmul.mubr.bf16.gmra.mxu0 %v6619_v42  ;;  %v6632_v16 = vld [vmem:[#allocation3 + $0x36c] ss:$36 sps:$4 sm:$0xff]   ;;  %1438 = vst [vmem:[#allocation3 + $0x328] sm:$0xf] %v5583_v8  ;;  %v5585_v17 = vpack.c.bf16 %v1280_v14, %v1280_v14  ;;  %v5586_v18 = vpack.c.bf16 %v1281_v15, %v1281_v15  ;;  %2013 = vst [vmem:[#allocation3 + $0x2ec] sm:$0xf] %v5583_v8  ;;  %v5587_v31 = vpack.c.bf16 %v1282_v24, %v1282_v24 }
  0xa4   : > { %4067 = vmatprep.mubr.bf16.mxu0 %v6624_v46  ;;  %6408 = vmatpush3.bf16.msra.mxu0 %v6666_v53  ;;  %v1094_v19 = vld [vmem:[#allocation2 + $0x180] sm:$0xff]  ;;  %1439 = vst [vmem:[#allocation3 + $0x34c] sm:$0xf] %v5584_v11  ;;  %1808 = vst [vmem:[#allocation3 + $0x114] sm:$0xf] %v5632_v13  ;;  %v1650_v25 = vld [vmem:[#allocation2 + $0x98] sm:$0xff] }
  0xa5   : > { %3963 = vmatmul.mubr.bf16.gmra.mxu1 %v6622_v45  ;;  %6409 = vmatprep.subr.bf16.mxu0 %v6678_v5  ;;  %v1095_v21 = vld [vmem:[#allocation2 + $0x188] sm:$0xff]  ;;  %2014 = vst [vmem:[#allocation3 + $0x310] sm:$0xf] %v5584_v11  ;;  %v5559_v20 = vpack.c.bf16 %v1094_v19, %v1094_v19  ;;  %1440 = vst [vmem:[#allocation3 + $0x370] sm:$0xf] %v5585_v17  ;;  %v5634_v26 = vpack.c.bf16 %v1650_v25, %v1650_v25  ;;  %v1283_v30 = vld [vmem:[#allocation2 + $0x159] sm:$0xff] }
  0xa6   : > { %3970 = vmatprep.mubr.bf16.mxu1 %v6626_v28  ;;  %v5560_v23 = vpack.c.bf16 %v1095_v21, %v1095_v21  ;;  %1441 = vst [vmem:[#allocation3 + $0x394] sm:$0xf] %v5586_v18  ;;  %2015 = vst [vmem:[#allocation3 + $0x334] sm:$0xf] %v5585_v17  ;;  %v6634_v27 = vld [vmem:[#allocation3 + $0x130] ss:$36 sps:$4 sm:$0xff]   ;;  %v5588_v35 = vpack.c.bf16 %v1283_v30, %v1283_v30 }
  0xa7   : > { %2016 = vst [vmem:[#allocation3 + $0x358] sm:$0xf] %v5586_v18  ;;  %1254 = vst [vmem:[#allocation3 + $0x444] sm:$0xf] %v5559_v20  ;;  %v6691_v29 = vld [vmem:[%s7584_s3 + $0x208] sm:$0xff]   ;;  %v1652_v33 = vld [vmem:[#allocation2 + $0xb0] sm:$0xff] }
  0xa8   : > { %6410 = vmatpush3.bf16.msra.mxu0 %v6678_v5  ;;  %1255 = vst [vmem:[#allocation3 + $0x468] sm:$0xf] %v5560_v23  ;;  %1809 = vst [vmem:[#allocation3 + $0x138] sm:$0xf] %v5633_v54  ;;  %v1651_v32 = vld [vmem:[#allocation2 + $0xa8] sm:$0xff]  ;;  %v5636_v38 = vpack.c.bf16 %v1652_v33, %v1652_v33  ;;  %v1285_v44 = vld [vmem:[#allocation2 + $0x171] sm:$0xff] }
  0xa9   : > { %1810 = vst [vmem:[#allocation3 + $0x15c] sm:$0xf] %v5634_v26  ;;  %v6637_v34 = vld [vmem:[#allocation3 + $0x368] ss:$36 sps:$4 sm:$0xff]   ;;  %6411 = vmatprep.subr.bf16.mxu0 %v6691_v29  ;;  %v5635_v37 = vpack.c.bf16 %v1651_v32, %v1651_v32  ;;  %v6639_v39 = vld [vmem:[#allocation3 + $0x17c] ss:$36 sps:$4 sm:$0xff]   ;;  %v5590_v47 = vpack.c.bf16 %v1285_v44, %v1285_v44 }
  0xaa   : > { %1442 = vst [vmem:[#allocation3 + $0x3b8] sm:$0xf] %v5587_v31  ;;  %v1284_v40 = vld [vmem:[#allocation2 + $0x169] sm:$0xff]  ;;  %2017 = vst [vmem:[#allocation3 + $0x37c] sm:$0xf] %v5587_v31  ;;  %v1653_v49 = vld [vmem:[#allocation2 + $0xc0] sm:$0xff] }
  0xab   : > { %4068 = vmatmul.mubr.bf16.gmra.mxu0 %v6628_v62  ;;  %v6641_v41 = vld [vmem:[#allocation3 + $0x3b4] ss:$36 sps:$4 sm:$0xff]   ;;  %1443 = vst [vmem:[#allocation3 + $0x3dc] sm:$0xf] %v5588_v35  ;;  %1811 = vst [vmem:[#allocation3 + $0x180] sm:$0xf] %v5635_v37  ;;  %v5589_v42 = vpack.c.bf16 %v1284_v40, %v1284_v40  ;;  %v5637_v51 = vpack.c.bf16 %v1653_v49, %v1653_v49 }
  0xac   : > { %4075 = vmatprep.mubr.bf16.mxu0 %v6630_v2  ;;  %6412 = vmatpush3.bf16.msra.mxu0 %v6691_v29  ;;  %1812 = vst [vmem:[#allocation3 + $0x1a4] sm:$0xf] %v5636_v38  ;;  %2018 = vst [vmem:[#allocation3 + $0x3a0] sm:$0xf] %v5588_v35  ;;  %v6643_v43 = vld [vmem:[#allocation3 + $0x178] ss:$36 sps:$4 sm:$0xff]  }
  0xad   : > { %3971 = vmatmul.mubr.bf16.gmra.mxu1 %v6629_v1  ;;  %1444 = vst [vmem:[#allocation3 + $0x400] sm:$0xf] %v5589_v42  ;;  %2019 = vst [vmem:[#allocation3 + $0x3c4] sm:$0xf] %v5589_v42  ;;  %v6644_v45 = vld [vmem:[#allocation3 + $0x3b0] ss:$36 sps:$4 sm:$0xff]  }
  0xae   : > { %3978 = vmatprep.mubr.bf16.mxu1 %v6632_v16  ;;  %v6645_v46 = vld [vmem:[#allocation3 + $0x1c4] ss:$36 sps:$4 sm:$0xff]   ;;  %v6647_v48 = vld [vmem:[#allocation3 + $0x3fc] ss:$36 sps:$4 sm:$0xff]   ;;  %1445 = vst [vmem:[#allocation3 + $0x424] sm:$0xf] %v5590_v47 }
  0xaf   : > { %2020 = vst [vmem:[#allocation3 + $0x3e8] sm:$0xf] %v5590_v47  ;;  %v1654_v50 = vld [vmem:[#allocation2 + $0xc8] sm:$0xff]  ;;  %v6704_v53 = vld [vmem:[%s7584_s3 + $0x200] sm:$0xff]   ;;  %v6649_v56 = vld [vmem:[#allocation3 + $0x1c0] ss:$36 sps:$4 sm:$0xff]  }
  0xb0   : > { %v5638_v52 = vpack.c.bf16 %v1654_v50, %v1654_v50  ;;  %v1478_v28 = vld [vmem:[#allocation2 + $0x182] sm:$0xff]  ;;  %v1479_v55 = vld [vmem:[#allocation2 + $0x18a] sm:$0xff]  ;;  %1813 = vst [vmem:[#allocation3 + $0x1c8] sm:$0xf] %v5637_v51  ;;  %v1655_v59 = vld [vmem:[#allocation2 + $0xd8] sm:$0xff]  ;;  %6413 = vmatprep.subr.bf16.mxu0 %v6704_v53 }
  0xb1   : > { %v5623_v57 = vpack.c.bf16 %v1478_v28, %v1478_v28  ;;  %v5624_v58 = vpack.c.bf16 %v1479_v55, %v1479_v55  ;;  %v1656_v36 = vld [vmem:[#allocation2 + $0xe0] sm:$0xff]  ;;  %v6652_v61 = vld [vmem:[#allocation3 + $0x3f8] ss:$36 sps:$4 sm:$0xff]   ;;  %v5639_v63 = vpack.c.bf16 %v1655_v59, %v1655_v59  ;;  %v2025_v3 = vld [vmem:[#allocation2 + $0x32] sm:$0xff]  ;;  %6414 = vmatpush3.bf16.msra.mxu0 %v6704_v53 }
  0xb2   : > { %v1847_v60 = vld [vmem:[#allocation2 + $0xd9] sm:$0xff]  ;;  %1814 = vst [vmem:[#allocation3 + $0x1ec] sm:$0xf] %v5638_v52  ;;  %v5640_v0 = vpack.c.bf16 %v1656_v36, %v1656_v36  ;;  %v1848_v1 = vld [vmem:[#allocation2 + $0xe1] sm:$0xff]  ;;  %v5689_v6 = vpack.c.bf16 %v2025_v3, %v2025_v3  ;;  %v1657_v8 = vld [vmem:[#allocation2 + $0xf0] sm:$0xff] }
  0xb3   : > { %4076 = vmatmul.mubr.bf16.gmra.mxu0 %v6634_v27  ;;  %v6654_v62 = vld [vmem:[#allocation3 + $0x20c] ss:$36 sps:$4 sm:$0xff]   ;;  %v5671_v2 = vpack.c.bf16 %v1847_v60, %v1847_v60  ;;  %1638 = vst [vmem:[#allocation3 + $0x44c] sm:$0xf] %v5623_v57  ;;  %1639 = vst [vmem:[#allocation3 + $0x470] sm:$0xf] %v5624_v58  ;;  %v5672_v5 = vpack.c.bf16 %v1848_v1, %v1848_v1  ;;  %v5641_v11 = vpack.c.bf16 %v1657_v8, %v1657_v8 }
  0xb4   : > { %4083 = vmatprep.mubr.bf16.mxu0 %v6639_v39  ;;  %v2026_v4 = vld [vmem:[#allocation2 + $0x3a] sm:$0xff]  ;;  %v1849_v10 = vld [vmem:[#allocation2 + $0xf1] sm:$0xff]  ;;  %2213 = vst [vmem:[#allocation3 + $0x410] sm:$0xf] %v5623_v57  ;;  %2214 = vst [vmem:[#allocation3 + $0x434] sm:$0xf] %v5624_v58 }
  0xb5   : > { %3979 = vmatmul.mubr.bf16.gmra.mxu1 %v6637_v34  ;;  %v5690_v7 = vpack.c.bf16 %v2026_v4, %v2026_v4  ;;  %v1658_v9 = vld [vmem:[#allocation2 + $0xf8] sm:$0xff]  ;;  %1815 = vst [vmem:[#allocation3 + $0x210] sm:$0xf] %v5639_v63  ;;  %1816 = vst [vmem:[#allocation3 + $0x234] sm:$0xf] %v5640_v0  ;;  %v5673_v14 = vpack.c.bf16 %v1849_v10, %v1849_v10  ;;  %v2027_v15 = vld [vmem:[#allocation2 + $0x4a] sm:$0xff] }
  0xb6   : > { %3986 = vmatprep.mubr.bf16.mxu1 %v6641_v41  ;;  %2007 = vst [vmem:[#allocation3 + $0x214] sm:$0xf] %v5671_v2  ;;  %v5642_v12 = vpack.c.bf16 %v1658_v9, %v1658_v9  ;;  %v1850_v13 = vld [vmem:[#allocation2 + $0xf9] sm:$0xff]  ;;  %v6754_v17 = vld [vmem:[#allocation2 + $0x8] sm:$0xff]  ;;  %2008 = vst [vmem:[#allocation3 + $0x238] sm:$0xf] %v5672_v5  ;;  %v5691_v22 = vpack.c.bf16 %v2027_v15, %v2027_v15 }
  0xb7   : > { %v2028_v16 = vld [vmem:[#allocation2 + $0x52] sm:$0xff]  ;;  %v5656_v18 = vpack.c.bf16 %v6754_v17, %v6754_v17  ;;  %2185 = vst [vmem:[#allocation3 + $0x20] sm:$0xf] %v5689_v6  ;;  %2186 = vst [vmem:[#allocation3 + $0x44] sm:$0xf] %v5690_v7  ;;  %v5674_v21 = vpack.c.bf16 %v1850_v13, %v1850_v13  ;;  %v2029_v23 = vld [vmem:[#allocation2 + $0x62] sm:$0xff] }
  0xb8   : > { %v6656_v19 = vld [vmem:[#allocation3 + $0x444] ss:$36 sps:$4 sm:$0xff]   ;;  %v5692_v20 = vpack.c.bf16 %v2028_v16, %v2028_v16  ;;  %1817 = vst [vmem:[#allocation3 + $0x258] sm:$0xf] %v5641_v11  ;;  %1818 = vst [vmem:[#allocation3 + $0x27c] sm:$0xf] %v5642_v12  ;;  %v5693_v26 = vpack.c.bf16 %v2029_v23, %v2029_v23 }
  0xb9   : > { %2009 = vst [vmem:[#allocation3 + $0x25c] sm:$0xf] %v5673_v14  ;;  %v2030_v25 = vld [vmem:[#allocation2 + $0x6a] sm:$0xff]  ;;  %1832 = vst [vmem:[#allocation3 + $0x474] sm:$0xf] %v5656_v18  ;;  %v2031_v35 = vld [vmem:[#allocation2 + $0x7a] sm:$0xff] }
  0xba   : > { %v1659_v54 = vld [vmem:[#allocation2 + $0x108] sm:$0xff]  ;;  %2010 = vst [vmem:[#allocation3 + $0x280] sm:$0xf] %v5674_v21  ;;  %2187 = vst [vmem:[#allocation3 + $0x68] sm:$0xf] %v5691_v22  ;;  %v5694_v27 = vpack.c.bf16 %v2030_v25, %v2030_v25  ;;  %v1660_v29 = vld [vmem:[#allocation2 + $0x110] sm:$0xff]  ;;  %v5695_v38 = vpack.c.bf16 %v2031_v35, %v2031_v35 }
  0xbb   : > { %4084 = vmatmul.mubr.bf16.gmra.mxu0 %v6643_v43  ;;  %2188 = vst [vmem:[#allocation3 + $0x8c] sm:$0xf] %v5692_v20  ;;  %v5643_v24 = vpack.c.bf16 %v1659_v54, %v1659_v54  ;;  %v1851_v30 = vld [vmem:[#allocation2 + $0x109] sm:$0xff]  ;;  %v1852_v31 = vld [vmem:[#allocation2 + $0x111] sm:$0xff]  ;;  %v5644_v32 = vpack.c.bf16 %v1660_v29, %v1660_v29  ;;  %2189 = vst [vmem:[#allocation3 + $0xb0] sm:$0xf] %v5693_v26 }
  0xbc   : > { %4091 = vmatprep.mubr.bf16.mxu0 %v6645_v46  ;;  %v5675_v33 = vpack.c.bf16 %v1851_v30, %v1851_v30  ;;  %v5676_v34 = vpack.c.bf16 %v1852_v31, %v1852_v31  ;;  %v2032_v37 = vld [vmem:[#allocation2 + $0x82] sm:$0xff]  ;;  %2190 = vst [vmem:[#allocation3 + $0xd4] sm:$0xf] %v5694_v27  ;;  %v6658_v40 = vld [vmem:[#allocation3 + $0x208] ss:$36 sps:$4 sm:$0xff]   ;;  %v2035_v28 = vld [vmem:[#allocation2 + $0xaa] sm:$0xff] }
  0xbd   : > { %3987 = vmatmul.mubr.bf16.gmra.mxu1 %v6644_v45  ;;  %1819 = vst [vmem:[#allocation3 + $0x2a0] sm:$0xf] %v5643_v24  ;;  %v5696_v39 = vpack.c.bf16 %v2032_v37, %v2032_v37  ;;  %1820 = vst [vmem:[#allocation3 + $0x2c4] sm:$0xf] %v5644_v32  ;;  %v2033_v41 = vld [vmem:[#allocation2 + $0x92] sm:$0xff]  ;;  %v2034_v50 = vld [vmem:[#allocation2 + $0x9a] sm:$0xff]  ;;  %v5699_v58 = vpack.c.bf16 %v2035_v28, %v2035_v28 }
  0xbe   : > { %3994 = vmatprep.mubr.bf16.mxu1 %v6647_v48  ;;  %2011 = vst [vmem:[#allocation3 + $0x2a4] sm:$0xf] %v5675_v33  ;;  %2012 = vst [vmem:[#allocation3 + $0x2c8] sm:$0xf] %v5676_v34  ;;  %v6659_v42 = vld [vmem:[#allocation3 + $0x440] ss:$36 sps:$4 sm:$0xff]   ;;  %v5697_v44 = vpack.c.bf16 %v2033_v41, %v2033_v41  ;;  %v5698_v51 = vpack.c.bf16 %v2034_v50, %v2034_v50 }
  0xbf   : > { %2191 = vst [vmem:[#allocation3 + $0xf8] sm:$0xf] %v5695_v38  ;;  %2192 = vst [vmem:[#allocation3 + $0x11c] sm:$0xf] %v5696_v39  ;;  %v6660_v43 = vld [vmem:[#allocation3 + $0x254] ss:$36 sps:$4 sm:$0xff]  }
  0xc0   : > { %v6665_v45 = vld [vmem:[#allocation3 + $0x1c] ss:$36 sps:$4 sm:$0xff]   ;;  %2193 = vst [vmem:[#allocation3 + $0x140] sm:$0xf] %v5697_v44  ;;  %v6662_v46 = vld [vmem:[#allocation3 + $0x250] ss:$36 sps:$4 sm:$0xff]  }
  0xc1   : > { %v6663_v47 = vld [vmem:[#allocation3 + $0x18] ss:$36 sps:$4 sm:$0xff]   ;;  %v6670_v49 = vld [vmem:[#allocation3 + $0x64] ss:$36 sps:$4 sm:$0xff]   ;;  %v1661_v52 = vld [vmem:[#allocation2 + $0x120] sm:$0xff] }
  0xc2   : > { %v6667_v48 = vld [vmem:[#allocation3 + $0x29c] ss:$36 sps:$4 sm:$0xff]   ;;  %v5645_v55 = vpack.c.bf16 %v1661_v52, %v1661_v52  ;;  %v2037_v59 = vld [vmem:[#allocation2 + $0xc2] sm:$0xff]  ;;  %2194 = vst [vmem:[#allocation3 + $0x164] sm:$0xf] %v5698_v51  ;;  %v2039_v3 = vld [vmem:[#allocation2 + $0xda] sm:$0xff] }
  0xc3   : > { %4092 = vmatmul.mubr.bf16.gmra.mxu0 %v6649_v56  ;;  %v1662_v53 = vld [vmem:[#allocation2 + $0x128] sm:$0xff]  ;;  %v2036_v57 = vld [vmem:[#allocation2 + $0xb2] sm:$0xff]  ;;  %v1664_v63 = vld [vmem:[#allocation2 + $0x140] sm:$0xff]  ;;  %2195 = vst [vmem:[#allocation3 + $0x188] sm:$0xf] %v5699_v58  ;;  %v5703_v6 = vpack.c.bf16 %v2039_v3, %v2039_v3 }
  0xc4   : > { %4099 = vmatprep.mubr.bf16.mxu0 %v6654_v62  ;;  %v5646_v56 = vpack.c.bf16 %v1662_v53, %v1662_v53  ;;  %v5700_v36 = vpack.c.bf16 %v2036_v57, %v2036_v57  ;;  %v2038_v60 = vld [vmem:[#allocation2 + $0xca] sm:$0xff]  ;;  %v1663_v62 = vld [vmem:[#allocation2 + $0x138] sm:$0xff]  ;;  %1821 = vst [vmem:[#allocation3 + $0x2e8] sm:$0xf] %v5645_v55  ;;  %v5648_v2 = vpack.c.bf16 %v1664_v63, %v1664_v63  ;;  %v2040_v4 = vld [vmem:[#allocation2 + $0xe2] sm:$0xff] }
  0xc5   : > { %3995 = vmatmul.mubr.bf16.gmra.mxu1 %v6652_v61  ;;  %v5701_v61 = vpack.c.bf16 %v2037_v59, %v2037_v59  ;;  %v5702_v0 = vpack.c.bf16 %v2038_v60, %v2038_v60  ;;  %v5647_v1 = vpack.c.bf16 %v1663_v62, %v1663_v62  ;;  %v2041_v5 = vld [vmem:[#allocation2 + $0xf2] sm:$0xff]  ;;  %v5704_v7 = vpack.c.bf16 %v2040_v4, %v2040_v4  ;;  %v2042_v8 = vld [vmem:[#allocation2 + $0xfa] sm:$0xff]  ;;  %v6669_v12 = vld [vmem:[#allocation3 + $0x298] ss:$36 sps:$4 sm:$0xff]  }
  0xc6   : > { %4002 = vmatprep.mubr.bf16.mxu1 %v6656_v19  ;;  %1822 = vst [vmem:[#allocation3 + $0x30c] sm:$0xf] %v5646_v56  ;;  %2196 = vst [vmem:[#allocation3 + $0x1ac] sm:$0xf] %v5700_v36  ;;  %v5705_v9 = vpack.c.bf16 %v2041_v5, %v2041_v5  ;;  %v1665_v10 = vld [vmem:[#allocation2 + $0x150] sm:$0xff]  ;;  %v1666_v11 = vld [vmem:[#allocation2 + $0x158] sm:$0xff]  ;;  %v5706_v13 = vpack.c.bf16 %v2042_v8, %v2042_v8 }
  0xc7   : > { %2197 = vst [vmem:[#allocation3 + $0x1d0] sm:$0xf] %v5701_v61  ;;  %2198 = vst [vmem:[#allocation3 + $0x1f4] sm:$0xf] %v5702_v0  ;;  %v5649_v14 = vpack.c.bf16 %v1665_v10, %v1665_v10  ;;  %v5650_v15 = vpack.c.bf16 %v1666_v11, %v1666_v11  ;;  %v2043_v16 = vld [vmem:[#allocation2 + $0x10a] sm:$0xff]  ;;  %v2044_v17 = vld [vmem:[#allocation2 + $0x112] sm:$0xff] }
  0xc8   : > { %1823 = vst [vmem:[#allocation3 + $0x330] sm:$0xf] %v5647_v1  ;;  %1824 = vst [vmem:[#allocation3 + $0x354] sm:$0xf] %v5648_v2  ;;  %v2045_v18 = vld [vmem:[#allocation2 + $0x122] sm:$0xff]  ;;  %v5707_v22 = vpack.c.bf16 %v2043_v16, %v2043_v16  ;;  %v5708_v20 = vpack.c.bf16 %v2044_v17, %v2044_v17  ;;  %v2046_v23 = vld [vmem:[#allocation2 + $0x12a] sm:$0xff] }
  0xc9   : > { %v6672_v19 = vld [vmem:[#allocation3 + $0x60] ss:$36 sps:$4 sm:$0xff]   ;;  %2199 = vst [vmem:[#allocation3 + $0x218] sm:$0xf] %v5703_v6  ;;  %2200 = vst [vmem:[#allocation3 + $0x23c] sm:$0xf] %v5704_v7  ;;  %v5709_v25 = vpack.c.bf16 %v2045_v18, %v2045_v18  ;;  %v5710_v27 = vpack.c.bf16 %v2046_v23, %v2046_v23 }
  0xca   : > { %v6673_v21 = vld [vmem:[#allocation3 + $0x2e4] ss:$36 sps:$4 sm:$0xff]   ;;  %2201 = vst [vmem:[#allocation3 + $0x260] sm:$0xf] %v5705_v9  ;;  %v1667_v54 = vld [vmem:[#allocation2 + $0x168] sm:$0xff]  ;;  %v1669_v38 = vld [vmem:[#allocation2 + $0x180] sm:$0xff] }
  0xcb   : > { %4100 = vmatmul.mubr.bf16.gmra.mxu0 %v6658_v40  ;;  %v1668_v26 = vld [vmem:[#allocation2 + $0x170] sm:$0xff]  ;;  %2202 = vst [vmem:[#allocation3 + $0x284] sm:$0xf] %v5706_v13  ;;  %1825 = vst [vmem:[#allocation3 + $0x378] sm:$0xf] %v5649_v14  ;;  %v5651_v29 = vpack.c.bf16 %v1667_v54, %v1667_v54  ;;  %v2047_v30 = vld [vmem:[#allocation2 + $0x13a] sm:$0xff] }
  0xcc   : > { %4107 = vmatprep.mubr.bf16.mxu0 %v6660_v43  ;;  %1826 = vst [vmem:[#allocation3 + $0x39c] sm:$0xf] %v5650_v15  ;;  %v5652_v24 = vpack.c.bf16 %v1668_v26, %v1668_v26  ;;  %v2048_v31 = vld [vmem:[#allocation2 + $0x142] sm:$0xff]  ;;  %v2049_v32 = vld [vmem:[#allocation2 + $0x152] sm:$0xff]  ;;  %2203 = vst [vmem:[#allocation3 + $0x2a8] sm:$0xf] %v5707_v22  ;;  %v5711_v33 = vpack.c.bf16 %v2047_v30, %v2047_v30 }
  0xcd   : > { %4003 = vmatmul.mubr.bf16.gmra.mxu1 %v6659_v42  ;;  %2204 = vst [vmem:[#allocation3 + $0x2cc] sm:$0xf] %v5708_v20  ;;  %2205 = vst [vmem:[#allocation3 + $0x2f0] sm:$0xf] %v5709_v25  ;;  %v5712_v34 = vpack.c.bf16 %v2048_v31, %v2048_v31  ;;  %v2050_v35 = vld [vmem:[#allocation2 + $0x15a] sm:$0xff]  ;;  %v5713_v37 = vpack.c.bf16 %v2049_v32, %v2049_v32  ;;  %v1670_v39 = vld [vmem:[#allocation2 + $0x188] sm:$0xff]  ;;  %v5653_v42 = vpack.c.bf16 %v1669_v38, %v1669_v38 }
  0xce   : > { %4204 = vmatprep.mubr.bf16.mxu1 %v6665_v45  ;;  %v6676_v40 = vld [vmem:[#allocation3 + $0xac] ss:$36 sps:$4 sm:$0xff]   ;;  %2206 = vst [vmem:[#allocation3 + $0x314] sm:$0xf] %v5710_v27  ;;  %1827 = vst [vmem:[#allocation3 + $0x3c0] sm:$0xf] %v5651_v29  ;;  %v5714_v41 = vpack.c.bf16 %v2050_v35, %v2050_v35  ;;  %v5654_v43 = vpack.c.bf16 %v1670_v39, %v1670_v39 }
  0xcf   : > { %1828 = vst [vmem:[#allocation3 + $0x3e4] sm:$0xf] %v5652_v24  ;;  %v1861_v44 = vld [vmem:[#allocation2 + $0x181] sm:$0xff]  ;;  %2207 = vst [vmem:[#allocation3 + $0x338] sm:$0xf] %v5711_v33  ;;  %v1862_v56 = vld [vmem:[#allocation2 + $0x189] sm:$0xff] }
  0xd0   : > { %2208 = vst [vmem:[#allocation3 + $0x35c] sm:$0xf] %v5712_v34  ;;  %2209 = vst [vmem:[#allocation3 + $0x380] sm:$0xf] %v5713_v37  ;;  %v5685_v45 = vpack.c.bf16 %v1861_v44, %v1861_v44  ;;  %v6682_v51 = vld [vmem:[#allocation3 + $0x328] ss:$36 sps:$4 sm:$0xff]   ;;  %v5686_v58 = vpack.c.bf16 %v1862_v56, %v1862_v56 }
  0xd1   : > { %2210 = vst [vmem:[#allocation3 + $0x3a4] sm:$0xf] %v5714_v41  ;;  %1829 = vst [vmem:[#allocation3 + $0x408] sm:$0xf] %v5653_v42  ;;  %v6685_v52 = vld [vmem:[#allocation3 + $0xf0] ss:$36 sps:$4 sm:$0xff]  }
  0xd2   : > { %1830 = vst [vmem:[#allocation3 + $0x42c] sm:$0xf] %v5654_v43  ;;  %2021 = vst [vmem:[#allocation3 + $0x40c] sm:$0xf] %v5685_v45  ;;  %v6686_v28 = vld [vmem:[#allocation3 + $0x374] ss:$36 sps:$4 sm:$0xff]  }
  0xd3   : > { %4108 = vmatmul.mubr.bf16.gmra.mxu0 %v6662_v46  ;;  %v6675_v46 = vld [vmem:[#allocation3 + $0x2e0] ss:$36 sps:$4 sm:$0xff]   ;;  %v1671_v63 = vld [vmem:[#allocation2 + $0x198] sm:$0xff]  ;;  %2022 = vst [vmem:[#allocation3 + $0x430] sm:$0xf] %v5686_v58  ;;  %v1864_v3 = vld [vmem:[#allocation2 + $0x1a1] sm:$0xff] }
  0xd4   : > { %4115 = vmatprep.mubr.bf16.mxu0 %v6667_v48  ;;  %v6680_v48 = vld [vmem:[#allocation3 + $0x32c] ss:$36 sps:$4 sm:$0xff]   ;;  %v2051_v59 = vld [vmem:[#allocation2 + $0x16a] sm:$0xff]  ;;  %v2052_v36 = vld [vmem:[#allocation2 + $0x172] sm:$0xff]  ;;  %v5655_v1 = vpack.c.bf16 %v1671_v63, %v1671_v63  ;;  %v5688_v7 = vpack.c.bf16 %v1864_v3, %v1864_v3 }
  0xd5   : > { %4205 = vmatmul.mubr.bf16.vlgmr.msra.gmra.mxu1 %v6663_v47  ;;  %v6679_v47 = vld [vmem:[#allocation3 + $0xa8] ss:$36 sps:$4 sm:$0xff]   ;;  %v6689_v60 = vld [vmem:[#allocation3 + $0x13c] ss:$36 sps:$4 sm:$0xff]   ;;  %v5715_v61 = vpack.c.bf16 %v2051_v59, %v2051_v59  ;;  %v5716_v62 = vpack.c.bf16 %v2052_v36, %v2052_v36  ;;  %v2056_v8 = vld [vmem:[#allocation2 + $0x1a2] sm:$0xff] }
  0xd6   : > { %4212 = vmatprep.mubr.bf16.mxu1 %v6670_v49  ;;  %v6683_v49 = vld [vmem:[#allocation3 + $0xf4] ss:$36 sps:$4 sm:$0xff]   ;;  %v1863_v2 = vld [vmem:[#allocation2 + $0x199] sm:$0xff]  ;;  %1831 = vst [vmem:[#allocation3 + $0x450] sm:$0xf] %v5655_v1  ;;  %v5720_v10 = vpack.c.bf16 %v2056_v8, %v2056_v8 }
  0xd7   : > { %v2055_v4 = vld [vmem:[#allocation2 + $0x19a] sm:$0xff]  ;;  %2211 = vst [vmem:[#allocation3 + $0x3c8] sm:$0xf] %v5715_v61  ;;  %2212 = vst [vmem:[#allocation3 + $0x3ec] sm:$0xf] %v5716_v62  ;;  %v5687_v6 = vpack.c.bf16 %v1863_v2, %v1863_v2 }
  0xd8   : > { %v5719_v9 = vpack.c.bf16 %v2055_v4, %v2055_v4  ;;  %2024 = vst [vmem:[#allocation3 + $0x478] sm:$0xf] %v5688_v7  ;;  %2216 = vst [vmem:[#allocation3 + $0x47c] sm:$0xf] %v5720_v10  ;;  %v6688_v11 = vld [vmem:[#allocation3 + $0x370] ss:$36 sps:$4 sm:$0xff]  }
  0xd9   : > { %2023 = vst [vmem:[#allocation3 + $0x454] sm:$0xf] %v5687_v6  ;;  %v6693_v13 = vld [vmem:[#allocation3 + $0x3bc] ss:$36 sps:$4 sm:$0xff]   ;;  %v6696_v15 = vld [vmem:[#allocation3 + $0x184] ss:$36 sps:$4 sm:$0xff]  }
  0xda   : > { %2215 = vst [vmem:[#allocation3 + $0x458] sm:$0xf] %v5719_v9  ;;  %v6695_v22 = vld [vmem:[#allocation3 + $0x3b8] ss:$36 sps:$4 sm:$0xff]   ;;  %v6698_v23 = vld [vmem:[#allocation3 + $0x180] ss:$36 sps:$4 sm:$0xff]  }
  0xdb   : > { %4116 = vmatmul.mubr.bf16.gmra.mxu0 %v6669_v12  ;;  %v6692_v12 = vld [vmem:[#allocation3 + $0x138] ss:$36 sps:$4 sm:$0xff]   ;;  %v6699_v25 = vld [vmem:[#allocation3 + $0x404] ss:$36 sps:$4 sm:$0xff]   ;;  %v6702_v27 = vld [vmem:[#allocation3 + $0x1cc] ss:$36 sps:$4 sm:$0xff]  }
  0xdc   : > { %4123 = vmatprep.mubr.bf16.mxu0 %v6673_v21  ;;  %v6701_v37 = vld [vmem:[#allocation3 + $0x400] ss:$36 sps:$4 sm:$0xff]   ;;  %v6706_v41 = vld [vmem:[#allocation3 + $0x44c] ss:$36 sps:$4 sm:$0xff]   ;;  %v6709_v42 = vld [vmem:[#allocation3 + $0x214] ss:$36 sps:$4 sm:$0xff]  }
  0xdd   : > { %4213 = vmatmul.mubr.bf16.gmra.mxu1 %v6672_v19  ;;  %v6712_v56 = vld [vmem:[#allocation3 + $0x20] ss:$36 sps:$4 sm:$0xff]   ;;  %v6716_v3 = vld [vmem:[#allocation3 + $0x68] ss:$36 sps:$4 sm:$0xff]   ;;  %v6713_v7 = vld [vmem:[#allocation3 + $0x258] ss:$36 sps:$4 sm:$0xff]  }
  0xde   : > { %4220 = vmatprep.mubr.bf16.mxu1 %v6676_v40  ;;  %v6705_v40 = vld [vmem:[#allocation3 + $0x1c8] ss:$36 sps:$4 sm:$0xff]   ;;  %v6717_v8 = vld [vmem:[#allocation3 + $0xb0] ss:$36 sps:$4 sm:$0xff]  }
  0xdf   : > { %v6720_v9 = vld [vmem:[#allocation3 + $0x2a4] ss:$36 sps:$4 sm:$0xff]  }
  0xe3   : > { %4124 = vmatmul.mubr.bf16.gmra.mxu0 %v6675_v46 }
  0xe4   : > { %4131 = vmatprep.mubr.bf16.mxu0 %v6680_v48 }
  0xe5   : > { %4221 = vmatmul.mubr.bf16.gmra.mxu1 %v6679_v47 }
  0xe6   : > { %4228 = vmatprep.mubr.bf16.mxu1 %v6683_v49 }
  0xeb   : > { %4132 = vmatmul.mubr.bf16.gmra.mxu0 %v6682_v51  ;;  %v6708_v51 = vld [vmem:[#allocation3 + $0x448] ss:$36 sps:$4 sm:$0xff]  }
  0xec   : > { %4139 = vmatprep.mubr.bf16.mxu0 %v6686_v28  ;;  %v6711_v28 = vld [vmem:[#allocation3 + $0x210] ss:$36 sps:$4 sm:$0xff]  }
  0xed   : > { %4229 = vmatmul.mubr.bf16.gmra.mxu1 %v6685_v52 }
  0xee   : > { %4236 = vmatprep.mubr.bf16.mxu1 %v6689_v60 }
  0xf1   : > { %v5943_v50 = vpop.f32.mrf.mxu0 }
  0xf3   : > { %v5944_v53 = vpop.f32.mrf.mxu0  ;;  %4140 = vmatmul.mubr.bf16.gmra.mxu0 %v6688_v11 }
  0xf4   : > { %v7135_v55 = vadd.f32 %v5944_v53, %v5943_v50  ;;  %4147 = vmatprep.mubr.bf16.mxu0 %v6693_v13 }
  0xf5   : > { %v5946_v57 = vpop.f32.mrf.mxu0  ;;  %v6015_v14 = vpop.f32.mrf.mxu1  ;;  %4237 = vmatmul.mubr.bf16.gmra.mxu1 %v6692_v12 }
  0xf6   : > { %4244 = vmatprep.mubr.bf16.mxu1 %v6696_v15 }
  0xf7   : > { %v5947_v0 = vpop.f32.mrf.mxu0  ;;  %v6016_v16 = vpop.f32.mrf.mxu1 }
  0xf8   : > { %v7137_v5 = vadd.f32 %v5947_v0, %v5946_v57  ;;  %v7139_v17 = vadd.f32 %v6016_v16, %v6015_v14  ;;  %v6715_v57 = vld [vmem:[#allocation3 + $0x25c] ss:$36 sps:$4 sm:$0xff]  }
  0xf9   : > { %v6018_v18 = vpop.f32.mrf.mxu1  ;;  %v5949_v21 = vpop.f32.mrf.mxu0 }
  0xfb   : > { %v6019_v19 = vpop.f32.mrf.mxu1  ;;  %v5950_v26 = vpop.f32.mrf.mxu0  ;;  %4148 = vmatmul.mubr.bf16.gmra.mxu0 %v6695_v22  ;;  %v6721_v22 = vld [vmem:[#allocation3 + $0xf8] ss:$36 sps:$4 sm:$0xff]  }
  0xfc   : > { %v7141_v20 = vadd.f32 %v6019_v19, %v6018_v18  ;;  %v7143_v29 = vadd.f32 %v5950_v26, %v5949_v21  ;;  %4155 = vmatprep.mubr.bf16.mxu0 %v6699_v25  ;;  %v6718_v25 = vld [vmem:[#allocation3 + $0x2a0] ss:$36 sps:$4 sm:$0xff]  }
  0xfd   : > { %v6021_v54 = vpop.f32.mrf.mxu1  ;;  %v5952_v30 = vpop.f32.mrf.mxu0  ;;  %4245 = vmatmul.mubr.bf16.gmra.mxu1 %v6698_v23 }
  0xfe   : > { %4252 = vmatprep.mubr.bf16.mxu1 %v6702_v27  ;;  %v6725_v27 = vld [vmem:[#allocation3 + $0x2ec] ss:$36 sps:$4 sm:$0xff]  }
  0xff   : > { %v6022_v24 = vpop.f32.mrf.mxu1  ;;  %v5953_v33 = vpop.f32.mrf.mxu0 }
 0x100   : > { %v7145_v31 = vadd.f32 %v6022_v24, %v6021_v54  ;;  %v7147_v34 = vadd.f32 %v5953_v33, %v5952_v30  ;;  %v6722_v54 = vld [vmem:[#allocation3 + $0x140] ss:$36 sps:$4 sm:$0xff]  }
 0x101   : > { %v6024_v32 = vpop.f32.mrf.mxu1  ;;  %v5955_v39 = vpop.f32.mrf.mxu0 }
 0x103   : > { %v6025_v35 = vpop.f32.mrf.mxu1  ;;  %v5956_v43 = vpop.f32.mrf.mxu0  ;;  %4156 = vmatmul.mubr.bf16.gmra.mxu0 %v6701_v37 }
 0x104   : > { %v7149_v38 = vadd.f32 %v6025_v35, %v6024_v32  ;;  %v7151_v44 = vadd.f32 %v5956_v43, %v5955_v39  ;;  %4163 = vmatprep.mubr.bf16.mxu0 %v6706_v41 }
 0x105   : > { %v6027_v45 = vpop.f32.mrf.mxu1  ;;  %4253 = vmatmul.mubr.bf16.gmra.mxu1 %v6705_v40  ;;  %v5958_v46 = vpop.f32.mrf.mxu0 }
 0x106   : > { %4260 = vmatprep.mubr.bf16.mxu1 %v6709_v42 }
 0x107   : > { %v6028_v47 = vpop.f32.mrf.mxu1  ;;  %v5959_v48 = vpop.f32.mrf.mxu0 }
 0x108   : > { %v7153_v49 = vadd.f32 %v6028_v47, %v6027_v45  ;;  %v7155_v50 = vadd.f32 %v5959_v48, %v5958_v46  ;;  %v6723_v45 = vld [vmem:[#allocation3 + $0x2e8] ss:$36 sps:$4 sm:$0xff]   ;;  %v6727_v46 = vld [vmem:[#allocation3 + $0x1d0] ss:$36 sps:$4 sm:$0xff]  }
 0x109   : > { %v6030_v52 = vpop.f32.mrf.mxu1  ;;  %v5961_v53 = vpop.f32.mrf.mxu0 }
 0x10b   : > { %v6031_v58 = vpop.f32.mrf.mxu1  ;;  %v5962_v59 = vpop.f32.mrf.mxu0  ;;  %4164 = vmatmul.mubr.bf16.gmra.mxu0 %v6708_v51  ;;  %v6730_v51 = vld [vmem:[#allocation3 + $0x334] ss:$36 sps:$4 sm:$0xff]  }
 0x10c   : > { %v7157_v36 = vadd.f32 %v6031_v58, %v6030_v52  ;;  %v7159_v60 = vadd.f32 %v5962_v59, %v5961_v53  ;;  %6415 = vmatprep.mubr.bf16.mxu0 %v6712_v56 }
 0x10d   : > { %v6033_v61 = vpop.f32.mrf.mxu1  ;;  %4261 = vmatmul.mubr.bf16.gmra.mxu1 %v6711_v28  ;;  %v5964_v62 = vpop.f32.mrf.mxu0 }
 0x10e   : > { %4268 = vmatprep.mubr.bf16.mxu1 %v6715_v57 }
 0x10f   : > { %v6034_v63 = vpop.f32.mrf.mxu1  ;;  %v5965_v0 = vpop.f32.mrf.mxu0 }
 0x110   : > { %v7161_v1 = vadd.f32 %v6034_v63, %v6033_v61  ;;  %v7163_v2 = vadd.f32 %v5965_v0, %v5964_v62  ;;  %v6731_v63 = vld [vmem:[#allocation3 + $0x218] ss:$36 sps:$4 sm:$0xff]  }
 0x111   : > { %v6036_v4 = vpop.f32.mrf.mxu1  ;;  %v5967_v6 = vpop.f32.mrf.mxu0 }
 0x113   : > { %v6037_v10 = vpop.f32.mrf.mxu1  ;;  %v5968_v11 = vpop.f32.mrf.mxu0  ;;  %6416 = vmatmul.mubr.bf16.vlgmr.msra.gmra.mxu0 %v6716_v3  ;;  %v6728_v3 = vld [vmem:[#allocation3 + $0x330] ss:$36 sps:$4 sm:$0xff]  }
 0x114   : > { %v7165_v12 = vadd.f32 %v6037_v10, %v6036_v4  ;;  %v7167_v13 = vadd.f32 %v5968_v11, %v5967_v6  ;;  %6419 = vmatprep.mubr.bf16.mxu0 %v6717_v8  ;;  %v6732_v4 = vld [vmem:[#allocation3 + $0x260] ss:$36 sps:$4 sm:$0xff]  }
 0x115   : > { %v6055_v14 = vpop.f32.mrf.mxu1  ;;  %4269 = vmatmul.mubr.bf16.gmra.mxu1 %v6713_v7  ;;  %v5970_v15 = vpop.f32.mrf.mxu0  ;;  %v6735_v8 = vld [vmem:[#allocation3 + $0x37c] ss:$36 sps:$4 sm:$0xff]  }
 0x116   : > { %4276 = vmatprep.mubr.bf16.mxu1 %v6720_v9 }
 0x117   : > { %v6056_v16 = vpop.f32.mrf.mxu1  ;;  %v5971_v18 = vpop.f32.mrf.mxu0 }
 0x118   : > { %v6057_v19 = vadd.f32 %v6056_v16, %v6055_v14  ;;  %v7169_v21 = vadd.f32 %v5971_v18, %v5970_v15 }
 0x119   : > { %v6058_v23 = vpop.f32.mrf.mxu1  ;;  %v5973_v32 = vpop.f32.mrf.mxu0 }
 0x11a   : > { %v7172_v26 = vadd.f32 %v6057_v19, %v7135_v55  ;;  %v6726_v55 = vld [vmem:[#allocation3 + $0x188] ss:$36 sps:$4 sm:$0xff]  }
 0x11b   : > { %v6059_v24 = vpop.f32.mrf.mxu1  ;;  %6420 = vmatmul.mubr.bf16.gmra.mxu0 %v6721_v22  ;;  %v5974_v37 = vpop.f32.mrf.mxu0 }
 0x11c   : > { %v6060_v30 = vadd.f32 %v6059_v24, %v6058_v23  ;;  %6423 = vmatprep.mubr.bf16.mxu0 %v6722_v54  ;;  %v7177_v39 = vadd.f32 %v5974_v37, %v5973_v32  ;;  %v6736_v23 = vld [vmem:[#allocation3 + $0x2a8] ss:$36 sps:$4 sm:$0xff]   ;;  %v6733_v54 = vld [vmem:[#allocation3 + $0x378] ss:$36 sps:$4 sm:$0xff]  }
 0x11d   : > { %v6061_v33 = vpop.f32.mrf.mxu1  ;;  %4277 = vmatmul.mubr.bf16.gmra.mxu1 %v6718_v25  ;;  %v5976_v42 = vpop.f32.mrf.mxu0  ;;  %v6740_v32 = vld [vmem:[#allocation3 + $0x3c4] ss:$36 sps:$4 sm:$0xff]  }
 0x11e   : > { %v7175_v35 = vadd.f32 %v6060_v30, %v7137_v5  ;;  %4284 = vmatprep.mubr.bf16.mxu1 %v6725_v27  ;;  %v6737_v27 = vld [vmem:[#allocation3 + $0x2f0] ss:$36 sps:$4 sm:$0xff]  }
 0x11f   : > { %v6062_v40 = vpop.f32.mrf.mxu1  ;;  %v5977_v48 = vpop.f32.mrf.mxu0 }
 0x120   : > { %v6063_v41 = vadd.f32 %v6062_v40, %v6061_v33  ;;  %v7182_v52 = vadd.f32 %v5977_v48, %v5976_v42  ;;  %v6741_v48 = vld [vmem:[#allocation3 + $0x338] ss:$36 sps:$4 sm:$0xff]  }
 0x121   : > { %v6064_v43 = vpop.f32.mrf.mxu1  ;;  %v5979_v28 = vpop.f32.mrf.mxu0 }
 0x122   : > { %v7180_v47 = vadd.f32 %v6063_v41, %v7143_v29 }
 0x123   : > { %v6065_v5 = vpop.f32.mrf.mxu1  ;;  %6424 = vmatmul.mubr.bf16.gmra.mxu0 %v6726_v55  ;;  %v5980_v58 = vpop.f32.mrf.mxu0 }
 0x124   : > { %v6066_v53 = vadd.f32 %v6065_v5, %v6064_v43  ;;  %6427 = vmatprep.mubr.bf16.mxu0 %v6727_v46  ;;  %v7187_v59 = vadd.f32 %v5980_v58, %v5979_v28  ;;  %v6738_v5 = vld [vmem:[#allocation3 + $0x3c0] ss:$36 sps:$4 sm:$0xff]   ;;  %v6745_v58 = vld [vmem:[#allocation3 + $0x40c] ss:$36 sps:$4 sm:$0xff]  }
 0x125   : > { %v6067_v56 = vpop.f32.mrf.mxu1  ;;  %4285 = vmatmul.mubr.bf16.gmra.mxu1 %v6723_v45  ;;  %v5982_v62 = vpop.f32.mrf.mxu0 }
 0x126   : > { %v7185_v57 = vadd.f32 %v6066_v53, %v7147_v34  ;;  %4292 = vmatprep.mubr.bf16.mxu1 %v6730_v51  ;;  %v6742_v53 = vld [vmem:[#allocation3 + $0x380] ss:$36 sps:$4 sm:$0xff]  }
 0x127   : > { %v6068_v29 = vpop.f32.mrf.mxu1  ;;  %v5983_v7 = vpop.f32.mrf.mxu0 }
 0x128   : > { %v6069_v61 = vadd.f32 %v6068_v29, %v6067_v56  ;;  %v7192_v9 = vadd.f32 %v5983_v7, %v5982_v62 }
 0x129   : > { %v6070_v0 = vpop.f32.mrf.mxu1 }
 0x12a   : > { %v7190_v6 = vadd.f32 %v6069_v61, %v7151_v44 }
 0x12b   : > { %v6071_v34 = vpop.f32.mrf.mxu1  ;;  %v5985_v11 = vpop.f32.mrf.mxu0  ;;  %6428 = vmatmul.mubr.bf16.gmra.mxu0 %v6731_v63 }
 0x12c   : > { %v6072_v10 = vadd.f32 %v6071_v34, %v6070_v0  ;;  %6431 = vmatprep.mubr.bf16.mxu0 %v6732_v4  ;;  %v6746_v34 = vld [vmem:[#allocation3 + $0x3c8] ss:$36 sps:$4 sm:$0xff]  }
 0x12d   : > { %v6073_v14 = vpop.f32.mrf.mxu1  ;;  %4293 = vmatmul.mubr.bf16.gmra.mxu1 %v6728_v3  ;;  %v5986_v16 = vpop.f32.mrf.mxu0 }
 0x12e   : > { %v7195_v15 = vadd.f32 %v6072_v10, %v7155_v50  ;;  %4300 = vmatprep.mubr.bf16.mxu1 %v6735_v8  ;;  %v7197_v18 = vadd.f32 %v5986_v16, %v5985_v11  ;;  %v6743_v11 = vld [vmem:[#allocation3 + $0x408] ss:$36 sps:$4 sm:$0xff]  }
 0x12f   : > { %v6074_v44 = vpop.f32.mrf.mxu1  ;;  %v5988_v22 = vpop.f32.mrf.mxu0 }
 0x130   : > { %v6075_v19 = vadd.f32 %v6074_v44, %v6073_v14  ;;  %v6747_v14 = vld [vmem:[#allocation3 + $0x410] ss:$36 sps:$4 sm:$0xff]  }
 0x131   : > { %v6076_v25 = vpop.f32.mrf.mxu1  ;;  %v5989_v30 = vpop.f32.mrf.mxu0 }
 0x132   : > { %v7200_v24 = vadd.f32 %v6075_v19, %v7159_v60  ;;  %v7202_v33 = vadd.f32 %v5989_v30, %v5988_v22  ;;  %v6750_v19 = vld [vmem:[#allocation3 + $0x454] ss:$36 sps:$4 sm:$0xff]  }
 0x133   : > { %v6077_v50 = vpop.f32.mrf.mxu1  ;;  %v5991_v40 = vpop.f32.mrf.mxu0  ;;  %6432 = vmatmul.mubr.bf16.gmra.mxu0 %v6736_v23 }
 0x134   : > { %v6078_v37 = vadd.f32 %v6077_v50, %v6076_v25  ;;  %6435 = vmatprep.mubr.bf16.mxu0 %v6737_v27 }
 0x135   : > { %v6079_v41 = vpop.f32.mrf.mxu1  ;;  %4301 = vmatmul.mubr.bf16.gmra.mxu1 %v6733_v54  ;;  %v5992_v55 = vpop.f32.mrf.mxu0 }
 0x136   : > { %v7205_v42 = vadd.f32 %v6078_v37, %v7163_v2  ;;  %4308 = vmatprep.mubr.bf16.mxu1 %v6740_v32  ;;  %v7207_v43 = vadd.f32 %v5992_v55, %v5991_v40  ;;  %v6751_v40 = vld [vmem:[#allocation3 + $0x458] ss:$36 sps:$4 sm:$0xff]   ;;  %v6748_v55 = vld [vmem:[#allocation3 + $0x450] ss:$36 sps:$4 sm:$0xff]  }
 0x137   : > { %v6080_v60 = vpop.f32.mrf.mxu1  ;;  %v5994_v46 = vpop.f32.mrf.mxu0 }
 0x138   : > { %v6081_v45 = vadd.f32 %v6080_v60, %v6079_v41 }
 0x139   : > { %v6082_v51 = vpop.f32.mrf.mxu1  ;;  %v5995_v56 = vpop.f32.mrf.mxu0 }
 0x13a   : > { %v7210_v28 = vadd.f32 %v6081_v45, %v7167_v13  ;;  %v7212_v29 = vadd.f32 %v5995_v56, %v5994_v46 }
 0x13b   : > { %v6083_v2 = vpop.f32.mrf.mxu1  ;;  %v5997_v62 = vpop.f32.mrf.mxu0  ;;  %6436 = vmatmul.mubr.bf16.gmra.mxu0 %v6741_v48 }
 0x13c   : > { %v6084_v61 = vadd.f32 %v6083_v2, %v6082_v51  ;;  %6439 = vmatprep.mubr.bf16.mxu0 %v6742_v53 }
 0x13d   : > { %v6085_v63 = vpop.f32.mrf.mxu1  ;;  %4309 = vmatmul.mubr.bf16.gmra.mxu1 %v6738_v5  ;;  %v5998_v3 = vpop.f32.mrf.mxu0 }
 0x13e   : > { %v7215_v0 = vadd.f32 %v6084_v61, %v7169_v21  ;;  %4316 = vmatprep.mubr.bf16.mxu1 %v6745_v58  ;;  %v7217_v4 = vadd.f32 %v5998_v3, %v5997_v62 }
 0x13f   : > { %v6086_v13 = vpop.f32.mrf.mxu1  ;;  %v6000_v8 = vpop.f32.mrf.mxu0 }
 0x140   : > { %v6087_v7 = vadd.f32 %v6086_v13, %v6085_v63 }
 0x141   : > { %v6088_v10 = vpop.f32.mrf.mxu1  ;;  %v6001_v44 = vpop.f32.mrf.mxu0 }
 0x142   : > { %v7220_v16 = vadd.f32 %v6087_v7, %v7177_v39  ;;  %v7222_v22 = vadd.f32 %v6001_v44, %v6000_v8 }
 0x143   : > { %v6089_v21 = vpop.f32.mrf.mxu1  ;;  %v6003_v25 = vpop.f32.mrf.mxu0  ;;  %6440 = vmatmul.mubr.bf16.gmra.mxu0 %v6746_v34 }
 0x144   : > { %v6090_v23 = vadd.f32 %v6089_v21, %v6088_v10  ;;  %6443 = vmatprep.mubr.bf16.mxu0 %v6747_v14 }
 0x145   : > { %v6091_v54 = vpop.f32.mrf.mxu1  ;;  %4317 = vmatmul.mubr.bf16.gmra.mxu1 %v6743_v11  ;;  %v6004_v30 = vpop.f32.mrf.mxu0 }
 0x146   : > { %v7225_v27 = vadd.f32 %v6090_v23, %v7182_v52  ;;  %4324 = vmatprep.mubr.bf16.mxu1 %v6750_v19  ;;  %v7227_v32 = vadd.f32 %v6004_v30, %v6003_v25 }
 0x147   : > { %v6092_v39 = vpop.f32.mrf.mxu1  ;;  %v6006_v37 = vpop.f32.mrf.mxu0 }
 0x148   : > { %v6093_v50 = vadd.f32 %v6092_v39, %v6091_v54 }
 0x149   : > { %v6094_v41 = vpop.f32.mrf.mxu1  ;;  %v6007_v45 = vpop.f32.mrf.mxu0 }
 0x14a   : > { %v7230_v60 = vadd.f32 %v6093_v50, %v7187_v59  ;;  %v7232_v46 = vadd.f32 %v6007_v45, %v6006_v37 }
 0x14b   : > { %v6095_v48 = vpop.f32.mrf.mxu1  ;;  %v6009_v52 = vpop.f32.mrf.mxu0  ;;  %6444 = vmatmul.mubr.bf16.gmra.mxu0 %v6751_v40 }
 0x14c   : > { %v6096_v51 = vadd.f32 %v6095_v48, %v6094_v41 }
 0x14d   : > { %v6097_v5 = vpop.f32.mrf.mxu1  ;;  %4325 = vmatmul.mubr.bf16.gmra.mxu1 %v6748_v55  ;;  %v6010_v56 = vpop.f32.mrf.mxu0 }
 0x14e   : > { %v7235_v53 = vadd.f32 %v6096_v51, %v7192_v9  ;;  %v7237_v58 = vadd.f32 %v6010_v56, %v6009_v52 }
 0x14f   : > { %v6098_v2 = vpop.f32.mrf.mxu1  ;;  %v6012_v62 = vpop.f32.mrf.mxu0 }
 0x150   : > { %v6099_v61 = vadd.f32 %v6098_v2, %v6097_v5 }
 0x151   : > { %v6100_v59 = vpop.f32.mrf.mxu1  ;;  %v6013_v3 = vpop.f32.mrf.mxu0 }
 0x152   : > { %v7240_v63 = vadd.f32 %v6099_v61, %v7197_v18  ;;  %v7242_v13 = vadd.f32 %v6013_v3, %v6012_v62 }
 0x153   : > { %v6101_v7 = vpop.f32.mrf.mxu1  ;;  %v6167_v34 = vpop.f32.mrf.mxu0 }
 0x154   : > { %v6102_v8 = vadd.f32 %v6101_v7, %v6100_v59 }
 0x155   : > { %v6103_v10 = vpop.f32.mrf.mxu1  ;;  %v6168_v11 = vpop.f32.mrf.mxu0 }
 0x156   : > { %v7245_v9 = vadd.f32 %v6102_v8, %v7202_v33  ;;  %v6169_v14 = vadd.f32 %v6168_v11, %v6167_v34 }
 0x157   : > { %v6104_v44 = vpop.f32.mrf.mxu1  ;;  %v6170_v21 = vpop.f32.mrf.mxu0 }
 0x158   : > { %v6105_v19 = vadd.f32 %v6104_v44, %v6103_v10  ;;  %v7248_v23 = vadd.f32 %v6169_v14, %v7172_v26 }
 0x159   : > { %v6106_v18 = vpop.f32.mrf.mxu1  ;;  %v6171_v54 = vpop.f32.mrf.mxu0 }
 0x15a   : > { %v7251_v25 = vadd.f32 %v6105_v19, %v7207_v43  ;;  %v6172_v30 = vadd.f32 %v6171_v54, %v6170_v21 }
 0x15b   : > { %v6107_v39 = vpop.f32.mrf.mxu1  ;;  %v6173_v37 = vpop.f32.mrf.mxu0 }
 0x15c   : > { %v6108_v50 = vadd.f32 %v6107_v39, %v6106_v18  ;;  %v7254_v33 = vadd.f32 %v6172_v30, %v7175_v35 }
 0x15d   : > { %v6109_v40 = vpop.f32.mrf.mxu1  ;;  %v6174_v55 = vpop.f32.mrf.mxu0 }
 0x15e   : > { %v7257_v41 = vadd.f32 %v6108_v50, %v7212_v29  ;;  %v6175_v45 = vadd.f32 %v6174_v55, %v6173_v37 }
 0x15f   : > { %v6110_v26 = vpop.f32.mrf.mxu1  ;;  %v6176_v51 = vpop.f32.mrf.mxu0 }
 0x160   : > { %v6111_v48 = vadd.f32 %v6110_v26, %v6109_v40  ;;  %v7260_v43 = vadd.f32 %v6175_v45, %v7180_v47 }
 0x161   : > { %v6112_v52 = vpop.f32.mrf.mxu1  ;;  %v6177_v56 = vpop.f32.mrf.mxu0 }
 0x162   : > { %v7263_v5 = vadd.f32 %v6111_v48, %v7217_v4  ;;  %v6178_v2 = vadd.f32 %v6177_v56, %v6176_v51 }
 0x163   : > { %v6113_v35 = vpop.f32.mrf.mxu1  ;;  %v6179_v62 = vpop.f32.mrf.mxu0 }
 0x164   : > { %v6114_v61 = vadd.f32 %v6113_v35, %v6112_v52  ;;  %v7266_v29 = vadd.f32 %v6178_v2, %v7185_v57 }
 0x165   : > { %v6115_v59 = vpop.f32.mrf.mxu1  ;;  %v6180_v7 = vpop.f32.mrf.mxu0 }
 0x166   : > { %v7269_v3 = vadd.f32 %v6114_v61, %v7222_v22  ;;  %v6181_v8 = vadd.f32 %v6180_v7, %v6179_v62 }
 0x167   : > { %v6116_v47 = vpop.f32.mrf.mxu1  ;;  %v6182_v10 = vpop.f32.mrf.mxu0 }
 0x168   : > { %v6117_v34 = vadd.f32 %v6116_v47, %v6115_v59  ;;  %v7272_v4 = vadd.f32 %v6181_v8, %v7190_v6 }
 0x169   : > { %v6118_v11 = vpop.f32.mrf.mxu1  ;;  %v6183_v44 = vpop.f32.mrf.mxu0 }
 0x16a   : > { %v7275_v14 = vadd.f32 %v6117_v34, %v7227_v32  ;;  %v6184_v19 = vadd.f32 %v6183_v44, %v6182_v10 }
 0x16b   : > { %v6119_v57 = vpop.f32.mrf.mxu1  ;;  %v6185_v18 = vpop.f32.mrf.mxu0 }
 0x16c   : > { %v6120_v21 = vadd.f32 %v6119_v57, %v6118_v11  ;;  %v7278_v22 = vadd.f32 %v6184_v19, %v7195_v15 }
 0x16d   : > { %v6121_v54 = vpop.f32.mrf.mxu1  ;;  %v6186_v39 = vpop.f32.mrf.mxu0 }
 0x16e   : > { %v7281_v30 = vadd.f32 %v6120_v21, %v7232_v46  ;;  %v6187_v50 = vadd.f32 %v6186_v39, %v6185_v18 }
 0x16f   : > { %v6122_v6 = vpop.f32.mrf.mxu1  ;;  %v6188_v40 = vpop.f32.mrf.mxu0 }
 0x170   : > { %v6123_v37 = vadd.f32 %v6122_v6, %v6121_v54  ;;  %v7284_v32 = vadd.f32 %v6187_v50, %v7200_v24 }
 0x171   : > { %v6124_v55 = vpop.f32.mrf.mxu1  ;;  %v6189_v26 = vpop.f32.mrf.mxu0 }
 0x172   : > { %v7287_v45 = vadd.f32 %v6123_v37, %v7237_v58  ;;  %v6190_v48 = vadd.f32 %v6189_v26, %v6188_v40 }
 0x173   : > { %v6125_v15 = vpop.f32.mrf.mxu1  ;;  %v6191_v52 = vpop.f32.mrf.mxu0 }
 0x174   : > { %v6126_v51 = vadd.f32 %v6125_v15, %v6124_v55  ;;  %v7290_v46 = vadd.f32 %v6190_v48, %v7205_v42 }
 0x175   : > { %v6127_v56 = vpop.f32.mrf.mxu1  ;;  %v6192_v35 = vpop.f32.mrf.mxu0 }
 0x176   : > { %v7293_v2 = vadd.f32 %v6126_v51, %v7242_v13  ;;  %v6193_v61 = vadd.f32 %v6192_v35, %v6191_v52 }
 0x177   : > { %v6128_v24 = vpop.f32.mrf.mxu1  ;;  %v6194_v59 = vpop.f32.mrf.mxu0 }
 0x178   : > { %v6129_v62 = vadd.f32 %v6128_v24, %v6127_v56  ;;  %v7296_v58 = vadd.f32 %v6193_v61, %v7210_v28 }
 0x179   : > { %v6130_v7 = vpop.f32.mrf.mxu1  ;;  %v6195_v47 = vpop.f32.mrf.mxu0 }
 0x17a   : > { %v7299_v8 = vadd.f32 %v6129_v62, %v7139_v17  ;;  %v6196_v34 = vadd.f32 %v6195_v47, %v6194_v59 }
 0x17b   : > { %v6131_v42 = vpop.f32.mrf.mxu1  ;;  %v6197_v11 = vpop.f32.mrf.mxu0 }
 0x17c   : > { %v6132_v10 = vadd.f32 %v6131_v42, %v6130_v7  ;;  %v7302_v13 = vadd.f32 %v6196_v34, %v7215_v0 }
 0x17d   : > { %v6133_v44 = vpop.f32.mrf.mxu1  ;;  %v6198_v57 = vpop.f32.mrf.mxu0 }
 0x17e   : > { %v7305_v19 = vadd.f32 %v6132_v10, %v7141_v20  ;;  %v6199_v21 = vadd.f32 %v6198_v57, %v6197_v11 }
 0x17f   : > { %v6134_v28 = vpop.f32.mrf.mxu1  ;;  %v6200_v54 = vpop.f32.mrf.mxu0 }
 0x180   : > { %v6135_v18 = vadd.f32 %v6134_v28, %v6133_v44  ;;  %v7308_v17 = vadd.f32 %v6199_v21, %v7220_v16 }
 0x181   : > { %v6136_v39 = vpop.f32.mrf.mxu1  ;;  %v6201_v6 = vpop.f32.mrf.mxu0 }
 0x182   : > { %v7311_v50 = vadd.f32 %v6135_v18, %v7145_v31  ;;  %v6202_v37 = vadd.f32 %v6201_v6, %v6200_v54 }
 0x183   : > { %v6137_v0 = vpop.f32.mrf.mxu1  ;;  %v6203_v55 = vpop.f32.mrf.mxu0 }
 0x184   : > { %v6138_v40 = vadd.f32 %v6137_v0, %v6136_v39  ;;  %v7314_v20 = vadd.f32 %v6202_v37, %v7225_v27 }
 0x185   : > { %v6139_v26 = vpop.f32.mrf.mxu1  ;;  %v6204_v15 = vpop.f32.mrf.mxu0 }
 0x186   : > { %v7317_v48 = vadd.f32 %v6138_v40, %v7149_v38  ;;  %v6205_v51 = vadd.f32 %v6204_v15, %v6203_v55 }
 0x187   : > { %v6140_v16 = vpop.f32.mrf.mxu1  ;;  %v6206_v56 = vpop.f32.mrf.mxu0 }
 0x188   : > { %v6141_v52 = vadd.f32 %v6140_v16, %v6139_v26  ;;  %v7320_v31 = vadd.f32 %v6205_v51, %v7230_v60 }
 0x189   : > { %v6142_v35 = vpop.f32.mrf.mxu1  ;;  %v6207_v24 = vpop.f32.mrf.mxu0 }
 0x18a   : > { %v7323_v61 = vadd.f32 %v6141_v52, %v7153_v49  ;;  %v6208_v62 = vadd.f32 %v6207_v24, %v6206_v56 }
 0x18b   : > { %v6143_v27 = vpop.f32.mrf.mxu1  ;;  %v6209_v7 = vpop.f32.mrf.mxu0 }
 0x18c   : > { %v6144_v59 = vadd.f32 %v6143_v27, %v6142_v35  ;;  %v7326_v38 = vadd.f32 %v6208_v62, %v7235_v53 }
 0x18d   : > { %v6145_v47 = vpop.f32.mrf.mxu1  ;;  %v6210_v42 = vpop.f32.mrf.mxu0 }
 0x18e   : > { %v7329_v34 = vadd.f32 %v6144_v59, %v7157_v36  ;;  %v6211_v10 = vadd.f32 %v6210_v42, %v6209_v7 }
 0x18f   : > { %v6146_v60 = vpop.f32.mrf.mxu1  ;;  %v6212_v44 = vpop.f32.mrf.mxu0 }
 0x190   : > { %v6147_v11 = vadd.f32 %v6146_v60, %v6145_v47  ;;  %v7332_v49 = vadd.f32 %v6211_v10, %v7240_v63 }
 0x191   : > { %v6148_v57 = vpop.f32.mrf.mxu1  ;;  %v6213_v28 = vpop.f32.mrf.mxu0 }
 0x192   : > { %v7335_v21 = vadd.f32 %v6147_v11, %v7161_v1  ;;  %v6214_v18 = vadd.f32 %v6213_v28, %v6212_v44 }
 0x193   : > { %v6149_v53 = vpop.f32.mrf.mxu1  ;;  %v6215_v39 = vpop.f32.mrf.mxu0 }
 0x194   : > { %v6150_v54 = vadd.f32 %v6149_v53, %v6148_v57  ;;  %v7338_v36 = vadd.f32 %v6214_v18, %v7245_v9 }
 0x195   : > { %v6279_v6 = vpop.f32.mrf.mxu1  ;;  %v6216_v0 = vpop.f32.mrf.mxu0 }
 0x196   : > { %v7341_v37 = vadd.f32 %v6150_v54, %v7165_v12  ;;  %v6217_v40 = vadd.f32 %v6216_v0, %v6215_v39 }
 0x197   : > { %v6280_v63 = vpop.f32.mrf.mxu1  ;;  %v6218_v26 = vpop.f32.mrf.mxu0 }
 0x198   : > { %v6281_v55 = vadd.f32 %v6280_v63, %v6279_v6  ;;  %v7344_v1 = vadd.f32 %v6217_v40, %v7251_v25 }
 0x199   : > { %v7346_v15 = vpop.f32.mrf.mxu1  ;;  %v6219_v51 = vpop.f32.mrf.mxu0 }
 0x19a   : > { %v7349_v16 = vadd.f32 %v6281_v55, %v7248_v23  ;;  %v6220_v9 = vadd.f32 %v6219_v51, %v6218_v26 }
 0x19b   : > { %v7351_v52 = vpop.f32.mrf.mxu1  ;;  %v6221_v56 = vpop.f32.mrf.mxu0 }
 0x19c   : > { %v7354_v12 = vadd.f32 %v6220_v9, %v7257_v41 }
 0x19d   : > { %v7356_v35 = vpop.f32.mrf.mxu1  ;;  %v6222_v24 = vpop.f32.mrf.mxu0 }
 0x19e   : > { %v6223_v62 = vadd.f32 %v6222_v24, %v6221_v56 }
 0x19f   : > { %v7358_v27 = vpop.f32.mrf.mxu1  ;;  %v6224_v25 = vpop.f32.mrf.mxu0 }
 0x1a0   : > { %v7361_v59 = vadd.f32 %v6223_v62, %v7263_v5 }
 0x1a1   : > { %v7363_v7 = vpop.f32.mrf.mxu1  ;;  %v6225_v23 = vpop.f32.mrf.mxu0 }
 0x1a2   : > { %v6226_v47 = vadd.f32 %v6225_v23, %v6224_v25 }
 0x1a3   : > { %v7365_v42 = vpop.f32.mrf.mxu1  ;;  %v6227_v10 = vpop.f32.mrf.mxu0 }
 0x1a4   : > { %v7368_v41 = vadd.f32 %v6226_v47, %v7269_v3 }
 0x1a5   : > { %v7370_v60 = vpop.f32.mrf.mxu1  ;;  %v6228_v11 = vpop.f32.mrf.mxu0 }
 0x1a6   : > { %v6229_v44 = vadd.f32 %v6228_v11, %v6227_v10 }
 0x1a7   : > { %v7372_v57 = vpop.f32.mrf.mxu1  ;;  %v6230_v28 = vpop.f32.mrf.mxu0 }
 0x1a8   : > { %v7375_v5 = vadd.f32 %v6229_v44, %v7275_v14 }
 0x1a9   : > { %v7377_v18 = vpop.f32.mrf.mxu1  ;;  %v6231_v53 = vpop.f32.mrf.mxu0 }
 0x1aa   : > { %v6232_v54 = vadd.f32 %v6231_v53, %v6230_v28 }
 0x1ab   : > { %v7379_v39 = vpop.f32.mrf.mxu1  ;;  %v6233_v6 = vpop.f32.mrf.mxu0 }
 0x1ac   : > { %v7382_v3 = vadd.f32 %v6232_v54, %v7281_v30 }
 0x1ad   : > { %v7384_v0 = vpop.f32.mrf.mxu1  ;;  %v6234_v40 = vpop.f32.mrf.mxu0 }
 0x1ae   : > { %7587 = vst [vmem:[#allocation4_spill] sm:$0xff] %v7382_v3  ;;  %v6235_v63 = vadd.f32 %v6234_v40, %v6233_v6 }
 0x1af   : > { %v7386_v55 = vpop.f32.mrf.mxu1  ;;  %v6236_v26 = vpop.f32.mrf.mxu0 }
 0x1b0   : > { %v7389_v14 = vadd.f32 %v6235_v63, %v7287_v45 }
 0x1b1   : > { %v7391_v51 = vpop.f32.mrf.mxu1  ;;  %v6237_v9 = vpop.f32.mrf.mxu0 }
 0x1b2   : > { %v6238_v56 = vadd.f32 %v6237_v9, %v6236_v26 }
 0x1b3   : > { %v7393_v24 = vpop.f32.mrf.mxu1  ;;  %v6239_v62 = vpop.f32.mrf.mxu0 }
 0x1b4   : > { %v7396_v30 = vadd.f32 %v6238_v56, %v7293_v2 }
 0x1b5   : > { %v7398_v25 = vpop.f32.mrf.mxu1  ;;  %v6240_v23 = vpop.f32.mrf.mxu0 }
 0x1b6   : > { %7588 = vst [vmem:[#allocation5_spill] sm:$0xff] %v7396_v30  ;;  %v6241_v47 = vadd.f32 %v6240_v23, %v6239_v62 }
 0x1b7   : > { %v7400_v10 = vpop.f32.mrf.mxu1  ;;  %v6242_v11 = vpop.f32.mrf.mxu0 }
 0x1b8   : > { %v7403_v45 = vadd.f32 %v6241_v47, %v7299_v8 }
 0x1b9   : > { %v7405_v44 = vpop.f32.mrf.mxu1  ;;  %v6243_v28 = vpop.f32.mrf.mxu0 }
 0x1ba   : > { %7589 = vst [vmem:[#allocation6_spill] sm:$0xff] %v7403_v45  ;;  %v6244_v53 = vadd.f32 %v6243_v28, %v6242_v11 }
 0x1bb   : > { %v7407_v54 = vpop.f32.mrf.mxu1  ;;  %v6245_v6 = vpop.f32.mrf.mxu0 }
 0x1bc   : > { %v7410_v2 = vadd.f32 %v6244_v53, %v7305_v19 }
 0x1bd   : > { %v7412_v40 = vpop.f32.mrf.mxu1  ;;  %v6246_v63 = vpop.f32.mrf.mxu0 }
 0x1be   : > { %7590 = vst [vmem:[#allocation7_spill] sm:$0xff] %v7410_v2  ;;  %v6247_v26 = vadd.f32 %v6246_v63, %v6245_v6 }
 0x1bf   : > { %v7414_v9 = vpop.f32.mrf.mxu1  ;;  %v6248_v56 = vpop.f32.mrf.mxu0 }
 0x1c0   : > { %v7417_v8 = vadd.f32 %v6247_v26, %v7311_v50 }
 0x1c1   : > { %v7419_v62 = vpop.f32.mrf.mxu1  ;;  %v6249_v23 = vpop.f32.mrf.mxu0 }
 0x1c2   : > { %7591 = vst [vmem:[#allocation8_spill] sm:$0xff] %v7417_v8  ;;  %v6250_v47 = vadd.f32 %v6249_v23, %v6248_v56 }
 0x1c3   : > { %v7421_v11 = vpop.f32.mrf.mxu1  ;;  %v6251_v28 = vpop.f32.mrf.mxu0 }
 0x1c4   : > { %v7424_v19 = vadd.f32 %v6250_v47, %v7317_v48 }
 0x1c5   : > { %v7426_v53 = vpop.f32.mrf.mxu1  ;;  %v6252_v6 = vpop.f32.mrf.mxu0 }
 0x1c6   : > { %7592 = vst [vmem:[#allocation9_spill] sm:$0xff] %v7424_v19  ;;  %v6253_v63 = vadd.f32 %v6252_v6, %v6251_v28 }
 0x1c7   : > { %v7428_v2 = vpop.f32.mrf.mxu1  ;;  %v6254_v45 = vpop.f32.mrf.mxu0 }
 0x1c8   : > { %v7431_v50 = vadd.f32 %v6253_v63, %v7323_v61 }
 0x1c9   : > { %v7433_v26 = vpop.f32.mrf.mxu1  ;;  %v6255_v8 = vpop.f32.mrf.mxu0 }
 0x1ca   : > { %7593 = vst [vmem:[#allocation10_spill] sm:$0xff] %v7431_v50  ;;  %v6256_v56 = vadd.f32 %v6255_v8, %v6254_v45  ;;  %v6287_v8 = vadd.f32 %v7358_v27, %v7356_v35 }
 0x1cb   : > { %v7435_v23 = vpop.f32.mrf.mxu1  ;;  %v6257_v3 = vpop.f32.mrf.mxu0 }
 0x1cc   : > { %v7439_v48 = vadd.f32 %v6256_v56, %v7329_v34  ;;  %v6290_v34 = vadd.f32 %v7365_v42, %v7363_v7  ;;  %v4215_v30 = vadd.f32 %v6287_v8, %v7260_v43 }
 0x1cd   : > { %v7441_v47 = vpop.f32.mrf.mxu1  ;;  %v6258_v28 = vpop.f32.mrf.mxu0 }
 0x1ce   : > { %7594 = vst [vmem:[#allocation11_spill] sm:$0xff] %v7439_v48  ;;  %v6259_v6 = vadd.f32 %v6258_v28, %v6257_v3  ;;  %v6284_v28 = vadd.f32 %v7351_v52, %v7346_v15  ;;  %v4218_v27 = vadd.f32 %v6290_v34, %v7266_v29  ;;  %v6299_v52 = vadd.f32 %v7386_v55, %v7384_v0 }
 0x1cf   : > { %v7443_v19 = vpop.f32.mrf.mxu1  ;;  %v6260_v61 = vpop.f32.mrf.mxu0  ;;  %v6302_v29 = vadd.f32 %v7393_v24, %v7391_v51 }
 0x1d0   : > { %v7446_v63 = vadd.f32 %v6259_v6, %v7335_v21  ;;  %v4210_v15 = vadd.f32 %v6284_v28, %v7254_v33 }
 0x1d1   : > { %v7448_v50 = vpop.f32.mrf.mxu1  ;;  %v6261_v45 = vpop.f32.mrf.mxu0 }
 0x1d2   : > { %7595 = vst [vmem:[#allocation12_spill] sm:$0xff] %v7446_v63  ;;  %v6262_v56 = vadd.f32 %v6261_v45, %v6260_v61 }
 0x1d3   : > { %v7454_v48 = vpop.f32.mrf.mxu1  ;;  %v6417_v3 = vpop.f32.mrf.mxu0 }
 0x1d4   : > { %v7459_v21 = vadd.f32 %v6262_v56, %v7341_v37  ;;  %v4376_v42 = vadd.f32 %v6417_v3, %v4215_v30  ;;  %v6293_v37 = vadd.f32 %v7372_v57, %v7370_v60  ;;  %v6296_v60 = vadd.f32 %v7379_v39, %v7377_v18 }
 0x1d5   : > { %v7461_v6 = vpop.f32.mrf.mxu1  ;;  %v4367_v63 = vpop.f32.mrf.mxu0  ;;  %v4231_v3 = vadd.f32 %v6299_v52, %v7284_v32  ;;  %v6305_v18 = vadd.f32 %v7400_v10, %v7398_v25  ;;  %v6311_v39 = vadd.f32 %v7414_v9, %v7412_v40 }
 0x1d6   : > { %v4368_v30 = vadd.f32 %v4367_v63, %v7349_v16  ;;  %v4223_v16 = vadd.f32 %v6293_v37, %v7272_v4  ;;  %v4226_v32 = vadd.f32 %v6296_v60, %v7278_v22  ;;  %v6308_v60 = vadd.f32 %v7407_v54, %v7405_v44 }
 0x1d7   : > { %v7464_v35 = vpop.f32.mrf.mxu1  ;;  %v6418_v7 = vpop.f32.mrf.mxu0  ;;  %v6317_v54 = vadd.f32 %v7428_v2, %v7426_v53 }
 0x1d8   : > { %v4379_v61 = vadd.f32 %v6418_v7, %v4218_v27  ;;  %v4234_v27 = vadd.f32 %v6302_v29, %v7290_v46  ;;  %v6314_v46 = vadd.f32 %v7421_v11, %v7419_v62 }
 0x1d9   : > { %v7467_v45 = vpop.f32.mrf.mxu1  ;;  %v4370_v43 = vpop.f32.mrf.mxu0 }
 0x1da   : > { %v4495_v33 = vpack.c.bf16 %v4379_v61, %v4376_v42  ;;  %v4371_v8 = vadd.f32 %v4370_v43, %v4210_v15  ;;  %v4250_v44 = vadd.f32 %v6314_v46, %v7314_v20  ;;  %v6326_v20 = vadd.f32 %v7454_v48, %v7448_v50 }
 0x1db   : > { %v7482_v34 = vpop.f32.mrf.mxu1  ;;  %v6421_v57 = vpop.f32.mrf.mxu0 }
 0x1dc   : > { %5912 = vst [vmem:[%s7477_s30 + $0x8] sm:$0xff] %v4495_v33   ;;  %v4494_v0 = vpack.c.bf16 %v4371_v8, %v4368_v30  ;;  %v4656_v56 = vunpack.c.l.bf16 %v4495_v33  ;;  %v4392_v7 = vadd.f32 %v6421_v57, %v4231_v3  ;;  %v4657_v37 = vunpack.c.h.bf16 %v4495_v33 }
 0x1dd   : > { %v7487_v55 = vpop.f32.mrf.mxu1  ;;  %v4383_v28 = vpop.f32.mrf.mxu0  ;;  %v4239_v33 = vadd.f32 %v6305_v18, %v7296_v58 }
 0x1de   : > { %5821 = vst [vmem:[%s7477_s30] sm:$0xff] %v4494_v0   ;;  %v4654_v51 = vunpack.c.l.bf16 %v4494_v0  ;;  %v4655_v24 = vunpack.c.h.bf16 %v4494_v0  ;;  %v4725_v29 = vmul.f32 %v4656_v56, %v4656_v56  ;;  %v4384_v25 = vadd.f32 %v4383_v28, %v4223_v16 }
 0x1df   : > { %v7492_v63 = vpop.f32.mrf.mxu1  ;;  %v6422_v42 = vpop.f32.mrf.mxu0  ;;  %v4726_v62 = vmul.f32 %v4657_v37, %v4657_v37  ;;  %v4247_v16 = vadd.f32 %v6311_v39, %v7308_v17  ;;  %v6323_v17 = vadd.f32 %v7443_v19, %v7441_v47 }
 0x1e0   : > { %v4686_v61 = vadd.f32 %v4655_v24, %v4654_v51  ;;  %v4723_v15 = vmul.f32 %v4654_v51, %v4654_v51  ;;  %v4724_v52 = vmul.f32 %v4655_v24, %v4655_v24  ;;  %v4395_v43 = vadd.f32 %v6422_v42, %v4234_v27 }
 0x1e1   : > { %v7500_v4 = vpop.f32.mrf.mxu1  ;;  %v4386_v10 = vpop.f32.mrf.mxu0 }
 0x1e2   : > { %v4687_v40 = vadd.f32 %v4686_v61, %v4656_v56  ;;  %v4755_v9 = vadd.f32 %v4724_v52, %v4723_v15  ;;  %v4497_v30 = vpack.c.bf16 %v4395_v43, %v4392_v7  ;;  %v4387_v8 = vadd.f32 %v4386_v10, %v4226_v32 }
 0x1e3   : > { %v7504_v22 = vpop.f32.mrf.mxu1  ;;  %v6425_v57 = vpop.f32.mrf.mxu0  ;;  %v4242_v61 = vadd.f32 %v6308_v60, %v7302_v13  ;;  %v6320_v10 = vadd.f32 %v7435_v23, %v7433_v26  ;;  %v4255_v60 = vadd.f32 %v6317_v54, %v7320_v31  ;;  %v4266_v26 = vadd.f32 %v6326_v20, %v7338_v36 }
 0x1e4   : > { %v4756_v0 = vadd.f32 %v4755_v9, %v4725_v29  ;;  %5914 = vst [vmem:[%s7477_s30 + $0x18] sm:$0xff] %v4497_v30   ;;  %v4496_v3 = vpack.c.bf16 %v4387_v8, %v4384_v25  ;;  %v4688_v11 = vadd.f32 %v4687_v40, %v4657_v37  ;;  %v4660_v7 = vunpack.c.l.bf16 %v4497_v30 }
 0x1e5   : > { %v7509_v51 = vpop.f32.mrf.mxu1  ;;  %v4399_v28 = vpop.f32.mrf.mxu0  ;;  %v4408_v18 = vadd.f32 %v6425_v57, %v4247_v16  ;;  %v4661_v39 = vunpack.c.h.bf16 %v4497_v30  ;;  %v4263_v30 = vadd.f32 %v6323_v17, %v7332_v49  ;;  %v6329_v23 = vadd.f32 %v7464_v35, %v7461_v6 }
 0x1e6   : > { %5913 = vst [vmem:[%s7477_s30 + $0x10] sm:$0xff] %v4496_v3   ;;  %v4658_v56 = vunpack.c.l.bf16 %v4496_v3  ;;  %v4659_v24 = vunpack.c.h.bf16 %v4496_v3  ;;  %v4757_v42 = vadd.f32 %v4756_v0, %v4726_v62  ;;  %v4400_v40 = vadd.f32 %v4399_v28, %v4239_v33 }
 0x1e7   : > { %v7514_v27 = vpop.f32.mrf.mxu1  ;;  %v6426_v32 = vpop.f32.mrf.mxu0  ;;  %v4729_v19 = vmul.f32 %v4660_v7, %v4660_v7  ;;  %v4730_v0 = vmul.f32 %v4661_v39, %v4661_v39  ;;  %v6332_v49 = vadd.f32 %v7482_v34, %v7467_v45  ;;  %v6335_v36 = vadd.f32 %v7492_v63, %v7487_v55 }
 0x1e8   : > { %v4689_v15 = vadd.f32 %v4688_v11, %v4658_v56  ;;  %v4727_v58 = vmul.f32 %v4658_v56, %v4658_v56  ;;  %v4411_v52 = vadd.f32 %v6426_v32, %v4250_v44  ;;  %v4728_v2 = vmul.f32 %v4659_v24, %v4659_v24 }
 0x1e9   : > { %v7520_v43 = vpop.f32.mrf.mxu1  ;;  %v4402_v53 = vpop.f32.mrf.mxu0  ;;  %v6338_v32 = vadd.f32 %v7504_v22, %v7500_v4  ;;  %v4271_v63 = vadd.f32 %v6329_v23, %v7344_v1  ;;  %v4274_v4 = vadd.f32 %v6332_v49, %v7354_v12  ;;  %v6341_v22 = vadd.f32 %v7514_v27, %v7509_v51 }
 0x1ea   : > { %v4690_v46 = vadd.f32 %v4689_v15, %v4659_v24  ;;  %v4758_v37 = vadd.f32 %v4757_v42, %v4727_v58  ;;  %v4499_v29 = vpack.c.bf16 %v4411_v52, %v4408_v18  ;;  %v4403_v13 = vadd.f32 %v4402_v53, %v4242_v61 }
 0x1eb   : > { %v7526_v25 = vpop.f32.mrf.mxu1  ;;  %v6429_v9 = vpop.f32.mrf.mxu0  ;;  %v4258_v24 = vadd.f32 %v6320_v10, %v7326_v38  ;;  %v4282_v10 = vadd.f32 %v6338_v32, %v7368_v41 }
 0x1ec   : > { %v4691_v47 = vadd.f32 %v4690_v46, %v4660_v7  ;;  %v4759_v8 = vadd.f32 %v4758_v37, %v4728_v2  ;;  %5916 = vst [vmem:[%s7477_s30 + $0x28] sm:$0xff] %v4499_v29   ;;  %v4498_v48 = vpack.c.bf16 %v4403_v13, %v4400_v40  ;;  %v4424_v16 = vadd.f32 %v6429_v9, %v4263_v30 }
 0x1ed   : > { %v6345_v50 = vpop.f32.mrf.mxu1  ;;  %v4415_v57 = vpop.f32.mrf.mxu0  ;;  %v4664_v7 = vunpack.c.l.bf16 %v4499_v29  ;;  %v4665_v45 = vunpack.c.h.bf16 %v4499_v29  ;;  %v4279_v29 = vadd.f32 %v6335_v36, %v7361_v59 }
 0x1ee   : > { %v4760_v3 = vadd.f32 %v4759_v8, %v4729_v19  ;;  %v4692_v62 = vadd.f32 %v4691_v47, %v4661_v39  ;;  %5915 = vst [vmem:[%s7477_s30 + $0x20] sm:$0xff] %v4498_v48   ;;  %v4662_v33 = vunpack.c.l.bf16 %v4498_v48  ;;  %v4663_v28 = vunpack.c.h.bf16 %v4498_v48 }
 0x1ef   : > { %v6346_v11 = vpop.f32.mrf.mxu1  ;;  %v6430_v56 = vpop.f32.mrf.mxu0  ;;  %v4416_v61 = vadd.f32 %v4415_v57, %v4255_v60  ;;  %v4733_v39 = vmul.f32 %v4664_v7, %v4664_v7  ;;  %v4734_v40 = vmul.f32 %v4665_v45, %v4665_v45  ;;  %v6344_v8 = vadd.f32 %v7526_v25, %v7520_v43 }
 0x1f0   : > { %v4761_v31 = vadd.f32 %v4760_v3, %v4730_v0  ;;  %v4427_v44 = vadd.f32 %v6430_v56, %v4266_v26  ;;  %v4693_v42 = vadd.f32 %v4692_v62, %v4662_v33  ;;  %v4731_v6 = vmul.f32 %v4662_v33, %v4662_v33 }
 0x1f1   : > { %v6348_v54 = vpop.f32.mrf.mxu1  ;;  %v4418_v35 = vpop.f32.mrf.mxu0  ;;  %v4732_v18 = vmul.f32 %v4663_v28, %v4663_v28  ;;  %v6347_v51 = vadd.f32 %v6346_v11, %v6345_v50 }
 0x1f2   : > { %v4501_v38 = vpack.c.bf16 %v4427_v44, %v4424_v16  ;;  %v4419_v15 = vadd.f32 %v4418_v35, %v4258_v24  ;;  %v4694_v34 = vadd.f32 %v4693_v42, %v4663_v28  ;;  %v4762_v52 = vadd.f32 %v4761_v31, %v4731_v6  ;;  %v7596_v42 = vld [vmem:[#allocation5_spill] sm:$0xff]  ;;  %v7597_v35 = vld [vmem:[#allocation4_spill] sm:$0xff] }
 0x1f3   : > { %v6349_v58 = vpop.f32.mrf.mxu1  ;;  %v6433_v17 = vpop.f32.mrf.mxu0  ;;  %v4287_v16 = vadd.f32 %v6341_v22, %v7375_v5  ;;  %v4295_v36 = vadd.f32 %v6347_v51, %v7389_v14  ;;  %v4290_v32 = vadd.f32 %v6344_v8, %v7597_v35 }
 0x1f4   : > { %5918 = vst [vmem:[%s7477_s30 + $0x38] sm:$0xff] %v4501_v38   ;;  %v4500_v20 = vpack.c.bf16 %v4419_v15, %v4416_v61  ;;  %v4695_v2 = vadd.f32 %v4694_v34, %v4664_v7  ;;  %v4763_v53 = vadd.f32 %v4762_v52, %v4732_v18  ;;  %v4440_v12 = vadd.f32 %v6433_v17, %v4279_v29 }
 0x1f5   : > { %v6351_v55 = vpop.f32.mrf.mxu1  ;;  %v4431_v46 = vpop.f32.mrf.mxu0  ;;  %v4668_v27 = vunpack.c.l.bf16 %v4501_v38  ;;  %v6350_v3 = vadd.f32 %v6349_v58, %v6348_v54  ;;  %v4669_v33 = vunpack.c.h.bf16 %v4501_v38 }
 0x1f6   : > { %5917 = vst [vmem:[%s7477_s30 + $0x30] sm:$0xff] %v4500_v20   ;;  %v4666_v37 = vunpack.c.l.bf16 %v4500_v20  ;;  %v4764_v9 = vadd.f32 %v4763_v53, %v4733_v39  ;;  %v4667_v19 = vunpack.c.h.bf16 %v4500_v20  ;;  %v4696_v1 = vadd.f32 %v4695_v2, %v4665_v45 }
 0x1f7   : > { %v6352_v13 = vpop.f32.mrf.mxu1  ;;  %v6434_v47 = vpop.f32.mrf.mxu0  ;;  %v4432_v41 = vadd.f32 %v4431_v46, %v4271_v63  ;;  %v4737_v31 = vmul.f32 %v4668_v27, %v4668_v27  ;;  %v4298_v6 = vadd.f32 %v6350_v3, %v7596_v42  ;;  %v4738_v61 = vmul.f32 %v4669_v33, %v4669_v33 }
 0x1f8   : > { %v4735_v48 = vmul.f32 %v4666_v37, %v4666_v37  ;;  %v4443_v30 = vadd.f32 %v6434_v47, %v4282_v10  ;;  %v4697_v57 = vadd.f32 %v4696_v1, %v4666_v37  ;;  %v4765_v59 = vadd.f32 %v4764_v9, %v4734_v40 }
 0x1f9   : > { %v6354_v60 = vpop.f32.mrf.mxu1  ;;  %v4434_v0 = vpop.f32.mrf.mxu0  ;;  %v4736_v56 = vmul.f32 %v4667_v19, %v4667_v19  ;;  %v6353_v20 = vadd.f32 %v6352_v13, %v6351_v55  ;;  %v7598_v55 = vld [vmem:[#allocation8_spill] sm:$0xff] }
 0x1fa   : > { %v4503_v62 = vpack.c.bf16 %v4443_v30, %v4440_v12  ;;  %v4435_v26 = vadd.f32 %v4434_v0, %v4274_v4  ;;  %v4698_v28 = vadd.f32 %v4697_v57, %v4667_v19  ;;  %v4766_v43 = vadd.f32 %v4765_v59, %v4735_v48  ;;  %v7600_v0 = vld [vmem:[#allocation6_spill] sm:$0xff] }
 0x1fb   : > { %v6355_v23 = vpop.f32.mrf.mxu1  ;;  %v6437_v25 = vpop.f32.mrf.mxu0  ;;  %v4303_v3 = vadd.f32 %v6353_v20, %v7600_v0 }
 0x1fc   : > { %5920 = vst [vmem:[%s7477_s30 + $0x48] sm:$0xff] %v4503_v62   ;;  %v4502_v24 = vpack.c.bf16 %v4435_v26, %v4432_v41  ;;  %v4699_v50 = vadd.f32 %v4698_v28, %v4668_v27  ;;  %v4767_v11 = vadd.f32 %v4766_v43, %v4736_v56  ;;  %v4456_v18 = vadd.f32 %v6437_v25, %v4295_v36  ;;  %v7599_v27 = vld [vmem:[#allocation9_spill] sm:$0xff] }
 0x1fd   : > { %v6357_v49 = vpop.f32.mrf.mxu1  ;;  %v4447_v44 = vpop.f32.mrf.mxu0  ;;  %v4672_v63 = vunpack.c.l.bf16 %v4503_v62  ;;  %v4673_v53 = vunpack.c.h.bf16 %v4503_v62  ;;  %v6356_v1 = vadd.f32 %v6355_v23, %v6354_v60 }
 0x1fe   : > { %5919 = vst [vmem:[%s7477_s30 + $0x40] sm:$0xff] %v4502_v24   ;;  %v4670_v54 = vunpack.c.l.bf16 %v4502_v24  ;;  %v4768_v38 = vadd.f32 %v4767_v11, %v4737_v31  ;;  %v4671_v15 = vunpack.c.h.bf16 %v4502_v24  ;;  %v4700_v58 = vadd.f32 %v4699_v50, %v4669_v33  ;;  %v7601_v24 = vld [vmem:[#allocation7_spill] sm:$0xff] }
 0x1ff   : > { %v6358_v7 = vpop.f32.mrf.mxu1  ;;  %v6438_v45 = vpop.f32.mrf.mxu0  ;;  %v4448_v46 = vadd.f32 %v4447_v44, %v4287_v16  ;;  %v4741_v48 = vmul.f32 %v4672_v63, %v4672_v63  ;;  %v4742_v62 = vmul.f32 %v4673_v53, %v4673_v53 }
 0x200   : > { %v4739_v34 = vmul.f32 %v4670_v54, %v4670_v54  ;;  %v6359_v52 = vadd.f32 %v6358_v7, %v6357_v49  ;;  %v4459_v17 = vadd.f32 %v6438_v45, %v4298_v6  ;;  %v4701_v39 = vadd.f32 %v4700_v58, %v4670_v54 }
 0x201   : > { %v6360_v5 = vpop.f32.mrf.mxu1  ;;  %v4769_v14 = vadd.f32 %v4768_v38, %v4738_v61  ;;  %v4450_v2 = vpop.f32.mrf.mxu0  ;;  %v4740_v10 = vmul.f32 %v4671_v15, %v4671_v15  ;;  %v4306_v49 = vadd.f32 %v6356_v1, %v7601_v24 }
 0x202   : > { %v4505_v4 = vpack.c.bf16 %v4459_v17, %v4456_v18  ;;  %v4451_v22 = vadd.f32 %v4450_v2, %v4290_v32  ;;  %v4702_v29 = vadd.f32 %v4701_v39, %v4671_v15  ;;  %v4311_v13 = vadd.f32 %v6359_v52, %v7598_v55 }
 0x203   : > { %v6361_v37 = vpop.f32.mrf.mxu1  ;;  %v4770_v40 = vadd.f32 %v4769_v14, %v4739_v34  ;;  %v6441_v19 = vpop.f32.mrf.mxu0 }
 0x204   : > { %v6362_v9 = vadd.f32 %v6361_v37, %v6360_v5  ;;  %5922 = vst [vmem:[%s7477_s30 + $0x58] sm:$0xff] %v4505_v4   ;;  %v4504_v47 = vpack.c.bf16 %v4451_v22, %v4448_v46  ;;  %v4703_v12 = vadd.f32 %v4702_v29, %v4672_v63  ;;  %v4472_v56 = vadd.f32 %v6441_v19, %v4311_v13  ;;  %v7602_v22 = vld [vmem:[#allocation10_spill] sm:$0xff] }
 0x205   : > { %v6363_v8 = vpop.f32.mrf.mxu1  ;;  %v4771_v30 = vadd.f32 %v4770_v40, %v4740_v10  ;;  %v4463_v51 = vpop.f32.mrf.mxu0  ;;  %v4676_v31 = vunpack.c.l.bf16 %v4505_v4  ;;  %v4677_v42 = vunpack.c.h.bf16 %v4505_v4  ;;  %v7603_v10 = vld [vmem:[#allocation11_spill] sm:$0xff] }
 0x206   : > { %v4314_v57 = vadd.f32 %v6362_v9, %v7599_v27  ;;  %5921 = vst [vmem:[%s7477_s30 + $0x50] sm:$0xff] %v4504_v47   ;;  %v4674_v59 = vunpack.c.l.bf16 %v4504_v47  ;;  %v4675_v33 = vunpack.c.h.bf16 %v4504_v47  ;;  %v4704_v60 = vadd.f32 %v4703_v12, %v4673_v53  ;;  %v7604_v27 = vld [vmem:[#allocation12_spill] sm:$0xff] }
 0x207   : > { %v6364_v41 = vpop.f32.mrf.mxu1  ;;  %v4772_v26 = vadd.f32 %v4771_v30, %v4741_v48  ;;  %v6442_v23 = vpop.f32.mrf.mxu0  ;;  %v4464_v44 = vadd.f32 %v4463_v51, %v4303_v3  ;;  %v4745_v34 = vmul.f32 %v4676_v31, %v4676_v31  ;;  %v4746_v39 = vmul.f32 %v4677_v42, %v4677_v42 }
 0x208   : > { %v4743_v28 = vmul.f32 %v4674_v59, %v4674_v59  ;;  %v4475_v43 = vadd.f32 %v6442_v23, %v4314_v57  ;;  %v4705_v50 = vadd.f32 %v4704_v60, %v4674_v59  ;;  %v4744_v35 = vmul.f32 %v4675_v33, %v4675_v33 }
 0x209   : > { %v6366_v25 = vpop.f32.mrf.mxu1  ;;  %v4773_v11 = vadd.f32 %v4772_v26, %v4742_v62  ;;  %v4466_v16 = vpop.f32.mrf.mxu0  ;;  %v6365_v38 = vadd.f32 %v6364_v41, %v6363_v8 }
 0x20a   : > { %v4507_v54 = vpack.c.bf16 %v4475_v43, %v4472_v56  ;;  %v4467_v36 = vadd.f32 %v4466_v16, %v4306_v49  ;;  %v4706_v6 = vadd.f32 %v4705_v50, %v4675_v33 }
 0x20b   : > { %v6367_v7 = vpop.f32.mrf.mxu1  ;;  %v4774_v32 = vadd.f32 %v4773_v11, %v4743_v28  ;;  %v6445_v61 = vpop.f32.mrf.mxu0  ;;  %v4319_v37 = vadd.f32 %v6365_v38, %v7602_v22 }
 0x20c   : > { %5924 = vst [vmem:[%s7477_s30 + $0x68] sm:$0xff] %v4507_v54   ;;  %v4506_v15 = vpack.c.bf16 %v4467_v36, %v4464_v44  ;;  %v6368_v58 = vadd.f32 %v6367_v7, %v6366_v25  ;;  %v4707_v18 = vadd.f32 %v4706_v6, %v4676_v31  ;;  %v4680_v9 = vunpack.c.l.bf16 %v4507_v54 }
 0x20d   : > { %v6369_v45 = vpop.f32.mrf.mxu1  ;;  %v4775_v52 = vadd.f32 %v4774_v32, %v4744_v35  ;;  %v4479_v17 = vpop.f32.mrf.mxu0  ;;  %v4681_v55 = vunpack.c.h.bf16 %v4507_v54 }
 0x20e   : > { %5923 = vst [vmem:[%s7477_s30 + $0x60] sm:$0xff] %v4506_v15   ;;  %v4678_v5 = vunpack.c.l.bf16 %v4506_v15  ;;  %v4679_v20 = vunpack.c.h.bf16 %v4506_v15  ;;  %v4708_v2 = vadd.f32 %v4707_v18, %v4677_v42  ;;  %v4322_v40 = vadd.f32 %v6368_v58, %v7603_v10 }
 0x20f   : > { %v6370_v63 = vpop.f32.mrf.mxu1  ;;  %v4776_v14 = vadd.f32 %v4775_v52, %v4745_v34  ;;  %v6446_v46 = vpop.f32.mrf.mxu0  ;;  %v4480_v8 = vadd.f32 %v4479_v17, %v4319_v37  ;;  %v4749_v3 = vmul.f32 %v4680_v9, %v4680_v9  ;;  %v4750_v33 = vmul.f32 %v4681_v55, %v4681_v55 }
 0x210   : > { %v6371_v53 = vadd.f32 %v6370_v63, %v6369_v45  ;;  %v4747_v4 = vmul.f32 %v4678_v5, %v4678_v5  ;;  %v4709_v19 = vadd.f32 %v4708_v2, %v4678_v5  ;;  %v4748_v13 = vmul.f32 %v4679_v20, %v4679_v20 }
 0x211   : > { %v6372_v29 = vpop.f32.mrf.mxu1  ;;  %v4777_v1 = vadd.f32 %v4776_v14, %v4746_v39  ;;  %v4482_v47 = vpop.f32.mrf.mxu0 }
 0x212   : > { %v4483_v48 = vadd.f32 %v4482_v47, %v4322_v40  ;;  %v4710_v30 = vadd.f32 %v4709_v19, %v4679_v20  ;;  %v4327_v57 = vadd.f32 %v6371_v53, %v7604_v27 }
 0x213   : > { %v6373_v12 = vpop.f32.mrf.mxu1  ;;  %v4778_v51 = vadd.f32 %v4777_v1, %v4747_v4 }
 0x214   : > { %v6374_v59 = vadd.f32 %v6373_v12, %v6372_v29  ;;  %v4508_v0 = vpack.c.bf16 %v4483_v48, %v4480_v8  ;;  %v4711_v41 = vadd.f32 %v4710_v30, %v4680_v9  ;;  %v4488_v56 = vadd.f32 %v6445_v61, %v4327_v57 }
 0x215   : > { %v4779_v62 = vadd.f32 %v4778_v51, %v4748_v13 }
 0x216   : > { %v4330_v26 = vadd.f32 %v6374_v59, %v7459_v21  ;;  %5925 = vst [vmem:[%s7477_s30 + $0x70] sm:$0xff] %v4508_v0   ;;  %v4682_v60 = vunpack.c.l.bf16 %v4508_v0  ;;  %v4683_v23 = vunpack.c.h.bf16 %v4508_v0  ;;  %v4712_v43 = vadd.f32 %v4711_v41, %v4681_v55 }
 0x217   : > { %v4780_v28 = vadd.f32 %v4779_v62, %v4749_v3 }
 0x218   : > { %v4491_v25 = vadd.f32 %v6446_v46, %v4330_v26  ;;  %v4751_v24 = vmul.f32 %v4682_v60, %v4682_v60  ;;  %v4713_v49 = vadd.f32 %v4712_v43, %v4682_v60  ;;  %v4752_v11 = vmul.f32 %v4683_v23, %v4683_v23 }
 0x219   : > { %v4781_v31 = vadd.f32 %v4780_v28, %v4750_v33 }
 0x21a   : > { %v4509_v50 = vpack.c.bf16 %v4491_v25, %v4488_v56  ;;  %v4714_v16 = vadd.f32 %v4713_v49, %v4683_v23 }
 0x21b   : > { %v4782_v44 = vadd.f32 %v4781_v31, %v4751_v24 }
 0x21c   : > { %5926 = vst [vmem:[%s7477_s30 + $0x78] sm:$0xff] %v4509_v50   ;;  %v4684_v54 = vunpack.c.l.bf16 %v4509_v50  ;;  %v4685_v36 = vunpack.c.h.bf16 %v4509_v50 }
 0x21d   : > { %v4783_v21 = vadd.f32 %v4782_v44, %v4752_v11 }
 0x21e   : > { %v4715_v7 = vadd.f32 %v4714_v16, %v4684_v54  ;;  %v4753_v42 = vmul.f32 %v4684_v54, %v4684_v54  ;;  %v4754_v35 = vmul.f32 %v4685_v36, %v4685_v36 }
 0x220   : > { %v4716_v6 = vadd.f32 %v4715_v7, %v4685_v36  ;;  %v4784_v32 = vadd.f32 %v4783_v21, %v4753_v42 }
 0x222   : > { %v4717_v61 = vrot.slane %v4716_v6, 4  ;;  %v4785_v38 = vadd.f32 %v4784_v32, %v4754_v35 }
 0x224   : > { %v4718_v15 = vadd.f32 %v4717_v61, %v4716_v6  ;;  %v4786_v58 = vrot.slane %v4785_v38, 4 }
 0x226   : > { %v4719_v45 = vrot.slane %v4718_v15, 2  ;;  %v4787_v34 = vadd.f32 %v4786_v58, %v4785_v38 }
 0x228   : > { %v4720_v18 = vadd.f32 %v4719_v45, %v4718_v15  ;;  %v4788_v52 = vrot.slane %v4787_v34, 2 }
 0x22a   : > { %v4721_v17 = vrot.slane %v4720_v18, 1  ;;  %v4789_v5 = vadd.f32 %v4788_v52, %v4787_v34 }
 0x22c   : > { %v4790_v20 = vrot.slane %v4789_v5, 1  ;;  %v4722_v63 = vadd.f32 %v4721_v17, %v4720_v18 }
 0x22e   : > { %v4791_v39 = vadd.f32 %v4790_v20, %v4789_v5 }
 0x230   : > { %v4793_v14 = vsel %vm4792_vm0, %v4722_v63, %v4791_v39 }
 0x231   : > { %4794 = vst [vmem:[%s236_s10] sm:$0x3] %v4793_v14 }
 0x232 PF: > { %s16_s18 = sadd.s32 1, %s6761_s18  }
 0x233   : > { %p13_p5 = scmp.ge.s32.totalorder %s16_s18, 4  }
 0x235   :  { %15 = sbr.rel (!%p13_p5) target bundleno = 1 (0x1), region = 81 }

</bundles_post_ra>
